<compile_context>
chip_gen: v7x
topology: tpu7x:2x2x1
jax: 0.10.0
libtpu: 0.0.40
codegen_flags: <defaults>
</compile_context>

<pallas_src>
import functools

import jax
import jax.numpy as jnp
from jax.experimental import pallas as pl
from jax.experimental.pallas import tpu as pltpu

# ---------------- flag configuration ----------------
NPLANES = 3
N_INITIAL_FILTERS = 8
NETWORK_DEPTH = 2
RES_BLOCKS_PER_LAYER = 1
RES_BLOCKS_DEEPEST_LAYER = 1
RES_BLOCKS_FINAL = 1

LANE = 128          # TPU lane width; output channels padded to this
MAX_TM = 512        # M-tile (rows) per grid step, multiple of 8


def _round_up(x, m):
    return (x + m - 1) // m * m


# ---------------- Pallas fused matmul kernels ----------------
# One (tm, Npad) tile of:  out = act( x @ w  [+ residual] )
#   relu + pre-ReLU residual  -> residual-block epilogue  relu(conv(x) + r)
#   relu + post-ReLU residual -> U-Net 'sum' connection   relu(convT(x)) + r
def _mm_kernel(x_ref, w_ref, o_ref, *, relu):
    acc = jnp.dot(x_ref[...], w_ref[...], preferred_element_type=jnp.float32)
    if relu:
        acc = jnp.maximum(acc, 0.0)
    o_ref[...] = acc


def _mm_res_kernel(x_ref, w_ref, r_ref, o_ref, *, relu, post_relu_residual):
    acc = jnp.dot(x_ref[...], w_ref[...], preferred_element_type=jnp.float32)
    if post_relu_residual:
        if relu:
            acc = jnp.maximum(acc, 0.0)
        acc = acc + r_ref[...]            # SumConnection: x + residual
    else:
        acc = acc + r_ref[...]
        if relu:
            acc = jnp.maximum(acc, 0.0)
    o_ref[...] = acc


def fused_matmul(x, w, residual=None, relu=False, post_relu_residual=False):
    """x: (M, K) f32, w: (K, N) f32, residual: (M, N) f32 or None -> (M, N) f32.

    MXU runs in bf16 with f32 accumulation; residual add, ReLU and the stored
    output stay f32.  N is padded to a multiple of 128 for lane-dense stores;
    M is tiled over a parallel grid.
    """
    M, K = x.shape
    N = w.shape[1]
    tm = min(MAX_TM, _round_up(M, 8))
    Mp = _round_up(M, tm)
    Np = _round_up(N, LANE)

    xp = x if Mp == M else jnp.pad(x, ((0, Mp - M), (0, 0)))
    xp = xp.astype(jnp.bfloat16)
    wp = w if Np == N else jnp.pad(w, ((0, 0), (0, Np - N)))
    wp = wp.astype(jnp.bfloat16)

    x_spec = pl.BlockSpec((tm, K), lambda i: (i, 0))
    w_spec = pl.BlockSpec((K, Np), lambda i: (0, 0))   # constant block: staged once
    o_spec = pl.BlockSpec((tm, Np), lambda i: (i, 0))
    out_shape = jax.ShapeDtypeStruct((Mp, Np), jnp.float32)
    grid = (Mp // tm,)

    if residual is None:
        kernel = functools.partial(_mm_kernel, relu=relu)
        in_specs = [x_spec, w_spec]
        args = (xp, wp)
    else:
        rp = residual
        if Mp != M or Np != N:
            rp = jnp.pad(rp, ((0, Mp - M), (0, Np - N)))
        rp = rp.astype(jnp.float32)
        r_spec = pl.BlockSpec((tm, Np), lambda i: (i, 0))
        kernel = functools.partial(_mm_res_kernel, relu=relu,
                                   post_relu_residual=post_relu_residual)
        in_specs = [x_spec, w_spec, r_spec]
        args = (xp, wp, rp)

    out = pl.pallas_call(
        kernel,
        out_shape=out_shape,
        grid=grid,
        in_specs=in_specs,
        out_specs=o_spec,
        compiler_params=pltpu.CompilerParams(
            dimension_semantics=("parallel",),
            vmem_limit_bytes=32 * 1024 * 1024),
    )(*args)
    if Mp != M or Np != N:
        out = out[:M, :N]
    return out


# ---------------- convolution wrappers (glue in JAX, compute in Pallas) ----
def _im2col(x, k, stride, pad):
    # TODO(synk): move patch extraction inside the Pallas kernel (halo windows
    # from a VMEM-resident NHWC tile, k*k partial matmuls into an accumulator)
    # to remove the k*k HBM inflation of this materialized patch matrix.
    B, H, W, C = x.shape
    xp = jnp.pad(x, ((0, 0), (pad, pad), (pad, pad), (0, 0)))
    Ho = (H + 2 * pad - k) // stride + 1
    Wo = (W + 2 * pad - k) // stride + 1
    cols = []
    for ki in range(k):
        for kj in range(k):
            cols.append(xp[:, ki:ki + stride * Ho:stride,
                           kj:kj + stride * Wo:stride, :])
    patches = jnp.stack(cols, axis=3)          # (B, Ho, Wo, k*k, C)
    return patches.reshape(B * Ho * Wo, k * k * C), Ho, Wo


def conv2d(x, w, stride=1, padding=0, relu=False, residual=None):
    """NHWC conv (no bias). w is PyTorch layout (Cout, Cin, kH, kW)."""
    Cout, Cin, k, _ = w.shape
    B = x.shape[0]
    patches, Ho, Wo = _im2col(x, k, stride, padding)
    w2 = jnp.transpose(w, (2, 3, 1, 0)).reshape(k * k * Cin, Cout)
    r = None
    if residual is not None:
        r = residual.reshape(B * Ho * Wo, Cout)
    y = fused_matmul(patches, w2, residual=r, relu=relu,
                     post_relu_residual=False)
    return y.reshape(B, Ho, Wo, Cout)


def conv_transpose2d_2x2(x, w, relu=False, skip=None):
    """NHWC transposed conv, kernel 2x2 stride 2. w: (Cin, Cout, 2, 2).

    If `skip` (shape (B, 2H, 2W, Cout)) is given, the U-Net 'sum' connection
    relu(conv_transpose(x)) + skip is fused into the Pallas epilogue.
    """
    Cin, Cout = w.shape[0], w.shape[1]
    B, H, W, _ = x.shape
    x_flat = x.reshape(B * H * W, Cin)
    w2 = w.reshape(Cin, Cout * 4)              # (Cin, Cout*dh*dw)
    r = None
    if skip is not None:
        # bring the skip into pre-pixel-shuffle layout (B*H*W, Cout*2*2)
        r = skip.reshape(B, H, 2, W, 2, Cout)
        r = jnp.transpose(r, (0, 1, 3, 5, 2, 4)).reshape(B * H * W, Cout * 4)
    y = fused_matmul(x_flat, w2, residual=r, relu=relu,
                     post_relu_residual=True)
    y = y.reshape(B, H, W, Cout, 2, 2)
    y = jnp.transpose(y, (0, 1, 4, 2, 5, 3))   # (B, H, dh, W, dw, Cout)
    return y.reshape(B, 2 * H, 2 * W, Cout)


# ---------------- network structure (mirrors the PyTorch module) ----------
def residual_block(x, p):
    out = conv2d(x, p['conv1'], stride=1, padding=1, relu=True)
    # conv2 + residual add + ReLU fused in the Pallas matmul epilogue
    out = conv2d(out, p['conv2'], stride=1, padding=1, relu=True, residual=x)
    return out


def block_series(x, blocks):
    for p in blocks:
        x = residual_block(x, p)
    return x


def planes_to_channels(x, batch):
    """(batch*NPLANES, H, W, C) -> (batch, H, W, NPLANES*C) (concat order)."""
    _, H, W, C = x.shape
    x = x.reshape(batch, NPLANES, H, W, C)
    x = jnp.transpose(x, (0, 2, 3, 1, 4))
    return x.reshape(batch, H, W, NPLANES * C)


def channels_to_planes(x, batch):
    """(batch, H, W, NPLANES*C) -> (batch*NPLANES, H, W, C)."""
    B, H, W, NC = x.shape
    C = NC // NPLANES
    x = x.reshape(B, H, W, NPLANES, C)
    x = jnp.transpose(x, (0, 3, 1, 2, 4))
    return x.reshape(B * NPLANES, H, W, C)


def unet_core(x, p, depth, batch):
    # x: (batch*NPLANES, H, W, C); planes are folded onto the batch axis since
    # all planes share weights -> one pallas_call per layer instead of three.
    if depth == 1:
        # DeepestBlock with BLOCK_CONCAT=False: concat planes along channels
        xc = planes_to_channels(x, batch)
        xc = block_series(xc, p['blocks'])
        return channels_to_planes(xc, batch)
    residual = x                                 # CONNECT_PRE_RES_BLOCKS_DOWN
    x = block_series(x, p['down_blocks'])
    x = conv2d(x, p['downsample'], stride=2, padding=0, relu=True)
    x = unet_core(x, p['main_module'], depth - 1, batch)
    # upsample + ReLU + 'sum' connection (SumConnection) fused in one call
    x = conv_transpose2d_2x2(x, p['upsample'], relu=True, skip=residual)
    x = block_series(x, p['up_blocks'])          # CONNECT_PRE_RES_BLOCKS_UP
    return x


def uresnet_forward(params, x_nchw):
    """x_nchw: (B, NPLANES, H, W) -> (B, 3, NPLANES, H, W)."""
    B, _, H, W = x_nchw.shape
    # fold planes onto the batch axis (shared weights), channels-last, Cin=1
    x = x_nchw.reshape(B * NPLANES, 1, H, W)
    x = jnp.transpose(x, (0, 2, 3, 1))                          # NHWC
    x = conv2d(x, params['initial'], stride=1, padding=2)
    x = unet_core(x, params['net_core'], NETWORK_DEPTH, B)
    x = block_series(x, params['final_layer'])
    x = conv2d(x, params['bottleneck'], stride=1, padding=0)    # (B*P, H, W, 3)
    x = jnp.transpose(x, (0, 3, 1, 2))                          # (B*P, 3, H, W)
    x = x.reshape(B, NPLANES, 3, H, W)
    return jnp.transpose(x, (0, 2, 1, 3, 4))                    # (B, 3, P, H, W)


# ---------------- deterministic parameter initialization ------------------
def _kaiming(key, shape, fan_out):
    std = (2.0 / fan_out) ** 0.5
    return std * jax.random.normal(key, shape, dtype=jnp.float32)


def init_params(key):
    keys = iter(jax.random.split(key, 64))
    nf = N_INITIAL_FILTERS

    def make_conv(cout, cin, k):
        return _kaiming(next(keys), (cout, cin, k, k), cout * k * k)

    def make_convT(cin, cout, k):
        return _kaiming(next(keys), (cin, cout, k, k), cin * k * k)

    def res_block_params(c):
        return {'conv1': make_conv(c, c, 3), 'conv2': make_conv(c, c, 3)}

    def block_series_params(c, n):
        return [res_block_params(c) for _ in range(n)]

    def unet_core_params(depth, inplanes):
        if depth == 1:
            return {'blocks': block_series_params(NPLANES * inplanes,
                                                  RES_BLOCKS_DEEPEST_LAYER)}
        nf_next = inplanes * 2  # multiplicative growth
        return {
            'down_blocks': block_series_params(inplanes, RES_BLOCKS_PER_LAYER),
            'downsample': make_conv(nf_next, inplanes, 2),
            'main_module': unet_core_params(depth - 1, nf_next),
            'upsample': make_convT(nf_next, inplanes, 2),
            'up_blocks': block_series_params(inplanes, RES_BLOCKS_PER_LAYER),
        }

    return {
        'initial': make_conv(nf, 1, 5),
        'net_core': unet_core_params(NETWORK_DEPTH, nf),
        'final_layer': block_series_params(nf, RES_BLOCKS_FINAL),
        'bottleneck': make_conv(3, nf, 1),
    }


if __name__ == "__main__":
    key = jax.random.PRNGKey(0)
    pkey, xkey = jax.random.split(key)
    params = init_params(pkey)
    x = jax.random.normal(xkey, (2, NPLANES, 16, 16), dtype=jnp.float32)

    fwd = jax.jit(uresnet_forward)
    out = fwd(params, x)
    jax.block_until_ready(out)
    assert out.shape == (2, 3, NPLANES, 16, 16), out.shape
    assert out.dtype == jnp.float32
    print("KERNEL_OK")
</pallas_src>

<mosaic_0001>
module attributes {stable_mosaic.version = 11 : i64} {
  func.func @_mm_kernel(%arg0: i32, %arg1: memref<512x25xbf16, #tpu.memory_space<vmem>>, %arg2: memref<25x128xbf16, #tpu.memory_space<vmem>>, %arg3: memref<512x128xf32, #tpu.memory_space<vmem>>) attributes {dimension_semantics = [#tpu.dimension_semantics<parallel>], iteration_bounds = array<i64: 3>, scalar_prefetch = 0 : i64, scratch_operands = 0 : i64, tpu.core_type = #tpu.core_type<tc>, window_params = [{transform_indices = @transform_0, window_bounds = array<i64: 512, 25>}, {pipeline_mode = #tpu.pipeline_mode<synchronous>, transform_indices = @transform_1, window_bounds = array<i64: 25, 128>}, {transform_indices = @transform_2, window_bounds = array<i64: 512, 128>}]} {
    %c0 = arith.constant 0 : index
    %c0_0 = arith.constant 0 : index
    %0 = vector.load %arg1[%c0, %c0_0] : memref<512x25xbf16, #tpu.memory_space<vmem>>, vector<512x25xbf16>
    %c0_1 = arith.constant 0 : index
    %c0_2 = arith.constant 0 : index
    %1 = vector.load %arg2[%c0_1, %c0_2] : memref<25x128xbf16, #tpu.memory_space<vmem>>, vector<25x128xbf16>
    %cst = arith.constant dense<0.000000e+00> : vector<512x128xf32>
    %2 = tpu.matmul %0, %1, %cst {dimension_numbers = #tpu.dot_dimension_numbers<[1], [0], [0], [1], [0, 0, 1, 1], [], []>} : vector<512x25xbf16>, vector<25x128xbf16>, vector<512x128xf32> -> vector<512x128xf32>
    %c0_3 = arith.constant 0 : index
    %c0_4 = arith.constant 0 : index
    %3 = vector.load %arg3[%c0_3, %c0_4] : memref<512x128xf32, #tpu.memory_space<vmem>>, vector<512x128xf32>
    tpu.vector_store %arg3[%c0_3, %c0_4], %2 {strides = array<i32>} : memref<512x128xf32, #tpu.memory_space<vmem>>, vector<512x128xf32>,
    return
  }
  func.func @transform_0(%arg0: i32) -> (i32, i32) {
    %c0_i32 = arith.constant 0 : i32
    %c0_i32_0 = arith.constant 0 : i32
    return %arg0, %c0_i32 : i32, i32
  }
  func.func @transform_1(%arg0: i32) -> (i32, i32) {
    %c0_i32 = arith.constant 0 : i32
    %c0_i32_0 = arith.constant 0 : i32
    %c0_i32_1 = arith.constant 0 : i32
    return %c0_i32, %c0_i32_0 : i32, i32
  }
  func.func @transform_2(%arg0: i32) -> (i32, i32) {
    %c0_i32 = arith.constant 0 : i32
    %c0_i32_0 = arith.constant 0 : i32
    return %arg0, %c0_i32 : i32, i32
  }
}

module attributes {stable_mosaic.version = 11 : i64} {
  func.func @_mm_kernel(%arg0: i32, %arg1: memref<512x72xbf16, #tpu.memory_space<vmem>>, %arg2: memref<72x128xbf16, #tpu.memory_space<vmem>>, %arg3: memref<512x128xf32, #tpu.memory_space<vmem>>) attributes {dimension_semantics = [#tpu.dimension_semantics<parallel>], iteration_bounds = array<i64: 3>, scalar_prefetch = 0 : i64, scratch_operands = 0 : i64, tpu.core_type = #tpu.core_type<tc>, window_params = [{transform_indices = @transform_0, window_bounds = array<i64: 512, 72>}, {pipeline_mode = #tpu.pipeline_mode<synchronous>, transform_indices = @transform_1, window_bounds = array<i64: 72, 128>}, {transform_indices = @transform_2, window_bounds = array<i64: 512, 128>}]} {
    %c0 = arith.constant 0 : index
    %c0_0 = arith.constant 0 : index
    %0 = vector.load %arg1[%c0, %c0_0] : memref<512x72xbf16, #tpu.memory_space<vmem>>, vector<512x72xbf16>
    %c0_1 = arith.constant 0 : index
    %c0_2 = arith.constant 0 : index
    %1 = vector.load %arg2[%c0_1, %c0_2] : memref<72x128xbf16, #tpu.memory_space<vmem>>, vector<72x128xbf16>
    %cst = arith.constant dense<0.000000e+00> : vector<512x128xf32>
    %2 = tpu.matmul %0, %1, %cst {dimension_numbers = #tpu.dot_dimension_numbers<[1], [0], [0], [1], [0, 0, 1, 1], [], []>} : vector<512x72xbf16>, vector<72x128xbf16>, vector<512x128xf32> -> vector<512x128xf32>
    %cst_3 = arith.constant 0.000000e+00 : f32
    %3 = vector.broadcast %cst_3 : f32 to vector<512x128xf32>
    %4 = arith.maximumf %2, %3 : vector<512x128xf32>
    %c0_4 = arith.constant 0 : index
    %c0_5 = arith.constant 0 : index
    %5 = vector.load %arg3[%c0_4, %c0_5] : memref<512x128xf32, #tpu.memory_space<vmem>>, vector<512x128xf32>
    tpu.vector_store %arg3[%c0_4, %c0_5], %4 {strides = array<i32>} : memref<512x128xf32, #tpu.memory_space<vmem>>, vector<512x128xf32>,
    return
  }
  func.func @transform_0(%arg0: i32) -> (i32, i32) {
    %c0_i32 = arith.constant 0 : i32
    %c0_i32_0 = arith.constant 0 : i32
    return %arg0, %c0_i32 : i32, i32
  }
  func.func @transform_1(%arg0: i32) -> (i32, i32) {
    %c0_i32 = arith.constant 0 : i32
    %c0_i32_0 = arith.constant 0 : i32
    %c0_i32_1 = arith.constant 0 : i32
    return %c0_i32, %c0_i32_0 : i32, i32
  }
  func.func @transform_2(%arg0: i32) -> (i32, i32) {
    %c0_i32 = arith.constant 0 : i32
    %c0_i32_0 = arith.constant 0 : i32
    return %arg0, %c0_i32 : i32, i32
  }
}

module attributes {stable_mosaic.version = 11 : i64} {
  func.func @_mm_res_kernel(%arg0: i32, %arg1: memref<512x72xbf16, #tpu.memory_space<vmem>>, %arg2: memref<72x128xbf16, #tpu.memory_space<vmem>>, %arg3: memref<512x128xf32, #tpu.memory_space<vmem>>, %arg4: memref<512x128xf32, #tpu.memory_space<vmem>>) attributes {dimension_semantics = [#tpu.dimension_semantics<parallel>], iteration_bounds = array<i64: 3>, scalar_prefetch = 0 : i64, scratch_operands = 0 : i64, tpu.core_type = #tpu.core_type<tc>, window_params = [{transform_indices = @transform_0, window_bounds = array<i64: 512, 72>}, {pipeline_mode = #tpu.pipeline_mode<synchronous>, transform_indices = @transform_1, window_bounds = array<i64: 72, 128>}, {transform_indices = @transform_2, window_bounds = array<i64: 512, 128>}, {transform_indices = @transform_3, window_bounds = array<i64: 512, 128>}]} {
    %c0 = arith.constant 0 : index
    %c0_0 = arith.constant 0 : index
    %0 = vector.load %arg1[%c0, %c0_0] : memref<512x72xbf16, #tpu.memory_space<vmem>>, vector<512x72xbf16>
    %c0_1 = arith.constant 0 : index
    %c0_2 = arith.constant 0 : index
    %1 = vector.load %arg2[%c0_1, %c0_2] : memref<72x128xbf16, #tpu.memory_space<vmem>>, vector<72x128xbf16>
    %cst = arith.constant dense<0.000000e+00> : vector<512x128xf32>
    %2 = tpu.matmul %0, %1, %cst {dimension_numbers = #tpu.dot_dimension_numbers<[1], [0], [0], [1], [0, 0, 1, 1], [], []>} : vector<512x72xbf16>, vector<72x128xbf16>, vector<512x128xf32> -> vector<512x128xf32>
    %c0_3 = arith.constant 0 : index
    %c0_4 = arith.constant 0 : index
    %3 = vector.load %arg3[%c0_3, %c0_4] : memref<512x128xf32, #tpu.memory_space<vmem>>, vector<512x128xf32>
    %4 = arith.addf %2, %3 : vector<512x128xf32>
    %cst_5 = arith.constant 0.000000e+00 : f32
    %5 = vector.broadcast %cst_5 : f32 to vector<512x128xf32>
    %6 = arith.maximumf %4, %5 : vector<512x128xf32>
    %c0_6 = arith.constant 0 : index
    %c0_7 = arith.constant 0 : index
    %7 = vector.load %arg4[%c0_6, %c0_7] : memref<512x128xf32, #tpu.memory_space<vmem>>, vector<512x128xf32>
    tpu.vector_store %arg4[%c0_6, %c0_7], %6 {strides = array<i32>} : memref<512x128xf32, #tpu.memory_space<vmem>>, vector<512x128xf32>,
    return
  }
  func.func @transform_0(%arg0: i32) -> (i32, i32) {
    %c0_i32 = arith.constant 0 : i32
    %c0_i32_0 = arith.constant 0 : i32
    return %arg0, %c0_i32 : i32, i32
  }
  func.func @transform_1(%arg0: i32) -> (i32, i32) {
    %c0_i32 = arith.constant 0 : i32
    %c0_i32_0 = arith.constant 0 : i32
    %c0_i32_1 = arith.constant 0 : i32
    return %c0_i32, %c0_i32_0 : i32, i32
  }
  func.func @transform_2(%arg0: i32) -> (i32, i32) {
    %c0_i32 = arith.constant 0 : i32
    %c0_i32_0 = arith.constant 0 : i32
    return %arg0, %c0_i32 : i32, i32
  }
  func.func @transform_3(%arg0: i32) -> (i32, i32) {
    %c0_i32 = arith.constant 0 : i32
    %c0_i32_0 = arith.constant 0 : i32
    return %arg0, %c0_i32 : i32, i32
  }
}

module attributes {stable_mosaic.version = 11 : i64} {
  func.func @_mm_kernel(%arg0: i32, %arg1: memref<384x32xbf16, #tpu.memory_space<vmem>>, %arg2: memref<32x128xbf16, #tpu.memory_space<vmem>>, %arg3: memref<384x128xf32, #tpu.memory_space<vmem>>) attributes {dimension_semantics = [#tpu.dimension_semantics<parallel>], iteration_bounds = array<i64: 1>, scalar_prefetch = 0 : i64, scratch_operands = 0 : i64, tpu.core_type = #tpu.core_type<tc>, window_params = [{transform_indices = @transform_0, window_bounds = array<i64: 384, 32>}, {pipeline_mode = #tpu.pipeline_mode<synchronous>, transform_indices = @transform_1, window_bounds = array<i64: 32, 128>}, {transform_indices = @transform_2, window_bounds = array<i64: 384, 128>}]} {
    %c0 = arith.constant 0 : index
    %c0_0 = arith.constant 0 : index
    %0 = vector.load %arg1[%c0, %c0_0] : memref<384x32xbf16, #tpu.memory_space<vmem>>, vector<384x32xbf16>
    %c0_1 = arith.constant 0 : index
    %c0_2 = arith.constant 0 : index
    %1 = vector.load %arg2[%c0_1, %c0_2] : memref<32x128xbf16, #tpu.memory_space<vmem>>, vector<32x128xbf16>
    %cst = arith.constant dense<0.000000e+00> : vector<384x128xf32>
    %2 = tpu.matmul %0, %1, %cst {dimension_numbers = #tpu.dot_dimension_numbers<[1], [0], [0], [1], [0, 0, 1, 1], [], []>} : vector<384x32xbf16>, vector<32x128xbf16>, vector<384x128xf32> -> vector<384x128xf32>
    %cst_3 = arith.constant 0.000000e+00 : f32
    %3 = vector.broadcast %cst_3 : f32 to vector<384x128xf32>
    %4 = arith.maximumf %2, %3 : vector<384x128xf32>
    %c0_4 = arith.constant 0 : index
    %c0_5 = arith.constant 0 : index
    %5 = vector.load %arg3[%c0_4, %c0_5] : memref<384x128xf32, #tpu.memory_space<vmem>>, vector<384x128xf32>
    tpu.vector_store %arg3[%c0_4, %c0_5], %4 {strides = array<i32>} : memref<384x128xf32, #tpu.memory_space<vmem>>, vector<384x128xf32>,
    return
  }
  func.func @transform_0(%arg0: i32) -> (i32, i32) {
    %c0_i32 = arith.constant 0 : i32
    %c0_i32_0 = arith.constant 0 : i32
    return %arg0, %c0_i32 : i32, i32
  }
  func.func @transform_1(%arg0: i32) -> (i32, i32) {
    %c0_i32 = arith.constant 0 : i32
    %c0_i32_0 = arith.constant 0 : i32
    %c0_i32_1 = arith.constant 0 : i32
    return %c0_i32, %c0_i32_0 : i32, i32
  }
  func.func @transform_2(%arg0: i32) -> (i32, i32) {
    %c0_i32 = arith.constant 0 : i32
    %c0_i32_0 = arith.constant 0 : i32
    return %arg0, %c0_i32 : i32, i32
  }
}

module attributes {stable_mosaic.version = 11 : i64} {
  func.func @_mm_kernel(%arg0: i32, %arg1: memref<128x432xbf16, #tpu.memory_space<vmem>>, %arg2: memref<432x128xbf16, #tpu.memory_space<vmem>>, %arg3: memref<128x128xf32, #tpu.memory_space<vmem>>) attributes {dimension_semantics = [#tpu.dimension_semantics<parallel>], iteration_bounds = array<i64: 1>, scalar_prefetch = 0 : i64, scratch_operands = 0 : i64, tpu.core_type = #tpu.core_type<tc>, window_params = [{transform_indices = @transform_0, window_bounds = array<i64: 128, 432>}, {pipeline_mode = #tpu.pipeline_mode<synchronous>, transform_indices = @transform_1, window_bounds = array<i64: 432, 128>}, {transform_indices = @transform_2, window_bounds = array<i64: 128, 128>}]} {
    %c0 = arith.constant 0 : index
    %c0_0 = arith.constant 0 : index
    %0 = vector.load %arg1[%c0, %c0_0] : memref<128x432xbf16, #tpu.memory_space<vmem>>, vector<128x432xbf16>
    %c0_1 = arith.constant 0 : index
    %c0_2 = arith.constant 0 : index
    %1 = vector.load %arg2[%c0_1, %c0_2] : memref<432x128xbf16, #tpu.memory_space<vmem>>, vector<432x128xbf16>
    %cst = arith.constant dense<0.000000e+00> : vector<128x128xf32>
    %2 = tpu.matmul %0, %1, %cst {dimension_numbers = #tpu.dot_dimension_numbers<[1], [0], [0], [1], [0, 0, 1, 1], [], []>} : vector<128x432xbf16>, vector<432x128xbf16>, vector<128x128xf32> -> vector<128x128xf32>
    %cst_3 = arith.constant 0.000000e+00 : f32
    %3 = vector.broadcast %cst_3 : f32 to vector<128x128xf32>
    %4 = arith.maximumf %2, %3 : vector<128x128xf32>
    %c0_4 = arith.constant 0 : index
    %c0_5 = arith.constant 0 : index
    %5 = vector.load %arg3[%c0_4, %c0_5] : memref<128x128xf32, #tpu.memory_space<vmem>>, vector<128x128xf32>
    tpu.vector_store %arg3[%c0_4, %c0_5], %4 {strides = array<i32>} : memref<128x128xf32, #tpu.memory_space<vmem>>, vector<128x128xf32>,
    return
  }
  func.func @transform_0(%arg0: i32) -> (i32, i32) {
    %c0_i32 = arith.constant 0 : i32
    %c0_i32_0 = arith.constant 0 : i32
    return %arg0, %c0_i32 : i32, i32
  }
  func.func @transform_1(%arg0: i32) -> (i32, i32) {
    %c0_i32 = arith.constant 0 : i32
    %c0_i32_0 = arith.constant 0 : i32
    %c0_i32_1 = arith.constant 0 : i32
    return %c0_i32, %c0_i32_0 : i32, i32
  }
  func.func @transform_2(%arg0: i32) -> (i32, i32) {
    %c0_i32 = arith.constant 0 : i32
    %c0_i32_0 = arith.constant 0 : i32
    return %arg0, %c0_i32 : i32, i32
  }
}

module attributes {stable_mosaic.version = 11 : i64} {
  func.func @_mm_res_kernel(%arg0: i32, %arg1: memref<128x432xbf16, #tpu.memory_space<vmem>>, %arg2: memref<432x128xbf16, #tpu.memory_space<vmem>>, %arg3: memref<128x128xf32, #tpu.memory_space<vmem>>, %arg4: memref<128x128xf32, #tpu.memory_space<vmem>>) attributes {dimension_semantics = [#tpu.dimension_semantics<parallel>], iteration_bounds = array<i64: 1>, scalar_prefetch = 0 : i64, scratch_operands = 0 : i64, tpu.core_type = #tpu.core_type<tc>, window_params = [{transform_indices = @transform_0, window_bounds = array<i64: 128, 432>}, {pipeline_mode = #tpu.pipeline_mode<synchronous>, transform_indices = @transform_1, window_bounds = array<i64: 432, 128>}, {transform_indices = @transform_2, window_bounds = array<i64: 128, 128>}, {transform_indices = @transform_3, window_bounds = array<i64: 128, 128>}]} {
    %c0 = arith.constant 0 : index
    %c0_0 = arith.constant 0 : index
    %0 = vector.load %arg1[%c0, %c0_0] : memref<128x432xbf16, #tpu.memory_space<vmem>>, vector<128x432xbf16>
    %c0_1 = arith.constant 0 : index
    %c0_2 = arith.constant 0 : index
    %1 = vector.load %arg2[%c0_1, %c0_2] : memref<432x128xbf16, #tpu.memory_space<vmem>>, vector<432x128xbf16>
    %cst = arith.constant dense<0.000000e+00> : vector<128x128xf32>
    %2 = tpu.matmul %0, %1, %cst {dimension_numbers = #tpu.dot_dimension_numbers<[1], [0], [0], [1], [0, 0, 1, 1], [], []>} : vector<128x432xbf16>, vector<432x128xbf16>, vector<128x128xf32> -> vector<128x128xf32>
    %c0_3 = arith.constant 0 : index
    %c0_4 = arith.constant 0 : index
    %3 = vector.load %arg3[%c0_3, %c0_4] : memref<128x128xf32, #tpu.memory_space<vmem>>, vector<128x128xf32>
    %4 = arith.addf %2, %3 : vector<128x128xf32>
    %cst_5 = arith.constant 0.000000e+00 : f32
    %5 = vector.broadcast %cst_5 : f32 to vector<128x128xf32>
    %6 = arith.maximumf %4, %5 : vector<128x128xf32>
    %c0_6 = arith.constant 0 : index
    %c0_7 = arith.constant 0 : index
    %7 = vector.load %arg4[%c0_6, %c0_7] : memref<128x128xf32, #tpu.memory_space<vmem>>, vector<128x128xf32>
    tpu.vector_store %arg4[%c0_6, %c0_7], %6 {strides = array<i32>} : memref<128x128xf32, #tpu.memory_space<vmem>>, vector<128x128xf32>,
    return
  }
  func.func @transform_0(%arg0: i32) -> (i32, i32) {
    %c0_i32 = arith.constant 0 : i32
    %c0_i32_0 = arith.constant 0 : i32
    return %arg0, %c0_i32 : i32, i32
  }
  func.func @transform_1(%arg0: i32) -> (i32, i32) {
    %c0_i32 = arith.constant 0 : i32
    %c0_i32_0 = arith.constant 0 : i32
    %c0_i32_1 = arith.constant 0 : i32
    return %c0_i32, %c0_i32_0 : i32, i32
  }
  func.func @transform_2(%arg0: i32) -> (i32, i32) {
    %c0_i32 = arith.constant 0 : i32
    %c0_i32_0 = arith.constant 0 : i32
    return %arg0, %c0_i32 : i32, i32
  }
  func.func @transform_3(%arg0: i32) -> (i32, i32) {
    %c0_i32 = arith.constant 0 : i32
    %c0_i32_0 = arith.constant 0 : i32
    return %arg0, %c0_i32 : i32, i32
  }
}

module attributes {stable_mosaic.version = 11 : i64} {
  func.func @_mm_res_kernel(%arg0: i32, %arg1: memref<384x16xbf16, #tpu.memory_space<vmem>>, %arg2: memref<16x128xbf16, #tpu.memory_space<vmem>>, %arg3: memref<384x128xf32, #tpu.memory_space<vmem>>, %arg4: memref<384x128xf32, #tpu.memory_space<vmem>>) attributes {dimension_semantics = [#tpu.dimension_semantics<parallel>], iteration_bounds = array<i64: 1>, scalar_prefetch = 0 : i64, scratch_operands = 0 : i64, tpu.core_type = #tpu.core_type<tc>, window_params = [{transform_indices = @transform_0, window_bounds = array<i64: 384, 16>}, {pipeline_mode = #tpu.pipeline_mode<synchronous>, transform_indices = @transform_1, window_bounds = array<i64: 16, 128>}, {transform_indices = @transform_2, window_bounds = array<i64: 384, 128>}, {transform_indices = @transform_3, window_bounds = array<i64: 384, 128>}]} {
    %c0 = arith.constant 0 : index
    %c0_0 = arith.constant 0 : index
    %0 = vector.load %arg1[%c0, %c0_0] : memref<384x16xbf16, #tpu.memory_space<vmem>>, vector<384x16xbf16>
    %c0_1 = arith.constant 0 : index
    %c0_2 = arith.constant 0 : index
    %1 = vector.load %arg2[%c0_1, %c0_2] : memref<16x128xbf16, #tpu.memory_space<vmem>>, vector<16x128xbf16>
    %cst = arith.constant dense<0.000000e+00> : vector<384x128xf32>
    %2 = tpu.matmul %0, %1, %cst {dimension_numbers = #tpu.dot_dimension_numbers<[1], [0], [0], [1], [0, 0, 1, 1], [], []>} : vector<384x16xbf16>, vector<16x128xbf16>, vector<384x128xf32> -> vector<384x128xf32>
    %cst_3 = arith.constant 0.000000e+00 : f32
    %3 = vector.broadcast %cst_3 : f32 to vector<384x128xf32>
    %4 = arith.maximumf %2, %3 : vector<384x128xf32>
    %c0_4 = arith.constant 0 : index
    %c0_5 = arith.constant 0 : index
    %5 = vector.load %arg3[%c0_4, %c0_5] : memref<384x128xf32, #tpu.memory_space<vmem>>, vector<384x128xf32>
    %6 = arith.addf %4, %5 : vector<384x128xf32>
    %c0_6 = arith.constant 0 : index
    %c0_7 = arith.constant 0 : index
    %7 = vector.load %arg4[%c0_6, %c0_7] : memref<384x128xf32, #tpu.memory_space<vmem>>, vector<384x128xf32>
    tpu.vector_store %arg4[%c0_6, %c0_7], %6 {strides = array<i32>} : memref<384x128xf32, #tpu.memory_space<vmem>>, vector<384x128xf32>,
    return
  }
  func.func @transform_0(%arg0: i32) -> (i32, i32) {
    %c0_i32 = arith.constant 0 : i32
    %c0_i32_0 = arith.constant 0 : i32
    return %arg0, %c0_i32 : i32, i32
  }
  func.func @transform_1(%arg0: i32) -> (i32, i32) {
    %c0_i32 = arith.constant 0 : i32
    %c0_i32_0 = arith.constant 0 : i32
    %c0_i32_1 = arith.constant 0 : i32
    return %c0_i32, %c0_i32_0 : i32, i32
  }
  func.func @transform_2(%arg0: i32) -> (i32, i32) {
    %c0_i32 = arith.constant 0 : i32
    %c0_i32_0 = arith.constant 0 : i32
    return %arg0, %c0_i32 : i32, i32
  }
  func.func @transform_3(%arg0: i32) -> (i32, i32) {
    %c0_i32 = arith.constant 0 : i32
    %c0_i32_0 = arith.constant 0 : i32
    return %arg0, %c0_i32 : i32, i32
  }
}

module attributes {stable_mosaic.version = 11 : i64} {
  func.func @_mm_kernel(%arg0: i32, %arg1: memref<512x8xbf16, #tpu.memory_space<vmem>>, %arg2: memref<8x128xbf16, #tpu.memory_space<vmem>>, %arg3: memref<512x128xf32, #tpu.memory_space<vmem>>) attributes {dimension_semantics = [#tpu.dimension_semantics<parallel>], iteration_bounds = array<i64: 3>, scalar_prefetch = 0 : i64, scratch_operands = 0 : i64, tpu.core_type = #tpu.core_type<tc>, window_params = [{transform_indices = @transform_0, window_bounds = array<i64: 512, 8>}, {pipeline_mode = #tpu.pipeline_mode<synchronous>, transform_indices = @transform_1, window_bounds = array<i64: 8, 128>}, {transform_indices = @transform_2, window_bounds = array<i64: 512, 128>}]} {
    %c0 = arith.constant 0 : index
    %c0_0 = arith.constant 0 : index
    %0 = vector.load %arg1[%c0, %c0_0] : memref<512x8xbf16, #tpu.memory_space<vmem>>, vector<512x8xbf16>
    %c0_1 = arith.constant 0 : index
    %c0_2 = arith.constant 0 : index
    %1 = vector.load %arg2[%c0_1, %c0_2] : memref<8x128xbf16, #tpu.memory_space<vmem>>, vector<8x128xbf16>
    %cst = arith.constant dense<0.000000e+00> : vector<512x128xf32>
    %2 = tpu.matmul %0, %1, %cst {dimension_numbers = #tpu.dot_dimension_numbers<[1], [0], [0], [1], [0, 0, 1, 1], [], []>} : vector<512x8xbf16>, vector<8x128xbf16>, vector<512x128xf32> -> vector<512x128xf32>
    %c0_3 = arith.constant 0 : index
    %c0_4 = arith.constant 0 : index
    %3 = vector.load %arg3[%c0_3, %c0_4] : memref<512x128xf32, #tpu.memory_space<vmem>>, vector<512x128xf32>
    tpu.vector_store %arg3[%c0_3, %c0_4], %2 {strides = array<i32>} : memref<512x128xf32, #tpu.memory_space<vmem>>, vector<512x128xf32>,
    return
  }
  func.func @transform_0(%arg0: i32) -> (i32, i32) {
    %c0_i32 = arith.constant 0 : i32
    %c0_i32_0 = arith.constant 0 : i32
    return %arg0, %c0_i32 : i32, i32
  }
  func.func @transform_1(%arg0: i32) -> (i32, i32) {
    %c0_i32 = arith.constant 0 : i32
    %c0_i32_0 = arith.constant 0 : i32
    %c0_i32_1 = arith.constant 0 : i32
    return %c0_i32, %c0_i32_0 : i32, i32
  }
  func.func @transform_2(%arg0: i32) -> (i32, i32) {
    %c0_i32 = arith.constant 0 : i32
    %c0_i32_0 = arith.constant 0 : i32
    return %arg0, %c0_i32 : i32, i32
  }
}

</mosaic_0001>

<bundles_post_ra>
// kernel: uresnet_forward.12
= control target key start
LH: loop header
LB: loop body
LE: loop exit
PB: predicated region body
PF: predicated region fallthrough
CT: control target
= control target key end

     0   :  { %s1150_s9 = smov 0   ;;  %s1309_s0 = inlined_call_operand.vmem [shape: bf16[1536,25], index: 0, kind: input, shape index: {}]   ;;  %s1310_s1 = inlined_call_operand.vmem [shape: bf16[25,128], index: 1, kind: input, shape index: {}]   ;;  %s1311_s2 = inlined_call_operand.vmem [shape: f32[1536,128], index: 2, kind: output, shape index: {}]  }
   0x1 LB: > { %s900_s10 = sadd.s32 4294967295, %s1132_s9   ;;  %p904_p0 = scmp.ge.s32.totalorder %s1132_s9, 1  ;;  %s1132_s9 = sphi %s1150_s9, %s12_s9  }
   0x2   : > { %p113_p1 = scmp.lt.s32.totalorder %s1132_s9, 4 }
   0x4   : > { %p114_p2 = pnand %p904_p0, %p113_p1 }
   0x5   : > { %v1092_v0 = vld [vmem:[%s1310_s1] sm:$0xff] (!%p114_p2)   ;;  %vm484_vm0 = vcmask (!%p114_p2), 1043456   ;;  %v1093_v1 = vld [vmem:[%s1310_s1 + $0x8] sm:$0x1f] (!%p114_p2)   ;;  %vm485_vm1 = vcmask (!%p114_p2), 1044480   ;;  %s905_s15 = sshll.u32 (!%p114_p2), %s900_s10, 6 }
   0x6   : > { %117 = sbr.rel (%p114_p2) target bundleno = 291 (0x123), region = 28  ;;  %1011 = vmatprep.subr.bf16.mxu0 (!%p114_p2), %v1092_v0  ;;  %1079 = vmatprep.subr.bf16.mxu1 (!%p114_p2), %v1092_v0  ;;  %v1134_v2 = vmov (!%p114_p2), 65535   ;;  %p136_p3 = scmp.lt.s32.totalorder (!%p114_p2), %s905_s15, 191  ;;  %vm387_vm2 = vcmask (!%p114_p2), 203776  }
   0x7   : > { %1012 = vmatpush3.bf16.msra.mxu0 (!%p114_p2), %v1092_v0  ;;  %1081 = vmatpush3.bf16.msra.mxu1 (!%p114_p2), %v1092_v0  ;;  %v486_v3 = vsel (!%p114_p2), %vm484_vm0, 4294967295, %v1134_v2 }
   0x8   : > { %v487_v4 = vsel (!%p114_p2), %vm485_vm1, %v486_v3, 0 }
   0x9   : > { %v489_v5 = vand.u32 (!%p114_p2), %v1093_v1, %v487_v4 }
   0xb   : > { %1013 = vmatprep.subr.bf16.mxu0 (!%p114_p2), %v489_v5  ;;  %1080 = vmatprep.subr.bf16.mxu1 (!%p114_p2), %v489_v5 }
   0xc   : > { %1014 = vmatpush3.bf16.msra.mxu0 (!%p114_p2), %v489_v5  ;;  %1082 = vmatpush3.bf16.msra.mxu1 (!%p114_p2), %v489_v5 }
   0xd   : > { %s1313_s15 = smov (!%p136_p3, %s905_s15), 191 }
   0xe   : > { %s906_s16 = sshll.u32 %s1313_s15, 2  ;;  %s908_s20 = sshll.u32 %s1313_s15, 3 }
   0xf   : > { %s1170_s19 = scalar_lea.vmem %s1309_s0, %s906_s16  ;;  %s1240_s23 = scalar_lea.vmem %s1311_s2, %s908_s20 }
  0x10   : > { %v1094_v6 = vld [vmem:[%s1170_s19] sm:$0xff]   ;;  %v1096_v8 = vld [vmem:[%s1170_s19 + $0x8] sm:$0xff]   ;;  %v1098_v10 = vld [vmem:[%s1170_s19 + $0x10] sm:$0xff]  }
  0x11   : > { %v1095_v7 = vld [vmem:[%s1170_s19 + $0x80] sm:$0xff]   ;;  %1015 = vmatprep.mubr.msk.bf16.mxu0 %vm387_vm2, %v1094_v6  ;;  %v1097_v9 = vld [vmem:[%s1170_s19 + $0x88] sm:$0xff]   ;;  %v1099_v11 = vld [vmem:[%s1170_s19 + $0x90] sm:$0xff]  }
  0x12   : > { %1047 = vmatprep.mubr.msk.bf16.mxu1 %vm387_vm2, %v1095_v7  ;;  %1016 = vmatmul.mubr.msk.bf16.vlgmr.msra.gmra.mrb[0].mxu0 %vm387_vm2, %v1096_v8  ;;  %v1100_v12 = vld [vmem:[%s1170_s19 + $0x18] sm:$0xff]   ;;  %v1102_v14 = vld [vmem:[%s1170_s19 + $0x20] sm:$0xff]   ;;  %v1104_v16 = vld [vmem:[%s1170_s19 + $0x28] sm:$0xff]  }
  0x13   : > { %1048 = vmatmul.mubr.msk.bf16.vlgmr.msra.gmra.mrb[0].mxu1 %vm387_vm2, %v1097_v9  ;;  %1019 = vmatprep.mubr.msk.bf16.mxu0 %vm387_vm2, %v1098_v10  ;;  %v1101_v13 = vld [vmem:[%s1170_s19 + $0x98] sm:$0xff]   ;;  %v1103_v15 = vld [vmem:[%s1170_s19 + $0xa0] sm:$0xff]   ;;  %v1105_v17 = vld [vmem:[%s1170_s19 + $0xa8] sm:$0xff]  }
  0x14   : > { %1051 = vmatprep.mubr.msk.bf16.mxu1 %vm387_vm2, %v1099_v11  ;;  %v1106_v18 = vld [vmem:[%s1170_s19 + $0x30] sm:$0xff]   ;;  %v1108_v20 = vld [vmem:[%s1170_s19 + $0x38] sm:$0xff]   ;;  %v1110_v22 = vld [vmem:[%s1170_s19 + $0x40] sm:$0xff]  }
  0x15   : > { %v1107_v19 = vld [vmem:[%s1170_s19 + $0xb0] sm:$0xff]   ;;  %v1109_v21 = vld [vmem:[%s1170_s19 + $0xb8] sm:$0xff]   ;;  %v1111_v23 = vld [vmem:[%s1170_s19 + $0xc0] sm:$0xff]  }
  0x16   : > { %v1112_v24 = vld [vmem:[%s1170_s19 + $0x48] sm:$0xff]   ;;  %v1114_v26 = vld [vmem:[%s1170_s19 + $0x50] sm:$0xff]   ;;  %v1116_v28 = vld [vmem:[%s1170_s19 + $0x58] sm:$0xff]  }
  0x17   : > { %v1113_v25 = vld [vmem:[%s1170_s19 + $0xc8] sm:$0xff]   ;;  %v1115_v27 = vld [vmem:[%s1170_s19 + $0xd0] sm:$0xff]   ;;  %v1117_v29 = vld [vmem:[%s1170_s19 + $0xd8] sm:$0xff]  }
  0x18   : > { %v1118_v30 = vld [vmem:[%s1170_s19 + $0x60] sm:$0xff]   ;;  %v1120_v32 = vld [vmem:[%s1170_s19 + $0x68] sm:$0xff]   ;;  %v1122_v34 = vld [vmem:[%s1170_s19 + $0x70] sm:$0xff]  }
  0x19   : > { %v1119_v31 = vld [vmem:[%s1170_s19 + $0xe0] sm:$0xff]   ;;  %v1121_v33 = vld [vmem:[%s1170_s19 + $0xe8] sm:$0xff]   ;;  %v1123_v35 = vld [vmem:[%s1170_s19 + $0xf0] sm:$0xff]  }
  0x1a   : > { %1020 = vmatmul.mubr.msk.bf16.gmra.mrb[4].mxu0 %vm387_vm2, %v1100_v12  ;;  %v1124_v36 = vld [vmem:[%s1170_s19 + $0x78] sm:$0xff]  }
  0x1b   : > { %1052 = vmatmul.mubr.msk.bf16.gmra.mrb[4].mxu1 %vm387_vm2, %v1101_v13  ;;  %1023 = vmatprep.mubr.msk.bf16.mxu0 %vm387_vm2, %v1102_v14  ;;  %v1125_v37 = vld [vmem:[%s1170_s19 + $0xf8] sm:$0xff]  }
  0x1c   : > { %1055 = vmatprep.mubr.msk.bf16.mxu1 %vm387_vm2, %v1103_v15 }
  0x22   : > { %1024 = vmatmul.mubr.msk.bf16.gmra.mrb[8].mxu0 %vm387_vm2, %v1104_v16 }
  0x23   : > { %1056 = vmatmul.mubr.msk.bf16.gmra.mrb[8].mxu1 %vm387_vm2, %v1105_v17  ;;  %1027 = vmatprep.mubr.msk.bf16.mxu0 %vm387_vm2, %v1106_v18 }
  0x24   : > { %1059 = vmatprep.mubr.msk.bf16.mxu1 %vm387_vm2, %v1107_v19 }
  0x2a   : > { %1028 = vmatmul.mubr.msk.bf16.gmra.mrb[12].mxu0 %vm387_vm2, %v1108_v20 }
  0x2b   : > { %1060 = vmatmul.mubr.msk.bf16.gmra.mrb[12].mxu1 %vm387_vm2, %v1109_v21  ;;  %1031 = vmatprep.mubr.msk.bf16.mxu0 %vm387_vm2, %v1110_v22 }
  0x2c   : > { %1063 = vmatprep.mubr.msk.bf16.mxu1 %vm387_vm2, %v1111_v23 }
  0x32   : > { %1032 = vmatmul.mubr.msk.bf16.gmra.mrb[16].mxu0 %vm387_vm2, %v1112_v24 }
  0x33   : > { %1064 = vmatmul.mubr.msk.bf16.gmra.mrb[16].mxu1 %vm387_vm2, %v1113_v25  ;;  %1035 = vmatprep.mubr.msk.bf16.mxu0 %vm387_vm2, %v1114_v26 }
  0x34   : > { %1067 = vmatprep.mubr.msk.bf16.mxu1 %vm387_vm2, %v1115_v27 }
  0x3a   : > { %1036 = vmatmul.mubr.msk.bf16.gmra.mrb[20].mxu0 %vm387_vm2, %v1116_v28 }
  0x3b   : > { %1068 = vmatmul.mubr.msk.bf16.gmra.mrb[20].mxu1 %vm387_vm2, %v1117_v29  ;;  %1039 = vmatprep.mubr.msk.bf16.mxu0 %vm387_vm2, %v1118_v30 }
  0x3c   : > { %1071 = vmatprep.mubr.msk.bf16.mxu1 %vm387_vm2, %v1119_v31 }
  0x42   : > { %1040 = vmatmul.mubr.msk.bf16.gmra.mrb[24].mxu0 %vm387_vm2, %v1120_v32 }
  0x43   : > { %1072 = vmatmul.mubr.msk.bf16.gmra.mrb[24].mxu1 %vm387_vm2, %v1121_v33  ;;  %1043 = vmatprep.mubr.msk.bf16.mxu0 %vm387_vm2, %v1122_v34 }
  0x44   : > { %1075 = vmatprep.mubr.msk.bf16.mxu1 %vm387_vm2, %v1123_v35 }
  0x4a   : > { %1044 = vmatmul.mubr.msk.bf16.gmra.mrb[28].mxu0 %vm387_vm2, %v1124_v36 }
  0x4b   : > { %1076 = vmatmul.mubr.msk.bf16.gmra.mrb[28].mxu1 %vm387_vm2, %v1125_v37 }
  0xe5   : > { %v1017_v38 = vpop.f32.mrb[0].mxu0 }
  0xe6   : > { %782 = vst [vmem:[%s1240_s23 + $0x10] sm:$0xff] %v1017_v38  ;;  %v1049_v39 = vpop.f32.mrb[0].mxu1  ;;  %v525_v40 = vpop.f32.mrb[1].mxu0 }
  0xe7   : > { %814 = vst [vmem:[%s1240_s23 + $0x110] sm:$0xff] %v1049_v39  ;;  %780 = vst [vmem:[%s1240_s23] sm:$0xff] %v525_v40  ;;  %v653_v41 = vpop.f32.mrb[1].mxu1  ;;  %v1018_v42 = vpop.f32.mrb[2].mxu0 }
  0xe8   : > { %812 = vst [vmem:[%s1240_s23 + $0x100] sm:$0xff] %v653_v41  ;;  %783 = vst [vmem:[%s1240_s23 + $0x18] sm:$0xff] %v1018_v42  ;;  %v1050_v43 = vpop.f32.mrb[2].mxu1  ;;  %v528_v44 = vpop.f32.mrb[3].mxu0 }
  0xe9   : > { %815 = vst [vmem:[%s1240_s23 + $0x118] sm:$0xff] %v1050_v43  ;;  %781 = vst [vmem:[%s1240_s23 + $0x8] sm:$0xff] %v528_v44  ;;  %v656_v45 = vpop.f32.mrb[3].mxu1 }
  0xea   : > { %813 = vst [vmem:[%s1240_s23 + $0x108] sm:$0xff] %v656_v45 }
  0xed   : > { %v1021_v46 = vpop.f32.mrb[4].mxu0 }
  0xee   : > { %786 = vst [vmem:[%s1240_s23 + $0x30] sm:$0xff] %v1021_v46  ;;  %v1053_v47 = vpop.f32.mrb[4].mxu1  ;;  %v541_v48 = vpop.f32.mrb[5].mxu0 }
  0xef   : > { %818 = vst [vmem:[%s1240_s23 + $0x130] sm:$0xff] %v1053_v47  ;;  %784 = vst [vmem:[%s1240_s23 + $0x20] sm:$0xff] %v541_v48  ;;  %v669_v49 = vpop.f32.mrb[5].mxu1  ;;  %v1022_v50 = vpop.f32.mrb[6].mxu0 }
  0xf0   : > { %816 = vst [vmem:[%s1240_s23 + $0x120] sm:$0xff] %v669_v49  ;;  %787 = vst [vmem:[%s1240_s23 + $0x38] sm:$0xff] %v1022_v50  ;;  %v1054_v51 = vpop.f32.mrb[6].mxu1  ;;  %v544_v52 = vpop.f32.mrb[7].mxu0 }
  0xf1   : > { %819 = vst [vmem:[%s1240_s23 + $0x138] sm:$0xff] %v1054_v51  ;;  %785 = vst [vmem:[%s1240_s23 + $0x28] sm:$0xff] %v544_v52  ;;  %v672_v53 = vpop.f32.mrb[7].mxu1 }
  0xf2   : > { %817 = vst [vmem:[%s1240_s23 + $0x128] sm:$0xff] %v672_v53 }
  0xf5   : > { %v1025_v54 = vpop.f32.mrb[8].mxu0 }
  0xf6   : > { %790 = vst [vmem:[%s1240_s23 + $0x50] sm:$0xff] %v1025_v54  ;;  %v1057_v55 = vpop.f32.mrb[8].mxu1  ;;  %v557_v56 = vpop.f32.mrb[9].mxu0 }
  0xf7   : > { %822 = vst [vmem:[%s1240_s23 + $0x150] sm:$0xff] %v1057_v55  ;;  %788 = vst [vmem:[%s1240_s23 + $0x40] sm:$0xff] %v557_v56  ;;  %v685_v57 = vpop.f32.mrb[9].mxu1  ;;  %v1026_v58 = vpop.f32.mrb[10].mxu0 }
  0xf8   : > { %820 = vst [vmem:[%s1240_s23 + $0x140] sm:$0xff] %v685_v57  ;;  %791 = vst [vmem:[%s1240_s23 + $0x58] sm:$0xff] %v1026_v58  ;;  %v1058_v59 = vpop.f32.mrb[10].mxu1  ;;  %v560_v60 = vpop.f32.mrb[11].mxu0 }
  0xf9   : > { %823 = vst [vmem:[%s1240_s23 + $0x158] sm:$0xff] %v1058_v59  ;;  %789 = vst [vmem:[%s1240_s23 + $0x48] sm:$0xff] %v560_v60  ;;  %v688_v61 = vpop.f32.mrb[11].mxu1 }
  0xfa   : > { %821 = vst [vmem:[%s1240_s23 + $0x148] sm:$0xff] %v688_v61 }
  0xfd   : > { %v1029_v62 = vpop.f32.mrb[12].mxu0 }
  0xfe   : > { %794 = vst [vmem:[%s1240_s23 + $0x70] sm:$0xff] %v1029_v62  ;;  %v1061_v63 = vpop.f32.mrb[12].mxu1  ;;  %v573_v0 = vpop.f32.mrb[13].mxu0 }
  0xff   : > { %826 = vst [vmem:[%s1240_s23 + $0x170] sm:$0xff] %v1061_v63  ;;  %792 = vst [vmem:[%s1240_s23 + $0x60] sm:$0xff] %v573_v0  ;;  %v701_v1 = vpop.f32.mrb[13].mxu1  ;;  %v1030_v2 = vpop.f32.mrb[14].mxu0 }
 0x100   : > { %824 = vst [vmem:[%s1240_s23 + $0x160] sm:$0xff] %v701_v1  ;;  %795 = vst [vmem:[%s1240_s23 + $0x78] sm:$0xff] %v1030_v2  ;;  %v1062_v3 = vpop.f32.mrb[14].mxu1  ;;  %v576_v4 = vpop.f32.mrb[15].mxu0 }
 0x101   : > { %827 = vst [vmem:[%s1240_s23 + $0x178] sm:$0xff] %v1062_v3  ;;  %793 = vst [vmem:[%s1240_s23 + $0x68] sm:$0xff] %v576_v4  ;;  %v704_v5 = vpop.f32.mrb[15].mxu1 }
 0x102   : > { %825 = vst [vmem:[%s1240_s23 + $0x168] sm:$0xff] %v704_v5 }
 0x105   : > { %v1033_v6 = vpop.f32.mrb[16].mxu0 }
 0x106   : > { %798 = vst [vmem:[%s1240_s23 + $0x90] sm:$0xff] %v1033_v6  ;;  %v1065_v7 = vpop.f32.mrb[16].mxu1  ;;  %v589_v8 = vpop.f32.mrb[17].mxu0 }
 0x107   : > { %830 = vst [vmem:[%s1240_s23 + $0x190] sm:$0xff] %v1065_v7  ;;  %796 = vst [vmem:[%s1240_s23 + $0x80] sm:$0xff] %v589_v8  ;;  %v717_v9 = vpop.f32.mrb[17].mxu1  ;;  %v1034_v10 = vpop.f32.mrb[18].mxu0 }
 0x108   : > { %828 = vst [vmem:[%s1240_s23 + $0x180] sm:$0xff] %v717_v9  ;;  %799 = vst [vmem:[%s1240_s23 + $0x98] sm:$0xff] %v1034_v10  ;;  %v1066_v11 = vpop.f32.mrb[18].mxu1  ;;  %v592_v12 = vpop.f32.mrb[19].mxu0 }
 0x109   : > { %831 = vst [vmem:[%s1240_s23 + $0x198] sm:$0xff] %v1066_v11  ;;  %797 = vst [vmem:[%s1240_s23 + $0x88] sm:$0xff] %v592_v12  ;;  %v720_v13 = vpop.f32.mrb[19].mxu1 }
 0x10a   : > { %829 = vst [vmem:[%s1240_s23 + $0x188] sm:$0xff] %v720_v13 }
 0x10d   : > { %v1037_v14 = vpop.f32.mrb[20].mxu0 }
 0x10e   : > { %802 = vst [vmem:[%s1240_s23 + $0xb0] sm:$0xff] %v1037_v14  ;;  %v1069_v15 = vpop.f32.mrb[20].mxu1  ;;  %v605_v16 = vpop.f32.mrb[21].mxu0 }
 0x10f   : > { %834 = vst [vmem:[%s1240_s23 + $0x1b0] sm:$0xff] %v1069_v15  ;;  %800 = vst [vmem:[%s1240_s23 + $0xa0] sm:$0xff] %v605_v16  ;;  %v733_v17 = vpop.f32.mrb[21].mxu1  ;;  %v1038_v18 = vpop.f32.mrb[22].mxu0 }
 0x110   : > { %832 = vst [vmem:[%s1240_s23 + $0x1a0] sm:$0xff] %v733_v17  ;;  %803 = vst [vmem:[%s1240_s23 + $0xb8] sm:$0xff] %v1038_v18  ;;  %v1070_v19 = vpop.f32.mrb[22].mxu1  ;;  %v608_v20 = vpop.f32.mrb[23].mxu0 }
 0x111   : > { %835 = vst [vmem:[%s1240_s23 + $0x1b8] sm:$0xff] %v1070_v19  ;;  %801 = vst [vmem:[%s1240_s23 + $0xa8] sm:$0xff] %v608_v20  ;;  %v736_v21 = vpop.f32.mrb[23].mxu1 }
 0x112   : > { %833 = vst [vmem:[%s1240_s23 + $0x1a8] sm:$0xff] %v736_v21 }
 0x115   : > { %v1041_v22 = vpop.f32.mrb[24].mxu0 }
 0x116   : > { %806 = vst [vmem:[%s1240_s23 + $0xd0] sm:$0xff] %v1041_v22  ;;  %v1073_v23 = vpop.f32.mrb[24].mxu1  ;;  %v621_v24 = vpop.f32.mrb[25].mxu0 }
 0x117   : > { %838 = vst [vmem:[%s1240_s23 + $0x1d0] sm:$0xff] %v1073_v23  ;;  %804 = vst [vmem:[%s1240_s23 + $0xc0] sm:$0xff] %v621_v24  ;;  %v749_v25 = vpop.f32.mrb[25].mxu1  ;;  %v1042_v26 = vpop.f32.mrb[26].mxu0 }
 0x118   : > { %836 = vst [vmem:[%s1240_s23 + $0x1c0] sm:$0xff] %v749_v25  ;;  %807 = vst [vmem:[%s1240_s23 + $0xd8] sm:$0xff] %v1042_v26  ;;  %v1074_v27 = vpop.f32.mrb[26].mxu1  ;;  %v624_v28 = vpop.f32.mrb[27].mxu0 }
 0x119   : > { %839 = vst [vmem:[%s1240_s23 + $0x1d8] sm:$0xff] %v1074_v27  ;;  %805 = vst [vmem:[%s1240_s23 + $0xc8] sm:$0xff] %v624_v28  ;;  %v752_v29 = vpop.f32.mrb[27].mxu1 }
 0x11a   : > { %837 = vst [vmem:[%s1240_s23 + $0x1c8] sm:$0xff] %v752_v29 }
 0x11d   : > { %v1045_v30 = vpop.f32.mrb[28].mxu0 }
 0x11e   : > { %810 = vst [vmem:[%s1240_s23 + $0xf0] sm:$0xff] %v1045_v30  ;;  %v1077_v31 = vpop.f32.mrb[28].mxu1  ;;  %v637_v32 = vpop.f32.mrb[29].mxu0 }
 0x11f   : > { %842 = vst [vmem:[%s1240_s23 + $0x1f0] sm:$0xff] %v1077_v31  ;;  %808 = vst [vmem:[%s1240_s23 + $0xe0] sm:$0xff] %v637_v32  ;;  %v765_v33 = vpop.f32.mrb[29].mxu1  ;;  %v1046_v34 = vpop.f32.mrb[30].mxu0 }
 0x120   : > { %840 = vst [vmem:[%s1240_s23 + $0x1e0] sm:$0xff] %v765_v33  ;;  %811 = vst [vmem:[%s1240_s23 + $0xf8] sm:$0xff] %v1046_v34  ;;  %v1078_v35 = vpop.f32.mrb[30].mxu1  ;;  %v640_v36 = vpop.f32.mrb[31].mxu0 }
 0x121   : > { %843 = vst [vmem:[%s1240_s23 + $0x1f8] sm:$0xff] %v1078_v35  ;;  %809 = vst [vmem:[%s1240_s23 + $0xe8] sm:$0xff] %v640_v36  ;;  %v768_v37 = vpop.f32.mrb[31].mxu1 }
 0x122   : > { %841 = vst [vmem:[%s1240_s23 + $0x1e8] sm:$0xff] %v768_v37 }
 0x123 PF: > { %s12_s9 = sadd.s32 1, %s1132_s9  }
 0x124   : > { %p9_p4 = scmp.ge.s32.totalorder %s12_s9, 5  }
 0x126   :  { %11 = sbr.rel (!%p9_p4) target bundleno = 1 (0x1), region = 58 }

// kernel: uresnet_forward.13
= control target key start
LH: loop header
LB: loop body
LE: loop exit
PB: predicated region body
PF: predicated region fallthrough
CT: control target
= control target key end

     0   :  { %s1253_s9 = smov 0   ;;  %s1421_s0 = inlined_call_operand.vmem [shape: bf16[1536,72], index: 0, kind: input, shape index: {}]   ;;  %s1422_s1 = inlined_call_operand.vmem [shape: bf16[72,128], index: 1, kind: input, shape index: {}]   ;;  %s1423_s2 = inlined_call_operand.vmem [shape: f32[1536,128], index: 2, kind: output, shape index: {}]  }
   0x1 LB: > { %s982_s10 = sadd.s32 4294967295, %s1236_s9   ;;  %p986_p0 = scmp.ge.s32.totalorder %s1236_s9, 1  ;;  %s1236_s9 = sphi %s1253_s9, %s12_s9  }
   0x2   : > { %p113_p1 = scmp.lt.s32.totalorder %s1236_s9, 4 }
   0x4   : > { %p114_p2 = pnand %p986_p0, %p113_p1 }
   0x5   : > { %v1193_v0 = vld [vmem:[%s1422_s1] sm:$0xff] (!%p114_p2)   ;;  %v1194_v1 = vld [vmem:[%s1422_s1 + $0x8] sm:$0xff] (!%p114_p2)   ;;  %s987_s15 = sshll.u32 (!%p114_p2), %s982_s10, 6  ;;  %v1195_v2 = vld [vmem:[%s1422_s1 + $0x10] sm:$0xff] (!%p114_p2)   ;;  %vm408_vm0 = vcmask (!%p114_p2), 588800   ;;  %vm505_vm1 = vcmask (!%p114_p2), 1043456  }
   0x6   : > { %117 = sbr.rel (%p114_p2) target bundleno = 300 (0x12c), region = 28  ;;  %1099 = vmatprep.subr.bf16.mxu0 (!%p114_p2), %v1193_v0  ;;  %1173 = vmatprep.subr.bf16.mxu1 (!%p114_p2), %v1193_v0  ;;  %p136_p3 = scmp.lt.s32.totalorder (!%p114_p2), %s987_s15, 191  ;;  %v1196_v3 = vld [vmem:[%s1422_s1 + $0x18] sm:$0xff] (!%p114_p2)   ;;  %v1197_v6 = vld [vmem:[%s1422_s1 + $0x20] ss:$0 sps:$4 sm:$0xff] (!%p114_p2)  }
   0x7   : > { %1100 = vmatpush3.bf16.msra.mxu0 (!%p114_p2), %v1193_v0  ;;  %1178 = vmatpush3.bf16.msra.mxu1 (!%p114_p2), %v1193_v0  ;;  %v507_v7 = vsel (!%p114_p2), %vm505_vm1, %v1197_v6, 0 }
   0x8   : > { %1101 = vmatprep.subr.bf16.mxu0 (!%p114_p2), %v1194_v1  ;;  %1174 = vmatprep.subr.bf16.mxu1 (!%p114_p2), %v1194_v1 }
   0xb   : > { %1102 = vmatpush3.bf16.msra.mxu0 (!%p114_p2), %v1194_v1  ;;  %1179 = vmatpush3.bf16.msra.mxu1 (!%p114_p2), %v1194_v1 }
   0xc   : > { %1103 = vmatprep.subr.bf16.mxu0 (!%p114_p2), %v1195_v2  ;;  %1175 = vmatprep.subr.bf16.mxu1 (!%p114_p2), %v1195_v2 }
   0xd   : > { %s1425_s15 = smov (!%p136_p3, %s987_s15), 191 }
   0xe   : > { %s988_s18 = sshll.u32 %s1425_s15, 2  ;;  %s990_s26 = sshll.u32 %s1425_s15, 3 }
   0xf   : > { %s1279_s23 = scalar_lea.vmem %s1421_s0, %s988_s18  ;;  %1104 = vmatpush3.bf16.msra.mxu0 %v1195_v2  ;;  %1180 = vmatpush3.bf16.msra.mxu1 %v1195_v2  ;;  %s1352_s29 = scalar_lea.vmem %s1423_s2, %s990_s26 }
  0x10   : > { %v1198_v4 = vld [vmem:[%s1279_s23] sm:$0xff]   ;;  %1105 = vmatprep.subr.bf16.mxu0 %v1196_v3  ;;  %1176 = vmatprep.subr.bf16.mxu1 %v1196_v3  ;;  %v1200_v8 = vld [vmem:[%s1279_s23 + $0x8] sm:$0xff]   ;;  %v1202_v10 = vld [vmem:[%s1279_s23 + $0x10] sm:$0xff]  }
  0x11   : > { %v1199_v5 = vld [vmem:[%s1279_s23 + $0x80] sm:$0xff]   ;;  %1109 = vmatprep.mubr.msk.bf16.mxu0 %vm408_vm0, %v1198_v4  ;;  %v1201_v9 = vld [vmem:[%s1279_s23 + $0x88] sm:$0xff]   ;;  %v1203_v11 = vld [vmem:[%s1279_s23 + $0x90] sm:$0xff]  }
  0x12   : > { %1141 = vmatprep.mubr.msk.bf16.mxu1 %vm408_vm0, %v1199_v5  ;;  %v1204_v12 = vld [vmem:[%s1279_s23 + $0x18] sm:$0xff]   ;;  %v1206_v14 = vld [vmem:[%s1279_s23 + $0x20] sm:$0xff]   ;;  %v1208_v16 = vld [vmem:[%s1279_s23 + $0x28] sm:$0xff]  }
  0x13   : > { %1106 = vmatpush3.bf16.msra.mxu0 %v1196_v3  ;;  %1181 = vmatpush3.bf16.msra.mxu1 %v1196_v3  ;;  %v1205_v13 = vld [vmem:[%s1279_s23 + $0x98] sm:$0xff]   ;;  %v1207_v15 = vld [vmem:[%s1279_s23 + $0xa0] sm:$0xff]   ;;  %v1209_v17 = vld [vmem:[%s1279_s23 + $0xa8] sm:$0xff]  }
  0x14   : > { %1183 = vmatprep.subr.msk.bf16.mxu0 %vm505_vm1, %v1197_v6  ;;  %1184 = vmatprep.subr.msk.bf16.mxu1 %vm505_vm1, %v1197_v6  ;;  %v1210_v18 = vld [vmem:[%s1279_s23 + $0x30] sm:$0xff]   ;;  %v1212_v20 = vld [vmem:[%s1279_s23 + $0x38] sm:$0xff]   ;;  %v1214_v22 = vld [vmem:[%s1279_s23 + $0x40] sm:$0xff]  }
  0x15   : > { %v1211_v19 = vld [vmem:[%s1279_s23 + $0xb0] sm:$0xff]   ;;  %v1213_v21 = vld [vmem:[%s1279_s23 + $0xb8] sm:$0xff]   ;;  %v1215_v23 = vld [vmem:[%s1279_s23 + $0xc0] sm:$0xff]  }
  0x16   : > { %v1216_v24 = vld [vmem:[%s1279_s23 + $0x48] sm:$0xff]   ;;  %v1218_v26 = vld [vmem:[%s1279_s23 + $0x50] sm:$0xff]   ;;  %v1220_v28 = vld [vmem:[%s1279_s23 + $0x58] sm:$0xff]  }
  0x17   : > { %1108 = vmatpush3.bf16.msra.mxu0 %v507_v7  ;;  %1182 = vmatpush3.bf16.msra.mxu1 %v507_v7  ;;  %v1217_v25 = vld [vmem:[%s1279_s23 + $0xc8] sm:$0xff]   ;;  %v1219_v27 = vld [vmem:[%s1279_s23 + $0xd0] sm:$0xff]   ;;  %v1221_v29 = vld [vmem:[%s1279_s23 + $0xd8] sm:$0xff]  }
  0x18   : > { %v1222_v30 = vld [vmem:[%s1279_s23 + $0x60] sm:$0xff]   ;;  %v1224_v32 = vld [vmem:[%s1279_s23 + $0x68] sm:$0xff]   ;;  %v1226_v34 = vld [vmem:[%s1279_s23 + $0x70] sm:$0xff]  }
  0x19   : > { %v1223_v31 = vld [vmem:[%s1279_s23 + $0xe0] sm:$0xff]   ;;  %v1225_v33 = vld [vmem:[%s1279_s23 + $0xe8] sm:$0xff]   ;;  %v1227_v35 = vld [vmem:[%s1279_s23 + $0xf0] sm:$0xff]  }
  0x1a   : > { %1110 = vmatmul.mubr.msk.bf16.vlgmr.msra.gmra.mrb[0].mxu0 %vm408_vm0, %v1200_v8  ;;  %1142 = vmatmul.mubr.msk.bf16.vlgmr.msra.gmra.mrb[0].mxu1 %vm408_vm0, %v1201_v9  ;;  %v1228_v36 = vld [vmem:[%s1279_s23 + $0x78] sm:$0xff]  }
  0x1b   : > { %1113 = vmatprep.mubr.msk.bf16.mxu0 %vm408_vm0, %v1202_v10  ;;  %1145 = vmatprep.mubr.msk.bf16.mxu1 %vm408_vm0, %v1203_v11  ;;  %v1229_v37 = vld [vmem:[%s1279_s23 + $0xf8] sm:$0xff]  }
  0x22   : > { %1114 = vmatmul.mubr.msk.bf16.gmra.mrb[4].mxu0 %vm408_vm0, %v1204_v12  ;;  %1146 = vmatmul.mubr.msk.bf16.gmra.mrb[4].mxu1 %vm408_vm0, %v1205_v13 }
  0x23   : > { %1117 = vmatprep.mubr.msk.bf16.mxu0 %vm408_vm0, %v1206_v14  ;;  %1149 = vmatprep.mubr.msk.bf16.mxu1 %vm408_vm0, %v1207_v15 }
  0x2a   : > { %1118 = vmatmul.mubr.msk.bf16.gmra.mrb[8].mxu0 %vm408_vm0, %v1208_v16  ;;  %1150 = vmatmul.mubr.msk.bf16.gmra.mrb[8].mxu1 %vm408_vm0, %v1209_v17 }
  0x2b   : > { %1121 = vmatprep.mubr.msk.bf16.mxu0 %vm408_vm0, %v1210_v18  ;;  %1153 = vmatprep.mubr.msk.bf16.mxu1 %vm408_vm0, %v1211_v19 }
  0x32   : > { %1122 = vmatmul.mubr.msk.bf16.gmra.mrb[12].mxu0 %vm408_vm0, %v1212_v20  ;;  %1154 = vmatmul.mubr.msk.bf16.gmra.mrb[12].mxu1 %vm408_vm0, %v1213_v21 }
  0x33   : > { %1125 = vmatprep.mubr.msk.bf16.mxu0 %vm408_vm0, %v1214_v22  ;;  %1157 = vmatprep.mubr.msk.bf16.mxu1 %vm408_vm0, %v1215_v23 }
  0x3a   : > { %1126 = vmatmul.mubr.msk.bf16.gmra.mrb[16].mxu0 %vm408_vm0, %v1216_v24  ;;  %1158 = vmatmul.mubr.msk.bf16.gmra.mrb[16].mxu1 %vm408_vm0, %v1217_v25 }
  0x3b   : > { %1129 = vmatprep.mubr.msk.bf16.mxu0 %vm408_vm0, %v1218_v26  ;;  %1161 = vmatprep.mubr.msk.bf16.mxu1 %vm408_vm0, %v1219_v27 }
  0x42   : > { %1130 = vmatmul.mubr.msk.bf16.gmra.mrb[20].mxu0 %vm408_vm0, %v1220_v28  ;;  %1162 = vmatmul.mubr.msk.bf16.gmra.mrb[20].mxu1 %vm408_vm0, %v1221_v29 }
  0x43   : > { %1133 = vmatprep.mubr.msk.bf16.mxu0 %vm408_vm0, %v1222_v30  ;;  %1165 = vmatprep.mubr.msk.bf16.mxu1 %vm408_vm0, %v1223_v31 }
  0x4a   : > { %1134 = vmatmul.mubr.msk.bf16.gmra.mrb[24].mxu0 %vm408_vm0, %v1224_v32  ;;  %1166 = vmatmul.mubr.msk.bf16.gmra.mrb[24].mxu1 %vm408_vm0, %v1225_v33 }
  0x4b   : > { %1137 = vmatprep.mubr.msk.bf16.mxu0 %vm408_vm0, %v1226_v34  ;;  %1169 = vmatprep.mubr.msk.bf16.mxu1 %vm408_vm0, %v1227_v35 }
  0x52   : > { %1138 = vmatmul.mubr.msk.bf16.gmra.mrb[28].mxu0 %vm408_vm0, %v1228_v36  ;;  %1170 = vmatmul.mubr.msk.bf16.gmra.mrb[28].mxu1 %vm408_vm0, %v1229_v37 }
  0xed   : > { %v1111_v38 = vpop.f32.mrb[0].mxu0  ;;  %v1143_v39 = vpop.f32.mrb[0].mxu1 }
  0xee   : > { %v800_v40 = vmax.f32 %v1111_v38, 0.0  ;;  %v832_v41 = vmax.f32 %v1143_v39, 0.0  ;;  %v543_v42 = vpop.f32.mrb[1].mxu0  ;;  %v671_v43 = vpop.f32.mrb[1].mxu1 }
  0xef   : > { %v798_v44 = vmax.f32 %v543_v42, 0.0  ;;  %v830_v45 = vmax.f32 %v671_v43, 0.0  ;;  %v1112_v46 = vpop.f32.mrb[2].mxu0  ;;  %v1144_v47 = vpop.f32.mrb[2].mxu1 }
  0xf0   : > { %864 = vst [vmem:[%s1352_s29 + $0x10] sm:$0xff] %v800_v40  ;;  %896 = vst [vmem:[%s1352_s29 + $0x110] sm:$0xff] %v832_v41  ;;  %v801_v48 = vmax.f32 %v1112_v46, 0.0  ;;  %v833_v49 = vmax.f32 %v1144_v47, 0.0  ;;  %v546_v50 = vpop.f32.mrb[3].mxu0  ;;  %v674_v51 = vpop.f32.mrb[3].mxu1 }
  0xf1   : > { %862 = vst [vmem:[%s1352_s29] sm:$0xff] %v798_v44  ;;  %894 = vst [vmem:[%s1352_s29 + $0x100] sm:$0xff] %v830_v45  ;;  %v799_v52 = vmax.f32 %v546_v50, 0.0  ;;  %v831_v53 = vmax.f32 %v674_v51, 0.0 }
  0xf2   : > { %865 = vst [vmem:[%s1352_s29 + $0x18] sm:$0xff] %v801_v48  ;;  %897 = vst [vmem:[%s1352_s29 + $0x118] sm:$0xff] %v833_v49 }
  0xf3   : > { %863 = vst [vmem:[%s1352_s29 + $0x8] sm:$0xff] %v799_v52  ;;  %895 = vst [vmem:[%s1352_s29 + $0x108] sm:$0xff] %v831_v53 }
  0xf5   : > { %v1115_v54 = vpop.f32.mrb[4].mxu0  ;;  %v1147_v55 = vpop.f32.mrb[4].mxu1 }
  0xf6   : > { %v804_v56 = vmax.f32 %v1115_v54, 0.0  ;;  %v836_v57 = vmax.f32 %v1147_v55, 0.0  ;;  %v559_v58 = vpop.f32.mrb[5].mxu0  ;;  %v687_v59 = vpop.f32.mrb[5].mxu1 }
  0xf7   : > { %v802_v60 = vmax.f32 %v559_v58, 0.0  ;;  %v834_v61 = vmax.f32 %v687_v59, 0.0  ;;  %v1116_v62 = vpop.f32.mrb[6].mxu0  ;;  %v1148_v63 = vpop.f32.mrb[6].mxu1 }
  0xf8   : > { %868 = vst [vmem:[%s1352_s29 + $0x30] sm:$0xff] %v804_v56  ;;  %900 = vst [vmem:[%s1352_s29 + $0x130] sm:$0xff] %v836_v57  ;;  %v805_v0 = vmax.f32 %v1116_v62, 0.0  ;;  %v837_v1 = vmax.f32 %v1148_v63, 0.0  ;;  %v562_v2 = vpop.f32.mrb[7].mxu0  ;;  %v690_v3 = vpop.f32.mrb[7].mxu1 }
  0xf9   : > { %866 = vst [vmem:[%s1352_s29 + $0x20] sm:$0xff] %v802_v60  ;;  %898 = vst [vmem:[%s1352_s29 + $0x120] sm:$0xff] %v834_v61  ;;  %v803_v4 = vmax.f32 %v562_v2, 0.0  ;;  %v835_v5 = vmax.f32 %v690_v3, 0.0 }
  0xfa   : > { %869 = vst [vmem:[%s1352_s29 + $0x38] sm:$0xff] %v805_v0  ;;  %901 = vst [vmem:[%s1352_s29 + $0x138] sm:$0xff] %v837_v1 }
  0xfb   : > { %867 = vst [vmem:[%s1352_s29 + $0x28] sm:$0xff] %v803_v4  ;;  %899 = vst [vmem:[%s1352_s29 + $0x128] sm:$0xff] %v835_v5 }
  0xfd   : > { %v1119_v6 = vpop.f32.mrb[8].mxu0  ;;  %v1151_v7 = vpop.f32.mrb[8].mxu1 }
  0xfe   : > { %v808_v8 = vmax.f32 %v1119_v6, 0.0  ;;  %v840_v9 = vmax.f32 %v1151_v7, 0.0  ;;  %v575_v10 = vpop.f32.mrb[9].mxu0  ;;  %v703_v11 = vpop.f32.mrb[9].mxu1 }
  0xff   : > { %v806_v12 = vmax.f32 %v575_v10, 0.0  ;;  %v838_v13 = vmax.f32 %v703_v11, 0.0  ;;  %v1120_v14 = vpop.f32.mrb[10].mxu0  ;;  %v1152_v15 = vpop.f32.mrb[10].mxu1 }
 0x100   : > { %872 = vst [vmem:[%s1352_s29 + $0x50] sm:$0xff] %v808_v8  ;;  %904 = vst [vmem:[%s1352_s29 + $0x150] sm:$0xff] %v840_v9  ;;  %v809_v16 = vmax.f32 %v1120_v14, 0.0  ;;  %v841_v17 = vmax.f32 %v1152_v15, 0.0  ;;  %v578_v18 = vpop.f32.mrb[11].mxu0  ;;  %v706_v19 = vpop.f32.mrb[11].mxu1 }
 0x101   : > { %870 = vst [vmem:[%s1352_s29 + $0x40] sm:$0xff] %v806_v12  ;;  %902 = vst [vmem:[%s1352_s29 + $0x140] sm:$0xff] %v838_v13  ;;  %v807_v20 = vmax.f32 %v578_v18, 0.0  ;;  %v839_v21 = vmax.f32 %v706_v19, 0.0 }
 0x102   : > { %873 = vst [vmem:[%s1352_s29 + $0x58] sm:$0xff] %v809_v16  ;;  %905 = vst [vmem:[%s1352_s29 + $0x158] sm:$0xff] %v841_v17 }
 0x103   : > { %871 = vst [vmem:[%s1352_s29 + $0x48] sm:$0xff] %v807_v20  ;;  %903 = vst [vmem:[%s1352_s29 + $0x148] sm:$0xff] %v839_v21 }
 0x105   : > { %v1123_v22 = vpop.f32.mrb[12].mxu0  ;;  %v1155_v23 = vpop.f32.mrb[12].mxu1 }
 0x106   : > { %v812_v24 = vmax.f32 %v1123_v22, 0.0  ;;  %v844_v25 = vmax.f32 %v1155_v23, 0.0  ;;  %v591_v26 = vpop.f32.mrb[13].mxu0  ;;  %v719_v27 = vpop.f32.mrb[13].mxu1 }
 0x107   : > { %v810_v28 = vmax.f32 %v591_v26, 0.0  ;;  %v842_v29 = vmax.f32 %v719_v27, 0.0  ;;  %v1124_v30 = vpop.f32.mrb[14].mxu0  ;;  %v1156_v31 = vpop.f32.mrb[14].mxu1 }
 0x108   : > { %876 = vst [vmem:[%s1352_s29 + $0x70] sm:$0xff] %v812_v24  ;;  %908 = vst [vmem:[%s1352_s29 + $0x170] sm:$0xff] %v844_v25  ;;  %v813_v32 = vmax.f32 %v1124_v30, 0.0  ;;  %v845_v33 = vmax.f32 %v1156_v31, 0.0  ;;  %v594_v34 = vpop.f32.mrb[15].mxu0  ;;  %v722_v35 = vpop.f32.mrb[15].mxu1 }
 0x109   : > { %874 = vst [vmem:[%s1352_s29 + $0x60] sm:$0xff] %v810_v28  ;;  %906 = vst [vmem:[%s1352_s29 + $0x160] sm:$0xff] %v842_v29  ;;  %v811_v36 = vmax.f32 %v594_v34, 0.0  ;;  %v843_v37 = vmax.f32 %v722_v35, 0.0 }
 0x10a   : > { %877 = vst [vmem:[%s1352_s29 + $0x78] sm:$0xff] %v813_v32  ;;  %909 = vst [vmem:[%s1352_s29 + $0x178] sm:$0xff] %v845_v33 }
 0x10b   : > { %875 = vst [vmem:[%s1352_s29 + $0x68] sm:$0xff] %v811_v36  ;;  %907 = vst [vmem:[%s1352_s29 + $0x168] sm:$0xff] %v843_v37 }
 0x10d   : > { %v1127_v38 = vpop.f32.mrb[16].mxu0  ;;  %v1159_v39 = vpop.f32.mrb[16].mxu1 }
 0x10e   : > { %v816_v40 = vmax.f32 %v1127_v38, 0.0  ;;  %v848_v41 = vmax.f32 %v1159_v39, 0.0  ;;  %v607_v42 = vpop.f32.mrb[17].mxu0  ;;  %v735_v43 = vpop.f32.mrb[17].mxu1 }
 0x10f   : > { %v814_v44 = vmax.f32 %v607_v42, 0.0  ;;  %v846_v45 = vmax.f32 %v735_v43, 0.0  ;;  %v1128_v46 = vpop.f32.mrb[18].mxu0  ;;  %v1160_v47 = vpop.f32.mrb[18].mxu1 }
 0x110   : > { %880 = vst [vmem:[%s1352_s29 + $0x90] sm:$0xff] %v816_v40  ;;  %912 = vst [vmem:[%s1352_s29 + $0x190] sm:$0xff] %v848_v41  ;;  %v817_v48 = vmax.f32 %v1128_v46, 0.0  ;;  %v849_v49 = vmax.f32 %v1160_v47, 0.0  ;;  %v610_v50 = vpop.f32.mrb[19].mxu0  ;;  %v738_v51 = vpop.f32.mrb[19].mxu1 }
 0x111   : > { %878 = vst [vmem:[%s1352_s29 + $0x80] sm:$0xff] %v814_v44  ;;  %910 = vst [vmem:[%s1352_s29 + $0x180] sm:$0xff] %v846_v45  ;;  %v815_v52 = vmax.f32 %v610_v50, 0.0  ;;  %v847_v53 = vmax.f32 %v738_v51, 0.0 }
 0x112   : > { %881 = vst [vmem:[%s1352_s29 + $0x98] sm:$0xff] %v817_v48  ;;  %913 = vst [vmem:[%s1352_s29 + $0x198] sm:$0xff] %v849_v49 }
 0x113   : > { %879 = vst [vmem:[%s1352_s29 + $0x88] sm:$0xff] %v815_v52  ;;  %911 = vst [vmem:[%s1352_s29 + $0x188] sm:$0xff] %v847_v53 }
 0x115   : > { %v1131_v54 = vpop.f32.mrb[20].mxu0  ;;  %v1163_v55 = vpop.f32.mrb[20].mxu1 }
 0x116   : > { %v820_v56 = vmax.f32 %v1131_v54, 0.0  ;;  %v852_v57 = vmax.f32 %v1163_v55, 0.0  ;;  %v623_v58 = vpop.f32.mrb[21].mxu0  ;;  %v751_v59 = vpop.f32.mrb[21].mxu1 }
 0x117   : > { %v818_v60 = vmax.f32 %v623_v58, 0.0  ;;  %v850_v61 = vmax.f32 %v751_v59, 0.0  ;;  %v1132_v62 = vpop.f32.mrb[22].mxu0  ;;  %v1164_v63 = vpop.f32.mrb[22].mxu1 }
 0x118   : > { %884 = vst [vmem:[%s1352_s29 + $0xb0] sm:$0xff] %v820_v56  ;;  %916 = vst [vmem:[%s1352_s29 + $0x1b0] sm:$0xff] %v852_v57  ;;  %v821_v0 = vmax.f32 %v1132_v62, 0.0  ;;  %v853_v1 = vmax.f32 %v1164_v63, 0.0  ;;  %v626_v2 = vpop.f32.mrb[23].mxu0  ;;  %v754_v3 = vpop.f32.mrb[23].mxu1 }
 0x119   : > { %882 = vst [vmem:[%s1352_s29 + $0xa0] sm:$0xff] %v818_v60  ;;  %914 = vst [vmem:[%s1352_s29 + $0x1a0] sm:$0xff] %v850_v61  ;;  %v819_v4 = vmax.f32 %v626_v2, 0.0  ;;  %v851_v5 = vmax.f32 %v754_v3, 0.0 }
 0x11a   : > { %885 = vst [vmem:[%s1352_s29 + $0xb8] sm:$0xff] %v821_v0  ;;  %917 = vst [vmem:[%s1352_s29 + $0x1b8] sm:$0xff] %v853_v1 }
 0x11b   : > { %883 = vst [vmem:[%s1352_s29 + $0xa8] sm:$0xff] %v819_v4  ;;  %915 = vst [vmem:[%s1352_s29 + $0x1a8] sm:$0xff] %v851_v5 }
 0x11d   : > { %v1135_v6 = vpop.f32.mrb[24].mxu0  ;;  %v1167_v7 = vpop.f32.mrb[24].mxu1 }
 0x11e   : > { %v824_v8 = vmax.f32 %v1135_v6, 0.0  ;;  %v856_v9 = vmax.f32 %v1167_v7, 0.0  ;;  %v639_v10 = vpop.f32.mrb[25].mxu0  ;;  %v767_v11 = vpop.f32.mrb[25].mxu1 }
 0x11f   : > { %v822_v12 = vmax.f32 %v639_v10, 0.0  ;;  %v854_v13 = vmax.f32 %v767_v11, 0.0  ;;  %v1136_v14 = vpop.f32.mrb[26].mxu0  ;;  %v1168_v15 = vpop.f32.mrb[26].mxu1 }
 0x120   : > { %888 = vst [vmem:[%s1352_s29 + $0xd0] sm:$0xff] %v824_v8  ;;  %920 = vst [vmem:[%s1352_s29 + $0x1d0] sm:$0xff] %v856_v9  ;;  %v825_v16 = vmax.f32 %v1136_v14, 0.0  ;;  %v857_v17 = vmax.f32 %v1168_v15, 0.0  ;;  %v642_v18 = vpop.f32.mrb[27].mxu0  ;;  %v770_v19 = vpop.f32.mrb[27].mxu1 }
 0x121   : > { %886 = vst [vmem:[%s1352_s29 + $0xc0] sm:$0xff] %v822_v12  ;;  %918 = vst [vmem:[%s1352_s29 + $0x1c0] sm:$0xff] %v854_v13  ;;  %v823_v20 = vmax.f32 %v642_v18, 0.0  ;;  %v855_v21 = vmax.f32 %v770_v19, 0.0 }
 0x122   : > { %889 = vst [vmem:[%s1352_s29 + $0xd8] sm:$0xff] %v825_v16  ;;  %921 = vst [vmem:[%s1352_s29 + $0x1d8] sm:$0xff] %v857_v17 }
 0x123   : > { %887 = vst [vmem:[%s1352_s29 + $0xc8] sm:$0xff] %v823_v20  ;;  %919 = vst [vmem:[%s1352_s29 + $0x1c8] sm:$0xff] %v855_v21 }
 0x125   : > { %v1139_v22 = vpop.f32.mrb[28].mxu0  ;;  %v1171_v23 = vpop.f32.mrb[28].mxu1 }
 0x126   : > { %v828_v24 = vmax.f32 %v1139_v22, 0.0  ;;  %v860_v25 = vmax.f32 %v1171_v23, 0.0  ;;  %v655_v26 = vpop.f32.mrb[29].mxu0  ;;  %v783_v27 = vpop.f32.mrb[29].mxu1 }
 0x127   : > { %v826_v28 = vmax.f32 %v655_v26, 0.0  ;;  %v858_v29 = vmax.f32 %v783_v27, 0.0  ;;  %v1140_v30 = vpop.f32.mrb[30].mxu0  ;;  %v1172_v31 = vpop.f32.mrb[30].mxu1 }
 0x128   : > { %892 = vst [vmem:[%s1352_s29 + $0xf0] sm:$0xff] %v828_v24  ;;  %924 = vst [vmem:[%s1352_s29 + $0x1f0] sm:$0xff] %v860_v25  ;;  %v829_v32 = vmax.f32 %v1140_v30, 0.0  ;;  %v861_v33 = vmax.f32 %v1172_v31, 0.0  ;;  %v658_v34 = vpop.f32.mrb[31].mxu0  ;;  %v786_v35 = vpop.f32.mrb[31].mxu1 }
 0x129   : > { %890 = vst [vmem:[%s1352_s29 + $0xe0] sm:$0xff] %v826_v28  ;;  %922 = vst [vmem:[%s1352_s29 + $0x1e0] sm:$0xff] %v858_v29  ;;  %v827_v36 = vmax.f32 %v658_v34, 0.0  ;;  %v859_v37 = vmax.f32 %v786_v35, 0.0 }
 0x12a   : > { %893 = vst [vmem:[%s1352_s29 + $0xf8] sm:$0xff] %v829_v32  ;;  %925 = vst [vmem:[%s1352_s29 + $0x1f8] sm:$0xff] %v861_v33 }
 0x12b   : > { %891 = vst [vmem:[%s1352_s29 + $0xe8] sm:$0xff] %v827_v36  ;;  %923 = vst [vmem:[%s1352_s29 + $0x1e8] sm:$0xff] %v859_v37 }
 0x12c PF: > { %s12_s9 = sadd.s32 1, %s1236_s9  }
 0x12d   : > { %p9_p4 = scmp.ge.s32.totalorder %s12_s9, 5  }
 0x12f   :  { %11 = sbr.rel (!%p9_p4) target bundleno = 1 (0x1), region = 58 }

// kernel: uresnet_forward.14
= control target key start
LH: loop header
LB: loop body
LE: loop exit
PB: predicated region body
PF: predicated region fallthrough
CT: control target
= control target key end

     0   :  { %s1385_s12 = smov 0   ;;  %s1622_s0 = inlined_call_operand.vmem [shape: bf16[1536,72], index: 0, kind: input, shape index: {}]   ;;  %s1623_s1 = inlined_call_operand.vmem [shape: bf16[72,128], index: 1, kind: input, shape index: {}]   ;;  %s1624_s2 = inlined_call_operand.vmem [shape: f32[1536,128], index: 2, kind: input, shape index: {}]   ;;  %s1625_s3 = inlined_call_operand.vmem [shape: f32[1536,128], index: 3, kind: output, shape index: {}]  }
   0x1 LB: > { %s1107_s13 = sadd.s32 4294967295, %s1363_s12   ;;  %p1111_p0 = scmp.ge.s32.totalorder %s1363_s12, 1  ;;  %s1363_s12 = sphi %s1385_s12, %s13_s12  }
   0x2   : > { %p149_p1 = scmp.lt.s32.totalorder %s1363_s12, 4 }
   0x4   : > { %p150_p2 = pnand %p1111_p0, %p149_p1 }
   0x5   : > { %v1320_v0 = vld [vmem:[%s1623_s1] sm:$0xff] (!%p150_p2)   ;;  %v1321_v1 = vld [vmem:[%s1623_s1 + $0x8] sm:$0xff] (!%p150_p2)   ;;  %s1112_s18 = sshll.u32 (!%p150_p2), %s1107_s13, 6  ;;  %v1322_v2 = vld [vmem:[%s1623_s1 + $0x10] sm:$0xff] (!%p150_p2)   ;;  %vm521_vm0 = vcmask (!%p150_p2), 588800   ;;  %vm618_vm1 = vcmask (!%p150_p2), 1043456  }
   0x6   : > { %153 = sbr.rel (%p150_p2) target bundleno = 302 (0x12e), region = 32  ;;  %1226 = vmatprep.subr.bf16.mxu0 (!%p150_p2), %v1320_v0  ;;  %1300 = vmatprep.subr.bf16.mxu1 (!%p150_p2), %v1320_v0  ;;  %p179_p3 = scmp.lt.s32.totalorder (!%p150_p2), %s1112_s18, 191  ;;  %v1323_v3 = vld [vmem:[%s1623_s1 + $0x18] sm:$0xff] (!%p150_p2)   ;;  %v1324_v6 = vld [vmem:[%s1623_s1 + $0x20] ss:$0 sps:$4 sm:$0xff] (!%p150_p2)  }
   0x7   : > { %1227 = vmatpush3.bf16.msra.mxu0 (!%p150_p2), %v1320_v0  ;;  %1305 = vmatpush3.bf16.msra.mxu1 (!%p150_p2), %v1320_v0  ;;  %v620_v7 = vsel (!%p150_p2), %vm618_vm1, %v1324_v6, 0 }
   0x8   : > { %1228 = vmatprep.subr.bf16.mxu0 (!%p150_p2), %v1321_v1  ;;  %1301 = vmatprep.subr.bf16.mxu1 (!%p150_p2), %v1321_v1 }
   0xb   : > { %1229 = vmatpush3.bf16.msra.mxu0 (!%p150_p2), %v1321_v1  ;;  %1306 = vmatpush3.bf16.msra.mxu1 (!%p150_p2), %v1321_v1 }
   0xc   : > { %1230 = vmatprep.subr.bf16.mxu0 (!%p150_p2), %v1322_v2  ;;  %1302 = vmatprep.subr.bf16.mxu1 (!%p150_p2), %v1322_v2 }
   0xd   : > { %s1627_s18 = smov (!%p179_p3, %s1112_s18), 191 }
   0xe   : > { %s1113_s21 = sshll.u32 %s1627_s18, 2  ;;  %s1115_s29 = sshll.u32 %s1627_s18, 3 }
   0xf   : > { %s1411_s26 = scalar_lea.vmem %s1622_s0, %s1113_s21  ;;  %1231 = vmatpush3.bf16.msra.mxu0 %v1322_v2  ;;  %1307 = vmatpush3.bf16.msra.mxu1 %v1322_v2  ;;  %s1484_s5 = scalar_lea.vmem %s1624_s2, %s1115_s29 }
  0x10   : > { %v1325_v4 = vld [vmem:[%s1411_s26] sm:$0xff]   ;;  %1232 = vmatprep.subr.bf16.mxu0 %v1323_v3  ;;  %1303 = vmatprep.subr.bf16.mxu1 %v1323_v3  ;;  %v1327_v8 = vld [vmem:[%s1411_s26 + $0x8] sm:$0xff]   ;;  %v1329_v10 = vld [vmem:[%s1411_s26 + $0x10] sm:$0xff]   ;;  %s1497_s8 = scalar_lea.vmem %s1625_s3, %s1115_s29 }
  0x11   : > { %v1326_v5 = vld [vmem:[%s1411_s26 + $0x80] sm:$0xff]   ;;  %1236 = vmatprep.mubr.msk.bf16.mxu0 %vm521_vm0, %v1325_v4  ;;  %v1328_v9 = vld [vmem:[%s1411_s26 + $0x88] sm:$0xff]   ;;  %v1330_v11 = vld [vmem:[%s1411_s26 + $0x90] sm:$0xff]  }
  0x12   : > { %1268 = vmatprep.mubr.msk.bf16.mxu1 %vm521_vm0, %v1326_v5  ;;  %v1331_v12 = vld [vmem:[%s1411_s26 + $0x18] sm:$0xff]   ;;  %v1333_v14 = vld [vmem:[%s1411_s26 + $0x20] sm:$0xff]   ;;  %v1335_v16 = vld [vmem:[%s1411_s26 + $0x28] sm:$0xff]  }
  0x13   : > { %1233 = vmatpush3.bf16.msra.mxu0 %v1323_v3  ;;  %1308 = vmatpush3.bf16.msra.mxu1 %v1323_v3  ;;  %v1332_v13 = vld [vmem:[%s1411_s26 + $0x98] sm:$0xff]   ;;  %v1334_v15 = vld [vmem:[%s1411_s26 + $0xa0] sm:$0xff]   ;;  %v1336_v17 = vld [vmem:[%s1411_s26 + $0xa8] sm:$0xff]  }
  0x14   : > { %1310 = vmatprep.subr.msk.bf16.mxu0 %vm618_vm1, %v1324_v6  ;;  %1311 = vmatprep.subr.msk.bf16.mxu1 %vm618_vm1, %v1324_v6  ;;  %v1337_v18 = vld [vmem:[%s1411_s26 + $0x30] sm:$0xff]   ;;  %v1339_v20 = vld [vmem:[%s1411_s26 + $0x38] sm:$0xff]   ;;  %v1341_v22 = vld [vmem:[%s1411_s26 + $0x40] sm:$0xff]  }
  0x15   : > { %v1338_v19 = vld [vmem:[%s1411_s26 + $0xb0] sm:$0xff]   ;;  %v1340_v21 = vld [vmem:[%s1411_s26 + $0xb8] sm:$0xff]   ;;  %v1342_v23 = vld [vmem:[%s1411_s26 + $0xc0] sm:$0xff]  }
  0x16   : > { %v1343_v24 = vld [vmem:[%s1411_s26 + $0x48] sm:$0xff]   ;;  %v1345_v26 = vld [vmem:[%s1411_s26 + $0x50] sm:$0xff]   ;;  %v1347_v28 = vld [vmem:[%s1411_s26 + $0x58] sm:$0xff]  }
  0x17   : > { %1235 = vmatpush3.bf16.msra.mxu0 %v620_v7  ;;  %1309 = vmatpush3.bf16.msra.mxu1 %v620_v7  ;;  %v1344_v25 = vld [vmem:[%s1411_s26 + $0xc8] sm:$0xff]   ;;  %v1346_v27 = vld [vmem:[%s1411_s26 + $0xd0] sm:$0xff]   ;;  %v1348_v29 = vld [vmem:[%s1411_s26 + $0xd8] sm:$0xff]  }
  0x18   : > { %v1349_v30 = vld [vmem:[%s1411_s26 + $0x60] sm:$0xff]   ;;  %v1351_v32 = vld [vmem:[%s1411_s26 + $0x68] sm:$0xff]   ;;  %v1353_v34 = vld [vmem:[%s1411_s26 + $0x70] sm:$0xff]  }
  0x19   : > { %v1350_v31 = vld [vmem:[%s1411_s26 + $0xe0] sm:$0xff]   ;;  %v1352_v33 = vld [vmem:[%s1411_s26 + $0xe8] sm:$0xff]   ;;  %v1354_v35 = vld [vmem:[%s1411_s26 + $0xf0] sm:$0xff]  }
  0x1a   : > { %1237 = vmatmul.mubr.msk.bf16.vlgmr.msra.gmra.mrb[0].mxu0 %vm521_vm0, %v1327_v8  ;;  %1269 = vmatmul.mubr.msk.bf16.vlgmr.msra.gmra.mrb[0].mxu1 %vm521_vm0, %v1328_v9  ;;  %v1355_v36 = vld [vmem:[%s1411_s26 + $0x78] sm:$0xff]   ;;  %v272_v38 = vld [vmem:[%s1484_s5 + $0x10] sm:$0xff]  ;;  %v270_v40 = vld [vmem:[%s1484_s5] sm:$0xff] }
  0x1b   : > { %1240 = vmatprep.mubr.msk.bf16.mxu0 %vm521_vm0, %v1329_v10  ;;  %1272 = vmatprep.mubr.msk.bf16.mxu1 %vm521_vm0, %v1330_v11  ;;  %v1356_v37 = vld [vmem:[%s1411_s26 + $0xf8] sm:$0xff]   ;;  %v304_v39 = vld [vmem:[%s1484_s5 + $0x110] sm:$0xff]  ;;  %v302_v41 = vld [vmem:[%s1484_s5 + $0x100] sm:$0xff] }
  0x1c   : > { %v273_v44 = vld [vmem:[%s1484_s5 + $0x18] sm:$0xff]  ;;  %v271_v50 = vld [vmem:[%s1484_s5 + $0x8] sm:$0xff]  ;;  %v276_v6 = vld [vmem:[%s1484_s5 + $0x30] sm:$0xff] }
  0x1d   : > { %v305_v45 = vld [vmem:[%s1484_s5 + $0x118] sm:$0xff]  ;;  %v303_v51 = vld [vmem:[%s1484_s5 + $0x108] sm:$0xff]  ;;  %v308_v7 = vld [vmem:[%s1484_s5 + $0x130] sm:$0xff] }
  0x1e   : > { %v274_v8 = vld [vmem:[%s1484_s5 + $0x20] sm:$0xff] }
  0x1f   : > { %v306_v9 = vld [vmem:[%s1484_s5 + $0x120] sm:$0xff] }
  0x22   : > { %1241 = vmatmul.mubr.msk.bf16.gmra.mrb[4].mxu0 %vm521_vm0, %v1331_v12  ;;  %1273 = vmatmul.mubr.msk.bf16.gmra.mrb[4].mxu1 %vm521_vm0, %v1332_v13  ;;  %v277_v12 = vld [vmem:[%s1484_s5 + $0x38] sm:$0xff] }
  0x23   : > { %1244 = vmatprep.mubr.msk.bf16.mxu0 %vm521_vm0, %v1333_v14  ;;  %1276 = vmatprep.mubr.msk.bf16.mxu1 %vm521_vm0, %v1334_v15  ;;  %v309_v13 = vld [vmem:[%s1484_s5 + $0x138] sm:$0xff] }
  0x2a   : > { %1245 = vmatmul.mubr.msk.bf16.gmra.mrb[8].mxu0 %vm521_vm0, %v1335_v16  ;;  %1277 = vmatmul.mubr.msk.bf16.gmra.mrb[8].mxu1 %vm521_vm0, %v1336_v17 }
  0x2b   : > { %1248 = vmatprep.mubr.msk.bf16.mxu0 %vm521_vm0, %v1337_v18  ;;  %1280 = vmatprep.mubr.msk.bf16.mxu1 %vm521_vm0, %v1338_v19  ;;  %v275_v18 = vld [vmem:[%s1484_s5 + $0x28] sm:$0xff] }
  0x2c   : > { %v307_v19 = vld [vmem:[%s1484_s5 + $0x128] sm:$0xff] }
  0x32   : > { %1249 = vmatmul.mubr.msk.bf16.gmra.mrb[12].mxu0 %vm521_vm0, %v1339_v20  ;;  %1281 = vmatmul.mubr.msk.bf16.gmra.mrb[12].mxu1 %vm521_vm0, %v1340_v21 }
  0x33   : > { %1252 = vmatprep.mubr.msk.bf16.mxu0 %vm521_vm0, %v1341_v22  ;;  %1284 = vmatprep.mubr.msk.bf16.mxu1 %vm521_vm0, %v1342_v23 }
  0x3a   : > { %1253 = vmatmul.mubr.msk.bf16.gmra.mrb[16].mxu0 %vm521_vm0, %v1343_v24  ;;  %1285 = vmatmul.mubr.msk.bf16.gmra.mrb[16].mxu1 %vm521_vm0, %v1344_v25 }
  0x3b   : > { %1256 = vmatprep.mubr.msk.bf16.mxu0 %vm521_vm0, %v1345_v26  ;;  %1288 = vmatprep.mubr.msk.bf16.mxu1 %vm521_vm0, %v1346_v27 }
  0x42   : > { %1257 = vmatmul.mubr.msk.bf16.gmra.mrb[20].mxu0 %vm521_vm0, %v1347_v28  ;;  %1289 = vmatmul.mubr.msk.bf16.gmra.mrb[20].mxu1 %vm521_vm0, %v1348_v29 }
  0x43   : > { %1260 = vmatprep.mubr.msk.bf16.mxu0 %vm521_vm0, %v1349_v30  ;;  %1292 = vmatprep.mubr.msk.bf16.mxu1 %vm521_vm0, %v1350_v31 }
  0x4a   : > { %1261 = vmatmul.mubr.msk.bf16.gmra.mrb[24].mxu0 %vm521_vm0, %v1351_v32  ;;  %1293 = vmatmul.mubr.msk.bf16.gmra.mrb[24].mxu1 %vm521_vm0, %v1352_v33 }
  0x4b   : > { %1264 = vmatprep.mubr.msk.bf16.mxu0 %vm521_vm0, %v1353_v34  ;;  %1296 = vmatprep.mubr.msk.bf16.mxu1 %vm521_vm0, %v1354_v35 }
  0x52   : > { %1265 = vmatmul.mubr.msk.bf16.gmra.mrb[28].mxu0 %vm521_vm0, %v1355_v36  ;;  %1297 = vmatmul.mubr.msk.bf16.gmra.mrb[28].mxu1 %vm521_vm0, %v1356_v37 }
  0xed   : > { %v1238_v42 = vpop.f32.mrb[0].mxu0  ;;  %v1270_v43 = vpop.f32.mrb[0].mxu1 }
  0xee   : > { %v665_v46 = vadd.f32 %v1238_v42, %v272_v38  ;;  %v793_v47 = vadd.f32 %v1270_v43, %v304_v39  ;;  %v656_v48 = vpop.f32.mrb[1].mxu0  ;;  %v784_v49 = vpop.f32.mrb[1].mxu1  ;;  %v280_v38 = vld [vmem:[%s1484_s5 + $0x50] sm:$0xff] }
  0xef   : > { %v657_v52 = vadd.f32 %v656_v48, %v270_v40  ;;  %v785_v53 = vadd.f32 %v784_v49, %v302_v41  ;;  %v1239_v54 = vpop.f32.mrb[2].mxu0  ;;  %v1271_v55 = vpop.f32.mrb[2].mxu1  ;;  %v312_v39 = vld [vmem:[%s1484_s5 + $0x150] sm:$0xff]  ;;  %v278_v40 = vld [vmem:[%s1484_s5 + $0x40] sm:$0xff] }
  0xf0   : > { %v913_v56 = vmax.f32 %v665_v46, 0.0  ;;  %v945_v57 = vmax.f32 %v793_v47, 0.0  ;;  %v668_v58 = vadd.f32 %v1239_v54, %v273_v44  ;;  %v796_v59 = vadd.f32 %v1271_v55, %v305_v45  ;;  %v659_v60 = vpop.f32.mrb[3].mxu0  ;;  %v787_v61 = vpop.f32.mrb[3].mxu1  ;;  %v310_v41 = vld [vmem:[%s1484_s5 + $0x140] sm:$0xff]  ;;  %v281_v44 = vld [vmem:[%s1484_s5 + $0x58] sm:$0xff] }
  0xf1   : > { %v911_v62 = vmax.f32 %v657_v52, 0.0  ;;  %v943_v63 = vmax.f32 %v785_v53, 0.0  ;;  %v660_v0 = vadd.f32 %v659_v60, %v271_v50  ;;  %v788_v1 = vadd.f32 %v787_v61, %v303_v51  ;;  %v313_v45 = vld [vmem:[%s1484_s5 + $0x158] sm:$0xff]  ;;  %v279_v50 = vld [vmem:[%s1484_s5 + $0x48] sm:$0xff] }
  0xf2   : > { %977 = vst [vmem:[%s1497_s8 + $0x10] sm:$0xff] %v913_v56  ;;  %1009 = vst [vmem:[%s1497_s8 + $0x110] sm:$0xff] %v945_v57  ;;  %v914_v2 = vmax.f32 %v668_v58, 0.0  ;;  %v946_v3 = vmax.f32 %v796_v59, 0.0  ;;  %v311_v51 = vld [vmem:[%s1484_s5 + $0x148] sm:$0xff] }
  0xf3   : > { %975 = vst [vmem:[%s1497_s8] sm:$0xff] %v911_v62  ;;  %1007 = vst [vmem:[%s1497_s8 + $0x100] sm:$0xff] %v943_v63  ;;  %v912_v4 = vmax.f32 %v660_v0, 0.0  ;;  %v944_v5 = vmax.f32 %v788_v1, 0.0 }
  0xf4   : > { %978 = vst [vmem:[%s1497_s8 + $0x18] sm:$0xff] %v914_v2  ;;  %1010 = vst [vmem:[%s1497_s8 + $0x118] sm:$0xff] %v946_v3 }
  0xf5   : > { %976 = vst [vmem:[%s1497_s8 + $0x8] sm:$0xff] %v912_v4  ;;  %1008 = vst [vmem:[%s1497_s8 + $0x108] sm:$0xff] %v944_v5  ;;  %v1242_v10 = vpop.f32.mrb[4].mxu0  ;;  %v1274_v11 = vpop.f32.mrb[4].mxu1 }
  0xf6   : > { %v681_v14 = vadd.f32 %v1242_v10, %v276_v6  ;;  %v809_v15 = vadd.f32 %v1274_v11, %v308_v7  ;;  %v672_v16 = vpop.f32.mrb[5].mxu0  ;;  %v800_v17 = vpop.f32.mrb[5].mxu1  ;;  %v284_v6 = vld [vmem:[%s1484_s5 + $0x70] sm:$0xff] }
  0xf7   : > { %v673_v20 = vadd.f32 %v672_v16, %v274_v8  ;;  %v801_v21 = vadd.f32 %v800_v17, %v306_v9  ;;  %v1243_v22 = vpop.f32.mrb[6].mxu0  ;;  %v1275_v23 = vpop.f32.mrb[6].mxu1  ;;  %v316_v7 = vld [vmem:[%s1484_s5 + $0x170] sm:$0xff]  ;;  %v282_v8 = vld [vmem:[%s1484_s5 + $0x60] sm:$0xff] }
  0xf8   : > { %v917_v24 = vmax.f32 %v681_v14, 0.0  ;;  %v949_v25 = vmax.f32 %v809_v15, 0.0  ;;  %v684_v26 = vadd.f32 %v1243_v22, %v277_v12  ;;  %v812_v27 = vadd.f32 %v1275_v23, %v309_v13  ;;  %v675_v28 = vpop.f32.mrb[7].mxu0  ;;  %v803_v29 = vpop.f32.mrb[7].mxu1  ;;  %v314_v9 = vld [vmem:[%s1484_s5 + $0x160] sm:$0xff]  ;;  %v285_v12 = vld [vmem:[%s1484_s5 + $0x78] sm:$0xff] }
  0xf9   : > { %v915_v30 = vmax.f32 %v673_v20, 0.0  ;;  %v947_v31 = vmax.f32 %v801_v21, 0.0  ;;  %v676_v32 = vadd.f32 %v675_v28, %v275_v18  ;;  %v804_v33 = vadd.f32 %v803_v29, %v307_v19  ;;  %v317_v13 = vld [vmem:[%s1484_s5 + $0x178] sm:$0xff]  ;;  %v283_v18 = vld [vmem:[%s1484_s5 + $0x68] sm:$0xff] }
  0xfa   : > { %981 = vst [vmem:[%s1497_s8 + $0x30] sm:$0xff] %v917_v24  ;;  %1013 = vst [vmem:[%s1497_s8 + $0x130] sm:$0xff] %v949_v25  ;;  %v918_v34 = vmax.f32 %v684_v26, 0.0  ;;  %v950_v35 = vmax.f32 %v812_v27, 0.0  ;;  %v315_v19 = vld [vmem:[%s1484_s5 + $0x168] sm:$0xff] }
  0xfb   : > { %979 = vst [vmem:[%s1497_s8 + $0x20] sm:$0xff] %v915_v30  ;;  %1011 = vst [vmem:[%s1497_s8 + $0x120] sm:$0xff] %v947_v31  ;;  %v916_v36 = vmax.f32 %v676_v32, 0.0  ;;  %v948_v37 = vmax.f32 %v804_v33, 0.0 }
  0xfc   : > { %982 = vst [vmem:[%s1497_s8 + $0x38] sm:$0xff] %v918_v34  ;;  %1014 = vst [vmem:[%s1497_s8 + $0x138] sm:$0xff] %v950_v35 }
  0xfd   : > { %980 = vst [vmem:[%s1497_s8 + $0x28] sm:$0xff] %v916_v36  ;;  %1012 = vst [vmem:[%s1497_s8 + $0x128] sm:$0xff] %v948_v37  ;;  %v1246_v42 = vpop.f32.mrb[8].mxu0  ;;  %v1278_v43 = vpop.f32.mrb[8].mxu1 }
  0xfe   : > { %v697_v46 = vadd.f32 %v1246_v42, %v280_v38  ;;  %v825_v47 = vadd.f32 %v1278_v43, %v312_v39  ;;  %v688_v48 = vpop.f32.mrb[9].mxu0  ;;  %v816_v49 = vpop.f32.mrb[9].mxu1  ;;  %v288_v38 = vld [vmem:[%s1484_s5 + $0x90] sm:$0xff] }
  0xff   : > { %v689_v52 = vadd.f32 %v688_v48, %v278_v40  ;;  %v817_v53 = vadd.f32 %v816_v49, %v310_v41  ;;  %v1247_v54 = vpop.f32.mrb[10].mxu0  ;;  %v1279_v55 = vpop.f32.mrb[10].mxu1  ;;  %v320_v39 = vld [vmem:[%s1484_s5 + $0x190] sm:$0xff]  ;;  %v286_v40 = vld [vmem:[%s1484_s5 + $0x80] sm:$0xff] }
 0x100   : > { %v921_v56 = vmax.f32 %v697_v46, 0.0  ;;  %v953_v57 = vmax.f32 %v825_v47, 0.0  ;;  %v700_v58 = vadd.f32 %v1247_v54, %v281_v44  ;;  %v828_v59 = vadd.f32 %v1279_v55, %v313_v45  ;;  %v691_v60 = vpop.f32.mrb[11].mxu0  ;;  %v819_v61 = vpop.f32.mrb[11].mxu1  ;;  %v318_v41 = vld [vmem:[%s1484_s5 + $0x180] sm:$0xff]  ;;  %v289_v44 = vld [vmem:[%s1484_s5 + $0x98] sm:$0xff] }
 0x101   : > { %v919_v62 = vmax.f32 %v689_v52, 0.0  ;;  %v951_v63 = vmax.f32 %v817_v53, 0.0  ;;  %v692_v0 = vadd.f32 %v691_v60, %v279_v50  ;;  %v820_v1 = vadd.f32 %v819_v61, %v311_v51  ;;  %v321_v45 = vld [vmem:[%s1484_s5 + $0x198] sm:$0xff]  ;;  %v287_v50 = vld [vmem:[%s1484_s5 + $0x88] sm:$0xff] }
 0x102   : > { %985 = vst [vmem:[%s1497_s8 + $0x50] sm:$0xff] %v921_v56  ;;  %1017 = vst [vmem:[%s1497_s8 + $0x150] sm:$0xff] %v953_v57  ;;  %v922_v2 = vmax.f32 %v700_v58, 0.0  ;;  %v954_v3 = vmax.f32 %v828_v59, 0.0  ;;  %v319_v51 = vld [vmem:[%s1484_s5 + $0x188] sm:$0xff] }
 0x103   : > { %983 = vst [vmem:[%s1497_s8 + $0x40] sm:$0xff] %v919_v62  ;;  %1015 = vst [vmem:[%s1497_s8 + $0x140] sm:$0xff] %v951_v63  ;;  %v920_v4 = vmax.f32 %v692_v0, 0.0  ;;  %v952_v5 = vmax.f32 %v820_v1, 0.0 }
 0x104   : > { %986 = vst [vmem:[%s1497_s8 + $0x58] sm:$0xff] %v922_v2  ;;  %1018 = vst [vmem:[%s1497_s8 + $0x158] sm:$0xff] %v954_v3 }
 0x105   : > { %984 = vst [vmem:[%s1497_s8 + $0x48] sm:$0xff] %v920_v4  ;;  %1016 = vst [vmem:[%s1497_s8 + $0x148] sm:$0xff] %v952_v5  ;;  %v1250_v10 = vpop.f32.mrb[12].mxu0  ;;  %v1282_v11 = vpop.f32.mrb[12].mxu1 }
 0x106   : > { %v713_v14 = vadd.f32 %v1250_v10, %v284_v6  ;;  %v841_v15 = vadd.f32 %v1282_v11, %v316_v7  ;;  %v704_v16 = vpop.f32.mrb[13].mxu0  ;;  %v832_v17 = vpop.f32.mrb[13].mxu1  ;;  %v292_v6 = vld [vmem:[%s1484_s5 + $0xb0] sm:$0xff] }
 0x107   : > { %v705_v20 = vadd.f32 %v704_v16, %v282_v8  ;;  %v833_v21 = vadd.f32 %v832_v17, %v314_v9  ;;  %v1251_v22 = vpop.f32.mrb[14].mxu0  ;;  %v1283_v23 = vpop.f32.mrb[14].mxu1  ;;  %v324_v7 = vld [vmem:[%s1484_s5 + $0x1b0] sm:$0xff]  ;;  %v290_v8 = vld [vmem:[%s1484_s5 + $0xa0] sm:$0xff] }
 0x108   : > { %v925_v24 = vmax.f32 %v713_v14, 0.0  ;;  %v957_v25 = vmax.f32 %v841_v15, 0.0  ;;  %v716_v26 = vadd.f32 %v1251_v22, %v285_v12  ;;  %v844_v27 = vadd.f32 %v1283_v23, %v317_v13  ;;  %v707_v28 = vpop.f32.mrb[15].mxu0  ;;  %v835_v29 = vpop.f32.mrb[15].mxu1  ;;  %v322_v9 = vld [vmem:[%s1484_s5 + $0x1a0] sm:$0xff]  ;;  %v293_v12 = vld [vmem:[%s1484_s5 + $0xb8] sm:$0xff] }
 0x109   : > { %v923_v30 = vmax.f32 %v705_v20, 0.0  ;;  %v955_v31 = vmax.f32 %v833_v21, 0.0  ;;  %v708_v32 = vadd.f32 %v707_v28, %v283_v18  ;;  %v836_v33 = vadd.f32 %v835_v29, %v315_v19  ;;  %v325_v13 = vld [vmem:[%s1484_s5 + $0x1b8] sm:$0xff]  ;;  %v291_v18 = vld [vmem:[%s1484_s5 + $0xa8] sm:$0xff] }
 0x10a   : > { %989 = vst [vmem:[%s1497_s8 + $0x70] sm:$0xff] %v925_v24  ;;  %1021 = vst [vmem:[%s1497_s8 + $0x170] sm:$0xff] %v957_v25  ;;  %v926_v34 = vmax.f32 %v716_v26, 0.0  ;;  %v958_v35 = vmax.f32 %v844_v27, 0.0  ;;  %v323_v19 = vld [vmem:[%s1484_s5 + $0x1a8] sm:$0xff] }
 0x10b   : > { %987 = vst [vmem:[%s1497_s8 + $0x60] sm:$0xff] %v923_v30  ;;  %1019 = vst [vmem:[%s1497_s8 + $0x160] sm:$0xff] %v955_v31  ;;  %v924_v36 = vmax.f32 %v708_v32, 0.0  ;;  %v956_v37 = vmax.f32 %v836_v33, 0.0 }
 0x10c   : > { %990 = vst [vmem:[%s1497_s8 + $0x78] sm:$0xff] %v926_v34  ;;  %1022 = vst [vmem:[%s1497_s8 + $0x178] sm:$0xff] %v958_v35 }
 0x10d   : > { %988 = vst [vmem:[%s1497_s8 + $0x68] sm:$0xff] %v924_v36  ;;  %1020 = vst [vmem:[%s1497_s8 + $0x168] sm:$0xff] %v956_v37  ;;  %v1254_v42 = vpop.f32.mrb[16].mxu0  ;;  %v1286_v43 = vpop.f32.mrb[16].mxu1 }
 0x10e   : > { %v729_v46 = vadd.f32 %v1254_v42, %v288_v38  ;;  %v857_v47 = vadd.f32 %v1286_v43, %v320_v39  ;;  %v720_v48 = vpop.f32.mrb[17].mxu0  ;;  %v848_v49 = vpop.f32.mrb[17].mxu1  ;;  %v296_v38 = vld [vmem:[%s1484_s5 + $0xd0] sm:$0xff] }
 0x10f   : > { %v721_v52 = vadd.f32 %v720_v48, %v286_v40  ;;  %v849_v53 = vadd.f32 %v848_v49, %v318_v41  ;;  %v1255_v54 = vpop.f32.mrb[18].mxu0  ;;  %v1287_v55 = vpop.f32.mrb[18].mxu1  ;;  %v328_v39 = vld [vmem:[%s1484_s5 + $0x1d0] sm:$0xff]  ;;  %v294_v40 = vld [vmem:[%s1484_s5 + $0xc0] sm:$0xff] }
 0x110   : > { %v929_v56 = vmax.f32 %v729_v46, 0.0  ;;  %v961_v57 = vmax.f32 %v857_v47, 0.0  ;;  %v732_v58 = vadd.f32 %v1255_v54, %v289_v44  ;;  %v860_v59 = vadd.f32 %v1287_v55, %v321_v45  ;;  %v723_v60 = vpop.f32.mrb[19].mxu0  ;;  %v851_v61 = vpop.f32.mrb[19].mxu1  ;;  %v326_v41 = vld [vmem:[%s1484_s5 + $0x1c0] sm:$0xff]  ;;  %v297_v44 = vld [vmem:[%s1484_s5 + $0xd8] sm:$0xff] }
 0x111   : > { %v927_v62 = vmax.f32 %v721_v52, 0.0  ;;  %v959_v63 = vmax.f32 %v849_v53, 0.0  ;;  %v724_v0 = vadd.f32 %v723_v60, %v287_v50  ;;  %v852_v1 = vadd.f32 %v851_v61, %v319_v51  ;;  %v329_v45 = vld [vmem:[%s1484_s5 + $0x1d8] sm:$0xff]  ;;  %v295_v50 = vld [vmem:[%s1484_s5 + $0xc8] sm:$0xff] }
 0x112   : > { %993 = vst [vmem:[%s1497_s8 + $0x90] sm:$0xff] %v929_v56  ;;  %1025 = vst [vmem:[%s1497_s8 + $0x190] sm:$0xff] %v961_v57  ;;  %v930_v2 = vmax.f32 %v732_v58, 0.0  ;;  %v962_v3 = vmax.f32 %v860_v59, 0.0  ;;  %v327_v51 = vld [vmem:[%s1484_s5 + $0x1c8] sm:$0xff] }
 0x113   : > { %991 = vst [vmem:[%s1497_s8 + $0x80] sm:$0xff] %v927_v62  ;;  %1023 = vst [vmem:[%s1497_s8 + $0x180] sm:$0xff] %v959_v63  ;;  %v928_v4 = vmax.f32 %v724_v0, 0.0  ;;  %v960_v5 = vmax.f32 %v852_v1, 0.0 }
 0x114   : > { %994 = vst [vmem:[%s1497_s8 + $0x98] sm:$0xff] %v930_v2  ;;  %1026 = vst [vmem:[%s1497_s8 + $0x198] sm:$0xff] %v962_v3 }
 0x115   : > { %992 = vst [vmem:[%s1497_s8 + $0x88] sm:$0xff] %v928_v4  ;;  %1024 = vst [vmem:[%s1497_s8 + $0x188] sm:$0xff] %v960_v5  ;;  %v1258_v10 = vpop.f32.mrb[20].mxu0  ;;  %v1290_v11 = vpop.f32.mrb[20].mxu1 }
 0x116   : > { %v745_v14 = vadd.f32 %v1258_v10, %v292_v6  ;;  %v873_v15 = vadd.f32 %v1290_v11, %v324_v7  ;;  %v736_v16 = vpop.f32.mrb[21].mxu0  ;;  %v864_v17 = vpop.f32.mrb[21].mxu1  ;;  %v300_v6 = vld [vmem:[%s1484_s5 + $0xf0] sm:$0xff] }
 0x117   : > { %v737_v20 = vadd.f32 %v736_v16, %v290_v8  ;;  %v865_v21 = vadd.f32 %v864_v17, %v322_v9  ;;  %v1259_v22 = vpop.f32.mrb[22].mxu0  ;;  %v1291_v23 = vpop.f32.mrb[22].mxu1  ;;  %v332_v7 = vld [vmem:[%s1484_s5 + $0x1f0] sm:$0xff]  ;;  %v298_v8 = vld [vmem:[%s1484_s5 + $0xe0] sm:$0xff] }
 0x118   : > { %v933_v24 = vmax.f32 %v745_v14, 0.0  ;;  %v965_v25 = vmax.f32 %v873_v15, 0.0  ;;  %v748_v26 = vadd.f32 %v1259_v22, %v293_v12  ;;  %v876_v27 = vadd.f32 %v1291_v23, %v325_v13  ;;  %v739_v28 = vpop.f32.mrb[23].mxu0  ;;  %v867_v29 = vpop.f32.mrb[23].mxu1  ;;  %v330_v9 = vld [vmem:[%s1484_s5 + $0x1e0] sm:$0xff]  ;;  %v301_v12 = vld [vmem:[%s1484_s5 + $0xf8] sm:$0xff] }
 0x119   : > { %v931_v30 = vmax.f32 %v737_v20, 0.0  ;;  %v963_v31 = vmax.f32 %v865_v21, 0.0  ;;  %v740_v32 = vadd.f32 %v739_v28, %v291_v18  ;;  %v868_v33 = vadd.f32 %v867_v29, %v323_v19  ;;  %v333_v13 = vld [vmem:[%s1484_s5 + $0x1f8] sm:$0xff]  ;;  %v299_v18 = vld [vmem:[%s1484_s5 + $0xe8] sm:$0xff] }
 0x11a   : > { %997 = vst [vmem:[%s1497_s8 + $0xb0] sm:$0xff] %v933_v24  ;;  %1029 = vst [vmem:[%s1497_s8 + $0x1b0] sm:$0xff] %v965_v25  ;;  %v934_v34 = vmax.f32 %v748_v26, 0.0  ;;  %v966_v35 = vmax.f32 %v876_v27, 0.0  ;;  %v331_v19 = vld [vmem:[%s1484_s5 + $0x1e8] sm:$0xff] }
 0x11b   : > { %995 = vst [vmem:[%s1497_s8 + $0xa0] sm:$0xff] %v931_v30  ;;  %1027 = vst [vmem:[%s1497_s8 + $0x1a0] sm:$0xff] %v963_v31  ;;  %v932_v36 = vmax.f32 %v740_v32, 0.0  ;;  %v964_v37 = vmax.f32 %v868_v33, 0.0 }
 0x11c   : > { %998 = vst [vmem:[%s1497_s8 + $0xb8] sm:$0xff] %v934_v34  ;;  %1030 = vst [vmem:[%s1497_s8 + $0x1b8] sm:$0xff] %v966_v35 }
 0x11d   : > { %996 = vst [vmem:[%s1497_s8 + $0xa8] sm:$0xff] %v932_v36  ;;  %1028 = vst [vmem:[%s1497_s8 + $0x1a8] sm:$0xff] %v964_v37  ;;  %v1262_v42 = vpop.f32.mrb[24].mxu0  ;;  %v1294_v43 = vpop.f32.mrb[24].mxu1 }
 0x11e   : > { %v761_v46 = vadd.f32 %v1262_v42, %v296_v38  ;;  %v889_v47 = vadd.f32 %v1294_v43, %v328_v39  ;;  %v752_v48 = vpop.f32.mrb[25].mxu0  ;;  %v880_v49 = vpop.f32.mrb[25].mxu1 }
 0x11f   : > { %v753_v52 = vadd.f32 %v752_v48, %v294_v40  ;;  %v881_v53 = vadd.f32 %v880_v49, %v326_v41  ;;  %v1263_v54 = vpop.f32.mrb[26].mxu0  ;;  %v1295_v55 = vpop.f32.mrb[26].mxu1 }
 0x120   : > { %v937_v56 = vmax.f32 %v761_v46, 0.0  ;;  %v969_v57 = vmax.f32 %v889_v47, 0.0  ;;  %v764_v58 = vadd.f32 %v1263_v54, %v297_v44  ;;  %v892_v59 = vadd.f32 %v1295_v55, %v329_v45  ;;  %v755_v60 = vpop.f32.mrb[27].mxu0  ;;  %v883_v61 = vpop.f32.mrb[27].mxu1 }
 0x121   : > { %v935_v62 = vmax.f32 %v753_v52, 0.0  ;;  %v967_v63 = vmax.f32 %v881_v53, 0.0  ;;  %v756_v0 = vadd.f32 %v755_v60, %v295_v50  ;;  %v884_v1 = vadd.f32 %v883_v61, %v327_v51 }
 0x122   : > { %1001 = vst [vmem:[%s1497_s8 + $0xd0] sm:$0xff] %v937_v56  ;;  %1033 = vst [vmem:[%s1497_s8 + $0x1d0] sm:$0xff] %v969_v57  ;;  %v938_v2 = vmax.f32 %v764_v58, 0.0  ;;  %v970_v3 = vmax.f32 %v892_v59, 0.0 }
 0x123   : > { %999 = vst [vmem:[%s1497_s8 + $0xc0] sm:$0xff] %v935_v62  ;;  %1031 = vst [vmem:[%s1497_s8 + $0x1c0] sm:$0xff] %v967_v63  ;;  %v936_v4 = vmax.f32 %v756_v0, 0.0  ;;  %v968_v5 = vmax.f32 %v884_v1, 0.0 }
 0x124   : > { %1002 = vst [vmem:[%s1497_s8 + $0xd8] sm:$0xff] %v938_v2  ;;  %1034 = vst [vmem:[%s1497_s8 + $0x1d8] sm:$0xff] %v970_v3 }
 0x125   : > { %1000 = vst [vmem:[%s1497_s8 + $0xc8] sm:$0xff] %v936_v4  ;;  %1032 = vst [vmem:[%s1497_s8 + $0x1c8] sm:$0xff] %v968_v5  ;;  %v1266_v10 = vpop.f32.mrb[28].mxu0  ;;  %v1298_v11 = vpop.f32.mrb[28].mxu1 }
 0x126   : > { %v777_v14 = vadd.f32 %v1266_v10, %v300_v6  ;;  %v905_v15 = vadd.f32 %v1298_v11, %v332_v7  ;;  %v768_v16 = vpop.f32.mrb[29].mxu0  ;;  %v896_v17 = vpop.f32.mrb[29].mxu1 }
 0x127   : > { %v769_v20 = vadd.f32 %v768_v16, %v298_v8  ;;  %v897_v21 = vadd.f32 %v896_v17, %v330_v9  ;;  %v1267_v22 = vpop.f32.mrb[30].mxu0  ;;  %v1299_v23 = vpop.f32.mrb[30].mxu1 }
 0x128   : > { %v941_v24 = vmax.f32 %v777_v14, 0.0  ;;  %v973_v25 = vmax.f32 %v905_v15, 0.0  ;;  %v780_v26 = vadd.f32 %v1267_v22, %v301_v12  ;;  %v908_v27 = vadd.f32 %v1299_v23, %v333_v13  ;;  %v771_v28 = vpop.f32.mrb[31].mxu0  ;;  %v899_v29 = vpop.f32.mrb[31].mxu1 }
 0x129   : > { %v939_v30 = vmax.f32 %v769_v20, 0.0  ;;  %v971_v31 = vmax.f32 %v897_v21, 0.0  ;;  %v772_v32 = vadd.f32 %v771_v28, %v299_v18  ;;  %v900_v33 = vadd.f32 %v899_v29, %v331_v19 }
 0x12a   : > { %1005 = vst [vmem:[%s1497_s8 + $0xf0] sm:$0xff] %v941_v24  ;;  %1037 = vst [vmem:[%s1497_s8 + $0x1f0] sm:$0xff] %v973_v25  ;;  %v942_v34 = vmax.f32 %v780_v26, 0.0  ;;  %v974_v35 = vmax.f32 %v908_v27, 0.0 }
 0x12b   : > { %1003 = vst [vmem:[%s1497_s8 + $0xe0] sm:$0xff] %v939_v30  ;;  %1035 = vst [vmem:[%s1497_s8 + $0x1e0] sm:$0xff] %v971_v31  ;;  %v940_v36 = vmax.f32 %v772_v32, 0.0  ;;  %v972_v37 = vmax.f32 %v900_v33, 0.0 }
 0x12c   : > { %1006 = vst [vmem:[%s1497_s8 + $0xf8] sm:$0xff] %v942_v34  ;;  %1038 = vst [vmem:[%s1497_s8 + $0x1f8] sm:$0xff] %v974_v35 }
 0x12d   : > { %1004 = vst [vmem:[%s1497_s8 + $0xe8] sm:$0xff] %v940_v36  ;;  %1036 = vst [vmem:[%s1497_s8 + $0x1e8] sm:$0xff] %v972_v37 }
 0x12e PF: > { %s13_s12 = sadd.s32 1, %s1363_s12  }
 0x12f   : > { %p10_p4 = scmp.ge.s32.totalorder %s13_s12, 5  }
 0x131   :  { %12 = sbr.rel (!%p10_p4) target bundleno = 1 (0x1), region = 65 }

// kernel: uresnet_forward.15
= control target key start
LH: loop header
LB: loop body
LE: loop exit
PB: predicated region body
PF: predicated region fallthrough
CT: control target
= control target key end

     0   :  { %vm196_vm0 = vcmask 261120   ;;  %s1013_s1 = inlined_call_operand.vmem [shape: bf16[32,128], index: 1, kind: input, shape index: {}]   ;;  %s1014_s0 = inlined_call_operand.vmem [shape: bf16[384,32], index: 0, kind: input, shape index: {}]   ;;  %s1015_s2 = inlined_call_operand.vmem [shape: f32[384,128], index: 2, kind: output, shape index: {}]  }
   0x1   :  { %v726_v0 = vld [vmem:[%s1013_s1] sm:$0xff]   ;;  %v727_v1 = vld [vmem:[%s1013_s1 + $0x8] sm:$0xff]   ;;  %v732_v6 = vld [vmem:[%s1014_s0 + $0x10] sm:$0xff]  }
   0x2   :  { %670 = vmatprep.subr.bf16.mxu0 %v726_v0  ;;  %722 = vmatprep.subr.bf16.mxu1 %v726_v0  ;;  %v728_v2 = vld [vmem:[%s1014_s0] sm:$0xff]   ;;  %v730_v4 = vld [vmem:[%s1014_s0 + $0x8] sm:$0xff]   ;;  %v733_v7 = vld [vmem:[%s1014_s0 + $0x70] sm:$0xff]  }
   0x3   :  { %671 = vmatpush3.bf16.msra.mxu0 %v726_v0  ;;  %724 = vmatpush3.bf16.msra.mxu1 %v726_v0  ;;  %v729_v3 = vld [vmem:[%s1014_s0 + $0x60] sm:$0xff]   ;;  %v731_v5 = vld [vmem:[%s1014_s0 + $0x68] sm:$0xff]   ;;  %v734_v8 = vld [vmem:[%s1014_s0 + $0x18] sm:$0xff]  }
   0x4   :  { %672 = vmatprep.subr.bf16.mxu0 %v727_v1  ;;  %723 = vmatprep.subr.bf16.mxu1 %v727_v1  ;;  %v735_v9 = vld [vmem:[%s1014_s0 + $0x78] sm:$0xff]   ;;  %v736_v10 = vld [vmem:[%s1014_s0 + $0x20] sm:$0xff]   ;;  %v738_v12 = vld [vmem:[%s1014_s0 + $0x28] sm:$0xff]  }
   0x5   :  { %674 = vmatprep.mubr.msk.bf16.mxu0 %vm196_vm0, %v728_v2  ;;  %698 = vmatprep.mubr.msk.bf16.mxu1 %vm196_vm0, %v729_v3  ;;  %v737_v11 = vld [vmem:[%s1014_s0 + $0x80] sm:$0xff]   ;;  %v739_v13 = vld [vmem:[%s1014_s0 + $0x88] sm:$0xff]   ;;  %v740_v14 = vld [vmem:[%s1014_s0 + $0x30] sm:$0xff]  }
   0x6   :  { %v741_v15 = vld [vmem:[%s1014_s0 + $0x90] sm:$0xff]   ;;  %v742_v16 = vld [vmem:[%s1014_s0 + $0x38] sm:$0xff]   ;;  %v744_v18 = vld [vmem:[%s1014_s0 + $0x40] sm:$0xff]  }
   0x7   :  { %673 = vmatpush3.bf16.msra.mxu0 %v727_v1  ;;  %725 = vmatpush3.bf16.msra.mxu1 %v727_v1  ;;  %v743_v17 = vld [vmem:[%s1014_s0 + $0x98] sm:$0xff]   ;;  %v745_v19 = vld [vmem:[%s1014_s0 + $0xa0] sm:$0xff]   ;;  %v746_v20 = vld [vmem:[%s1014_s0 + $0x48] sm:$0xff]  }
   0x8   :  { %v747_v21 = vld [vmem:[%s1014_s0 + $0xa8] sm:$0xff]   ;;  %v748_v22 = vld [vmem:[%s1014_s0 + $0x50] sm:$0xff]   ;;  %v750_v24 = vld [vmem:[%s1014_s0 + $0x58] sm:$0xff]  }
   0x9   :  { %v749_v23 = vld [vmem:[%s1014_s0 + $0xb0] sm:$0xff]   ;;  %v751_v25 = vld [vmem:[%s1014_s0 + $0xb8] sm:$0xff]  }
   0xa   :  { %675 = vmatmul.mubr.msk.bf16.vlgmr.msra.gmra.mrb[0].mxu0 %vm196_vm0, %v730_v4  ;;  %699 = vmatmul.mubr.msk.bf16.vlgmr.msra.gmra.mrb[0].mxu1 %vm196_vm0, %v731_v5 }
   0xb   :  { %678 = vmatprep.mubr.msk.bf16.mxu0 %vm196_vm0, %v732_v6  ;;  %702 = vmatprep.mubr.msk.bf16.mxu1 %vm196_vm0, %v733_v7 }
  0x12   :  { %679 = vmatmul.mubr.msk.bf16.gmra.mrb[4].mxu0 %vm196_vm0, %v734_v8  ;;  %703 = vmatmul.mubr.msk.bf16.gmra.mrb[4].mxu1 %vm196_vm0, %v735_v9 }
  0x13   :  { %682 = vmatprep.mubr.msk.bf16.mxu0 %vm196_vm0, %v736_v10  ;;  %706 = vmatprep.mubr.msk.bf16.mxu1 %vm196_vm0, %v737_v11 }
  0x1a   :  { %683 = vmatmul.mubr.msk.bf16.gmra.mrb[8].mxu0 %vm196_vm0, %v738_v12  ;;  %707 = vmatmul.mubr.msk.bf16.gmra.mrb[8].mxu1 %vm196_vm0, %v739_v13 }
  0x1b   :  { %686 = vmatprep.mubr.msk.bf16.mxu0 %vm196_vm0, %v740_v14  ;;  %710 = vmatprep.mubr.msk.bf16.mxu1 %vm196_vm0, %v741_v15 }
  0x22   :  { %687 = vmatmul.mubr.msk.bf16.gmra.mrb[12].mxu0 %vm196_vm0, %v742_v16  ;;  %711 = vmatmul.mubr.msk.bf16.gmra.mrb[12].mxu1 %vm196_vm0, %v743_v17 }
  0x23   :  { %690 = vmatprep.mubr.msk.bf16.mxu0 %vm196_vm0, %v744_v18  ;;  %714 = vmatprep.mubr.msk.bf16.mxu1 %vm196_vm0, %v745_v19 }
  0x2a   :  { %691 = vmatmul.mubr.msk.bf16.gmra.mrb[16].mxu0 %vm196_vm0, %v746_v20  ;;  %715 = vmatmul.mubr.msk.bf16.gmra.mrb[16].mxu1 %vm196_vm0, %v747_v21 }
  0x2b   :  { %694 = vmatprep.mubr.msk.bf16.mxu0 %vm196_vm0, %v748_v22  ;;  %718 = vmatprep.mubr.msk.bf16.mxu1 %vm196_vm0, %v749_v23 }
  0x32   :  { %695 = vmatmul.mubr.msk.bf16.gmra.mrb[20].mxu0 %vm196_vm0, %v750_v24  ;;  %719 = vmatmul.mubr.msk.bf16.gmra.mrb[20].mxu1 %vm196_vm0, %v751_v25 }
  0xdd   :  { %v676_v26 = vpop.f32.mrb[0].mxu0  ;;  %v700_v27 = vpop.f32.mrb[0].mxu1 }
  0xde   :  { %v496_v28 = vmax.f32 %v676_v26, 0.0  ;;  %v520_v29 = vmax.f32 %v700_v27, 0.0  ;;  %v303_v30 = vpop.f32.mrb[1].mxu0  ;;  %v399_v31 = vpop.f32.mrb[1].mxu1 }
  0xdf   :  { %v494_v32 = vmax.f32 %v303_v30, 0.0  ;;  %v518_v33 = vmax.f32 %v399_v31, 0.0  ;;  %v677_v34 = vpop.f32.mrb[2].mxu0  ;;  %v701_v35 = vpop.f32.mrb[2].mxu1 }
  0xe0   :  { %544 = vst [vmem:[%s1015_s2 + $0x10] sm:$0xff] %v496_v28  ;;  %568 = vst [vmem:[%s1015_s2 + $0xd0] sm:$0xff] %v520_v29  ;;  %v497_v36 = vmax.f32 %v677_v34, 0.0  ;;  %v521_v37 = vmax.f32 %v701_v35, 0.0  ;;  %v306_v38 = vpop.f32.mrb[3].mxu0  ;;  %v402_v39 = vpop.f32.mrb[3].mxu1 }
  0xe1   :  { %542 = vst [vmem:[%s1015_s2] sm:$0xff] %v494_v32  ;;  %566 = vst [vmem:[%s1015_s2 + $0xc0] sm:$0xff] %v518_v33  ;;  %v495_v40 = vmax.f32 %v306_v38, 0.0  ;;  %v519_v41 = vmax.f32 %v402_v39, 0.0 }
  0xe2   :  { %545 = vst [vmem:[%s1015_s2 + $0x18] sm:$0xff] %v497_v36  ;;  %569 = vst [vmem:[%s1015_s2 + $0xd8] sm:$0xff] %v521_v37 }
  0xe3   :  { %543 = vst [vmem:[%s1015_s2 + $0x8] sm:$0xff] %v495_v40  ;;  %567 = vst [vmem:[%s1015_s2 + $0xc8] sm:$0xff] %v519_v41 }
  0xe5   :  { %v680_v42 = vpop.f32.mrb[4].mxu0  ;;  %v704_v43 = vpop.f32.mrb[4].mxu1 }
  0xe6   :  { %v500_v44 = vmax.f32 %v680_v42, 0.0  ;;  %v524_v45 = vmax.f32 %v704_v43, 0.0  ;;  %v319_v46 = vpop.f32.mrb[5].mxu0  ;;  %v415_v47 = vpop.f32.mrb[5].mxu1 }
  0xe7   :  { %v498_v48 = vmax.f32 %v319_v46, 0.0  ;;  %v522_v49 = vmax.f32 %v415_v47, 0.0  ;;  %v681_v50 = vpop.f32.mrb[6].mxu0  ;;  %v705_v51 = vpop.f32.mrb[6].mxu1 }
  0xe8   :  { %548 = vst [vmem:[%s1015_s2 + $0x30] sm:$0xff] %v500_v44  ;;  %572 = vst [vmem:[%s1015_s2 + $0xf0] sm:$0xff] %v524_v45  ;;  %v501_v52 = vmax.f32 %v681_v50, 0.0  ;;  %v525_v53 = vmax.f32 %v705_v51, 0.0  ;;  %v322_v54 = vpop.f32.mrb[7].mxu0  ;;  %v418_v55 = vpop.f32.mrb[7].mxu1 }
  0xe9   :  { %546 = vst [vmem:[%s1015_s2 + $0x20] sm:$0xff] %v498_v48  ;;  %570 = vst [vmem:[%s1015_s2 + $0xe0] sm:$0xff] %v522_v49  ;;  %v499_v56 = vmax.f32 %v322_v54, 0.0  ;;  %v523_v57 = vmax.f32 %v418_v55, 0.0 }
  0xea   :  { %549 = vst [vmem:[%s1015_s2 + $0x38] sm:$0xff] %v501_v52  ;;  %573 = vst [vmem:[%s1015_s2 + $0xf8] sm:$0xff] %v525_v53 }
  0xeb   :  { %547 = vst [vmem:[%s1015_s2 + $0x28] sm:$0xff] %v499_v56  ;;  %571 = vst [vmem:[%s1015_s2 + $0xe8] sm:$0xff] %v523_v57 }
  0xed   :  { %v684_v58 = vpop.f32.mrb[8].mxu0  ;;  %v708_v59 = vpop.f32.mrb[8].mxu1 }
  0xee   :  { %v504_v60 = vmax.f32 %v684_v58, 0.0  ;;  %v528_v61 = vmax.f32 %v708_v59, 0.0  ;;  %v335_v62 = vpop.f32.mrb[9].mxu0  ;;  %v431_v63 = vpop.f32.mrb[9].mxu1 }
  0xef   :  { %v502_v0 = vmax.f32 %v335_v62, 0.0  ;;  %v526_v1 = vmax.f32 %v431_v63, 0.0  ;;  %v685_v2 = vpop.f32.mrb[10].mxu0  ;;  %v709_v3 = vpop.f32.mrb[10].mxu1 }
  0xf0   :  { %552 = vst [vmem:[%s1015_s2 + $0x50] sm:$0xff] %v504_v60  ;;  %576 = vst [vmem:[%s1015_s2 + $0x110] sm:$0xff] %v528_v61  ;;  %v505_v4 = vmax.f32 %v685_v2, 0.0  ;;  %v529_v5 = vmax.f32 %v709_v3, 0.0  ;;  %v338_v6 = vpop.f32.mrb[11].mxu0  ;;  %v434_v7 = vpop.f32.mrb[11].mxu1 }
  0xf1   :  { %550 = vst [vmem:[%s1015_s2 + $0x40] sm:$0xff] %v502_v0  ;;  %574 = vst [vmem:[%s1015_s2 + $0x100] sm:$0xff] %v526_v1  ;;  %v503_v8 = vmax.f32 %v338_v6, 0.0  ;;  %v527_v9 = vmax.f32 %v434_v7, 0.0 }
  0xf2   :  { %553 = vst [vmem:[%s1015_s2 + $0x58] sm:$0xff] %v505_v4  ;;  %577 = vst [vmem:[%s1015_s2 + $0x118] sm:$0xff] %v529_v5 }
  0xf3   :  { %551 = vst [vmem:[%s1015_s2 + $0x48] sm:$0xff] %v503_v8  ;;  %575 = vst [vmem:[%s1015_s2 + $0x108] sm:$0xff] %v527_v9 }
  0xf5   :  { %v688_v10 = vpop.f32.mrb[12].mxu0  ;;  %v712_v11 = vpop.f32.mrb[12].mxu1 }
  0xf6   :  { %v508_v12 = vmax.f32 %v688_v10, 0.0  ;;  %v532_v13 = vmax.f32 %v712_v11, 0.0  ;;  %v351_v14 = vpop.f32.mrb[13].mxu0  ;;  %v447_v15 = vpop.f32.mrb[13].mxu1 }
  0xf7   :  { %v506_v16 = vmax.f32 %v351_v14, 0.0  ;;  %v530_v17 = vmax.f32 %v447_v15, 0.0  ;;  %v689_v18 = vpop.f32.mrb[14].mxu0  ;;  %v713_v19 = vpop.f32.mrb[14].mxu1 }
  0xf8   :  { %556 = vst [vmem:[%s1015_s2 + $0x70] sm:$0xff] %v508_v12  ;;  %580 = vst [vmem:[%s1015_s2 + $0x130] sm:$0xff] %v532_v13  ;;  %v509_v20 = vmax.f32 %v689_v18, 0.0  ;;  %v533_v21 = vmax.f32 %v713_v19, 0.0  ;;  %v354_v22 = vpop.f32.mrb[15].mxu0  ;;  %v450_v23 = vpop.f32.mrb[15].mxu1 }
  0xf9   :  { %554 = vst [vmem:[%s1015_s2 + $0x60] sm:$0xff] %v506_v16  ;;  %578 = vst [vmem:[%s1015_s2 + $0x120] sm:$0xff] %v530_v17  ;;  %v507_v24 = vmax.f32 %v354_v22, 0.0  ;;  %v531_v25 = vmax.f32 %v450_v23, 0.0 }
  0xfa   :  { %557 = vst [vmem:[%s1015_s2 + $0x78] sm:$0xff] %v509_v20  ;;  %581 = vst [vmem:[%s1015_s2 + $0x138] sm:$0xff] %v533_v21 }
  0xfb   :  { %555 = vst [vmem:[%s1015_s2 + $0x68] sm:$0xff] %v507_v24  ;;  %579 = vst [vmem:[%s1015_s2 + $0x128] sm:$0xff] %v531_v25 }
  0xfd   :  { %v692_v26 = vpop.f32.mrb[16].mxu0  ;;  %v716_v27 = vpop.f32.mrb[16].mxu1 }
  0xfe   :  { %v512_v28 = vmax.f32 %v692_v26, 0.0  ;;  %v536_v29 = vmax.f32 %v716_v27, 0.0  ;;  %v367_v30 = vpop.f32.mrb[17].mxu0  ;;  %v463_v31 = vpop.f32.mrb[17].mxu1 }
  0xff   :  { %v510_v32 = vmax.f32 %v367_v30, 0.0  ;;  %v534_v33 = vmax.f32 %v463_v31, 0.0  ;;  %v693_v34 = vpop.f32.mrb[18].mxu0  ;;  %v717_v35 = vpop.f32.mrb[18].mxu1 }
 0x100   :  { %560 = vst [vmem:[%s1015_s2 + $0x90] sm:$0xff] %v512_v28  ;;  %584 = vst [vmem:[%s1015_s2 + $0x150] sm:$0xff] %v536_v29  ;;  %v513_v36 = vmax.f32 %v693_v34, 0.0  ;;  %v537_v37 = vmax.f32 %v717_v35, 0.0  ;;  %v370_v38 = vpop.f32.mrb[19].mxu0  ;;  %v466_v39 = vpop.f32.mrb[19].mxu1 }
 0x101   :  { %558 = vst [vmem:[%s1015_s2 + $0x80] sm:$0xff] %v510_v32  ;;  %582 = vst [vmem:[%s1015_s2 + $0x140] sm:$0xff] %v534_v33  ;;  %v511_v40 = vmax.f32 %v370_v38, 0.0  ;;  %v535_v41 = vmax.f32 %v466_v39, 0.0 }
 0x102   :  { %561 = vst [vmem:[%s1015_s2 + $0x98] sm:$0xff] %v513_v36  ;;  %585 = vst [vmem:[%s1015_s2 + $0x158] sm:$0xff] %v537_v37 }
 0x103   :  { %559 = vst [vmem:[%s1015_s2 + $0x88] sm:$0xff] %v511_v40  ;;  %583 = vst [vmem:[%s1015_s2 + $0x148] sm:$0xff] %v535_v41 }
 0x105   :  { %v696_v42 = vpop.f32.mrb[20].mxu0  ;;  %v720_v43 = vpop.f32.mrb[20].mxu1 }
 0x106   :  { %v516_v44 = vmax.f32 %v696_v42, 0.0  ;;  %v540_v45 = vmax.f32 %v720_v43, 0.0  ;;  %v383_v46 = vpop.f32.mrb[21].mxu0  ;;  %v479_v47 = vpop.f32.mrb[21].mxu1 }
 0x107   :  { %v514_v48 = vmax.f32 %v383_v46, 0.0  ;;  %v538_v49 = vmax.f32 %v479_v47, 0.0  ;;  %v697_v50 = vpop.f32.mrb[22].mxu0  ;;  %v721_v51 = vpop.f32.mrb[22].mxu1 }
 0x108   :  { %564 = vst [vmem:[%s1015_s2 + $0xb0] sm:$0xff] %v516_v44  ;;  %588 = vst [vmem:[%s1015_s2 + $0x170] sm:$0xff] %v540_v45  ;;  %v517_v52 = vmax.f32 %v697_v50, 0.0  ;;  %v541_v53 = vmax.f32 %v721_v51, 0.0  ;;  %v386_v54 = vpop.f32.mrb[23].mxu0  ;;  %v482_v55 = vpop.f32.mrb[23].mxu1 }
 0x109   :  { %562 = vst [vmem:[%s1015_s2 + $0xa0] sm:$0xff] %v514_v48  ;;  %586 = vst [vmem:[%s1015_s2 + $0x160] sm:$0xff] %v538_v49  ;;  %v515_v56 = vmax.f32 %v386_v54, 0.0  ;;  %v539_v57 = vmax.f32 %v482_v55, 0.0 }
 0x10a   :  { %565 = vst [vmem:[%s1015_s2 + $0xb8] sm:$0xff] %v517_v52  ;;  %589 = vst [vmem:[%s1015_s2 + $0x178] sm:$0xff] %v541_v53 }
 0x10b   :  { %563 = vst [vmem:[%s1015_s2 + $0xa8] sm:$0xff] %v515_v56  ;;  %587 = vst [vmem:[%s1015_s2 + $0x168] sm:$0xff] %v539_v57 }

// kernel: uresnet_forward.16
= control target key start
LH: loop header
LB: loop body
LE: loop exit
PB: predicated region body
PF: predicated region fallthrough
CT: control target
= control target key end

     0   :  { %v874_v0 = vmov 0   ;;  %vm412_vm0 = vcmask 392192   ;;  %s1134_s1 = inlined_call_operand.vmem [shape: bf16[432,128], index: 1, kind: input, shape index: {}]   ;;  %s1135_s0 = inlined_call_operand.vmem [shape: bf16[128,432], index: 0, kind: input, shape index: {}]   ;;  %s1136_s2 = inlined_call_operand.vmem [shape: f32[128,128], index: 2, kind: output, shape index: {}]  }
   0x1   :  { %534 = vmatprep.subr.bf16.mxu1 %v874_v0  ;;  %v799_v1 = vld [vmem:[%s1134_s1 + $0x80] sm:$0xff]   ;;  %v800_v2 = vld [vmem:[%s1134_s1 + $0x88] sm:$0xff]   ;;  %v803_v5 = vld [vmem:[%s1134_s1 + $0x90] sm:$0xff]  }
   0x2   :  { %535 = vmatpush1.bf16.msra.mxu1 %v799_v1  ;;  %v801_v3 = vld [vmem:[%s1134_s1 + $0x40] sm:$0xff]   ;;  %v804_v6 = vld [vmem:[%s1134_s1 + $0x48] sm:$0xff]   ;;  %v807_v8 = vld [vmem:[%s1134_s1 + $0x50] sm:$0xff]  }
   0x3   :  { %536 = vmatprep.subr.bf16.mxu1 %v874_v0  ;;  %v802_v4 = vld [vmem:[%s1134_s1] sm:$0xff]   ;;  %734 = vmatprep.subr.bf16.mxu0 %v801_v3  ;;  %v805_v7 = vld [vmem:[%s1134_s1 + $0x8] sm:$0xff]   ;;  %v808_v9 = vld [vmem:[%s1134_s1 + $0x10] sm:$0xff]  }
   0x4   :  { %735 = vmatpush3.bf16.msra.mxu0 %v802_v4  ;;  %v806_v10 = vld [vmem:[%s1134_s1 + $0x98] sm:$0xff]   ;;  %v809_v12 = vld [vmem:[%s1134_s1 + $0xa0] sm:$0xff]   ;;  %v812_v15 = vld [vmem:[%s1134_s1 + $0xa8] sm:$0xff]  }
   0x5   :  { %736 = vmatprep.subr.bf16.mxu0 %v804_v6  ;;  %v810_v11 = vld [vmem:[%s1134_s1 + $0x58] sm:$0xff]   ;;  %v813_v14 = vld [vmem:[%s1134_s1 + $0x60] sm:$0xff]   ;;  %v816_v17 = vld [vmem:[%s1134_s1 + $0x68] sm:$0xff]  }
   0x6   :  { %537 = vmatpush1.bf16.msra.mxu1 %v800_v2  ;;  %v811_v13 = vld [vmem:[%s1134_s1 + $0x18] sm:$0xff]   ;;  %v814_v16 = vld [vmem:[%s1134_s1 + $0x20] sm:$0xff]   ;;  %v815_v18 = vld [vmem:[%s1134_s1 + $0xb0] sm:$0xff]  }
   0x7   :  { %538 = vmatprep.subr.bf16.mxu1 %v874_v0  ;;  %v817_v19 = vld [vmem:[%s1134_s1 + $0x28] sm:$0xff]   ;;  %v819_v20 = vld [vmem:[%s1134_s1 + $0x70] sm:$0xff]   ;;  %v818_v21 = vld [vmem:[%s1134_s1 + $0xb8] sm:$0xff]  }
   0x8   :  { %737 = vmatpush3.bf16.msra.mxu0 %v805_v7  ;;  %v820_v22 = vld [vmem:[%s1134_s1 + $0x30] sm:$0xff]   ;;  %v822_v23 = vld [vmem:[%s1134_s1 + $0x78] sm:$0xff]   ;;  %v821_v27 = vld [vmem:[%s1134_s1 + $0xc0] sm:$0xff]  }
   0x9   :  { %738 = vmatprep.subr.bf16.mxu0 %v807_v8  ;;  %v826_v24 = vld [vmem:[%s1135_s0 + $0x4] ss:$16 sps:$4 sm:$0xff]   ;;  %v823_v25 = vld [vmem:[%s1134_s1 + $0x38] sm:$0xff]   ;;  %v824_v28 = vld [vmem:[%s1135_s0] ss:$16 sps:$4 sm:$0xff]  }
   0xa   :  { %539 = vmatpush1.bf16.msra.mxu1 %v803_v5  ;;  %469 = vmatprep.mubr.bf16.mxu0 %v826_v24  ;;  %v831_v26 = vld [vmem:[%s1135_s0 + $0xc] ss:$16 sps:$4 sm:$0xff]   ;;  %v832_v29 = vld [vmem:[%s1135_s0 + $0x24] ss:$16 sps:$4 sm:$0xff]   ;;  %v834_v32 = vld [vmem:[%s1135_s0 + $0x20] ss:$16 sps:$4 sm:$0xff]  }
   0xb   :  { %540 = vmatprep.subr.bf16.mxu1 %v874_v0  ;;  %726 = vmatprep.mubr.msk.bf16.mxu1 %vm412_vm0, %v831_v26  ;;  %v827_v30 = vld [vmem:[%s1134_s1 + $0xc8] sm:$0xff]   ;;  %v828_v31 = vld [vmem:[%s1134_s1 + $0xd0] sm:$0xff]  }
   0xc   :  { %739 = vmatpush3.bf16.msra.mxu0 %v808_v9  ;;  %v829_v33 = vld [vmem:[%s1135_s0 + $0x8] ss:$16 sps:$4 sm:$0xff]   ;;  %v838_v34 = vld [vmem:[%s1135_s0 + $0x44] ss:$16 sps:$4 sm:$0xff]   ;;  %v835_v35 = vld [vmem:[%s1135_s0 + $0x2c] ss:$16 sps:$4 sm:$0xff]  }
   0xd   :  { %740 = vmatprep.subr.bf16.mxu0 %v810_v11  ;;  %v840_v36 = vld [vmem:[%s1135_s0 + $0x40] ss:$16 sps:$4 sm:$0xff]   ;;  %v837_v37 = vld [vmem:[%s1135_s0 + $0x28] ss:$16 sps:$4 sm:$0xff]   ;;  %v844_v38 = vld [vmem:[%s1135_s0 + $0x64] ss:$16 sps:$4 sm:$0xff]  }
   0xe   :  { %541 = vmatpush1.bf16.msra.mxu1 %v806_v10  ;;  %v841_v39 = vld [vmem:[%s1135_s0 + $0x4c] ss:$16 sps:$4 sm:$0xff]   ;;  %v846_v40 = vld [vmem:[%s1135_s0 + $0x60] ss:$16 sps:$4 sm:$0xff]   ;;  %v843_v41 = vld [vmem:[%s1135_s0 + $0x48] ss:$16 sps:$4 sm:$0xff]  }
   0xf   :  { %542 = vmatprep.subr.bf16.mxu1 %v874_v0  ;;  %v850_v42 = vld [vmem:[%s1135_s0 + $0x84] ss:$16 sps:$4 sm:$0xff]   ;;  %v847_v43 = vld [vmem:[%s1135_s0 + $0x6c] ss:$16 sps:$4 sm:$0xff]   ;;  %v852_v44 = vld [vmem:[%s1135_s0 + $0x80] ss:$16 sps:$4 sm:$0xff]  }
  0x10   :  { %741 = vmatpush3.bf16.msra.mxu0 %v811_v13  ;;  %v849_v45 = vld [vmem:[%s1135_s0 + $0x68] ss:$16 sps:$4 sm:$0xff]   ;;  %v856_v46 = vld [vmem:[%s1135_s0 + $0xa4] ss:$16 sps:$4 sm:$0xff]   ;;  %v853_v47 = vld [vmem:[%s1135_s0 + $0x8c] ss:$16 sps:$4 sm:$0xff]  }
  0x11   :  { %742 = vmatprep.subr.bf16.mxu0 %v813_v14  ;;  %v858_v48 = vld [vmem:[%s1135_s0 + $0xa0] ss:$16 sps:$4 sm:$0xff]   ;;  %v855_v49 = vld [vmem:[%s1135_s0 + $0x88] ss:$16 sps:$4 sm:$0xff]   ;;  %v862_v50 = vld [vmem:[%s1135_s0 + $0xc4] ss:$16 sps:$4 sm:$0xff]  }
  0x12   :  { %543 = vmatpush1.bf16.msra.mxu1 %v809_v12  ;;  %v859_v51 = vld [vmem:[%s1135_s0 + $0xac] ss:$16 sps:$4 sm:$0xff]   ;;  %v864_v52 = vld [vmem:[%s1135_s0 + $0xc0] ss:$16 sps:$4 sm:$0xff]   ;;  %v861_v53 = vld [vmem:[%s1135_s0 + $0xa8] ss:$16 sps:$4 sm:$0xff]  }
  0x13   :  { %544 = vmatprep.subr.bf16.mxu1 %v874_v0  ;;  %v868_v54 = vld [vmem:[%s1135_s0 + $0xe4] ss:$16 sps:$4 sm:$0xff]   ;;  %v865_v55 = vld [vmem:[%s1135_s0 + $0xcc] ss:$16 sps:$4 sm:$0xff]   ;;  %v870_v56 = vld [vmem:[%s1135_s0 + $0xe0] ss:$16 sps:$4 sm:$0xff]  }
  0x14   :  { %743 = vmatpush3.bf16.msra.mxu0 %v814_v16  ;;  %v867_v57 = vld [vmem:[%s1135_s0 + $0xc8] ss:$16 sps:$4 sm:$0xff]   ;;  %v871_v58 = vld [vmem:[%s1135_s0 + $0xec] ss:$16 sps:$4 sm:$0xff]  }
  0x15   :  { %744 = vmatprep.subr.bf16.mxu0 %v816_v17  ;;  %v873_v59 = vld [vmem:[%s1135_s0 + $0xe8] ss:$16 sps:$4 sm:$0xff]  }
  0x16   :  { %545 = vmatpush1.bf16.msra.mxu1 %v812_v15 }
  0x17   :  { %546 = vmatprep.subr.bf16.mxu1 %v874_v0 }
  0x18   :  { %745 = vmatpush3.bf16.msra.mxu0 %v817_v19 }
  0x19   :  { %746 = vmatprep.subr.bf16.mxu0 %v819_v20 }
  0x1a   :  { %547 = vmatpush1.bf16.msra.mxu1 %v815_v18 }
  0x1b   :  { %548 = vmatprep.subr.bf16.mxu1 %v874_v0 }
  0x1c   :  { %747 = vmatpush3.bf16.msra.mxu0 %v820_v22 }
  0x1d   :  { %748 = vmatprep.subr.bf16.mxu0 %v822_v23 }
  0x1e   :  { %549 = vmatpush1.bf16.msra.mxu1 %v818_v21 }
  0x1f   :  { %550 = vmatprep.subr.bf16.mxu1 %v874_v0 }
  0x20   :  { %749 = vmatpush3.bf16.msra.mxu0 %v823_v25 }
  0x22   :  { %551 = vmatpush1.bf16.msra.mxu1 %v821_v27 }
  0x23   :  { %552 = vmatprep.subr.bf16.mxu1 %v874_v0  ;;  %470 = vmatmul.mubr.bf16.vlgmr.msra.gmra.mrb[0].mxu0 %v824_v28 }
  0x24   :  { %477 = vmatprep.mubr.bf16.mxu0 %v832_v29 }
  0x26   :  { %553 = vmatpush1.bf16.msra.mxu1 %v827_v30 }
  0x27   :  { %554 = vmatprep.subr.bf16.mxu1 %v874_v0 }
  0x2a   :  { %555 = vmatpush1.bf16.msra.mxu1 %v828_v31 }
  0x2b   :  { %478 = vmatmul.mubr.bf16.gmra.mrb[4].mxu0 %v834_v32 }
  0x2c   :  { %485 = vmatprep.mubr.bf16.mxu0 %v838_v34 }
  0x2d   :  { %567 = vmatmul.mubr.bf16.vlgmr.msra.gmra.mrb[0].mxu1 %v829_v33 }
  0x2e   :  { %727 = vmatprep.mubr.msk.bf16.mxu1 %vm412_vm0, %v835_v35 }
  0x33   :  { %486 = vmatmul.mubr.bf16.gmra.mrb[8].mxu0 %v840_v36 }
  0x34   :  { %493 = vmatprep.mubr.bf16.mxu0 %v844_v38 }
  0x35   :  { %575 = vmatmul.mubr.bf16.gmra.mrb[4].mxu1 %v837_v37 }
  0x36   :  { %728 = vmatprep.mubr.msk.bf16.mxu1 %vm412_vm0, %v841_v39 }
  0x3b   :  { %494 = vmatmul.mubr.bf16.gmra.mrb[12].mxu0 %v846_v40 }
  0x3c   :  { %501 = vmatprep.mubr.bf16.mxu0 %v850_v42 }
  0x3d   :  { %583 = vmatmul.mubr.bf16.gmra.mrb[8].mxu1 %v843_v41 }
  0x3e   :  { %729 = vmatprep.mubr.msk.bf16.mxu1 %vm412_vm0, %v847_v43 }
  0x43   :  { %502 = vmatmul.mubr.bf16.gmra.mrb[16].mxu0 %v852_v44 }
  0x44   :  { %509 = vmatprep.mubr.bf16.mxu0 %v856_v46 }
  0x45   :  { %591 = vmatmul.mubr.bf16.gmra.mrb[12].mxu1 %v849_v45 }
  0x46   :  { %730 = vmatprep.mubr.msk.bf16.mxu1 %vm412_vm0, %v853_v47 }
  0x4b   :  { %510 = vmatmul.mubr.bf16.gmra.mrb[20].mxu0 %v858_v48 }
  0x4c   :  { %517 = vmatprep.mubr.bf16.mxu0 %v862_v50 }
  0x4d   :  { %599 = vmatmul.mubr.bf16.gmra.mrb[16].mxu1 %v855_v49 }
  0x4e   :  { %731 = vmatprep.mubr.msk.bf16.mxu1 %vm412_vm0, %v859_v51 }
  0x53   :  { %518 = vmatmul.mubr.bf16.gmra.mrb[24].mxu0 %v864_v52 }
  0x54   :  { %525 = vmatprep.mubr.bf16.mxu0 %v868_v54 }
  0x55   :  { %607 = vmatmul.mubr.bf16.gmra.mrb[20].mxu1 %v861_v53 }
  0x56   :  { %732 = vmatprep.mubr.msk.bf16.mxu1 %vm412_vm0, %v865_v55 }
  0x5b   :  { %526 = vmatmul.mubr.bf16.gmra.mrb[28].mxu0 %v870_v56 }
  0x5d   :  { %615 = vmatmul.mubr.bf16.gmra.mrb[24].mxu1 %v867_v57 }
  0x5e   :  { %733 = vmatprep.mubr.msk.bf16.mxu1 %vm412_vm0, %v871_v58 }
  0x65   :  { %623 = vmatmul.mubr.bf16.gmra.mrb[28].mxu1 %v873_v59 }
  0xf6   :  { %v750_v60 = vpop.f32.mrb[0].mxu0 }
  0xf7   :  { %v751_v61 = vpop.f32.mrb[1].mxu0 }
  0xf8   :  { %v752_v62 = vadd.f32 %v751_v61, %v750_v60  ;;  %v753_v63 = vpop.f32.mrb[2].mxu0 }
  0xf9   :  { %v754_v0 = vpop.f32.mrb[3].mxu0 }
  0xfa   :  { %v755_v1 = vadd.f32 %v754_v0, %v753_v63 }
  0xfe   :  { %v756_v2 = vpop.f32.mrb[4].mxu0 }
  0xff   :  { %v757_v4 = vpop.f32.mrb[5].mxu0 }
 0x100   :  { %v568_v3 = vpop.f32.mrb[0].mxu1  ;;  %v758_v7 = vadd.f32 %v757_v4, %v756_v2  ;;  %v759_v8 = vpop.f32.mrb[6].mxu0 }
 0x101   :  { %v569_v5 = vadd.f32 %v752_v62, %v568_v3  ;;  %v570_v6 = vpop.f32.mrb[1].mxu1  ;;  %v760_v10 = vpop.f32.mrb[7].mxu0 }
 0x102   :  { %v571_v9 = vpop.f32.mrb[2].mxu1  ;;  %v761_v14 = vadd.f32 %v760_v10, %v759_v8 }
 0x103   :  { %v631_v11 = vmax.f32 %v569_v5, 0.0  ;;  %v572_v12 = vadd.f32 %v755_v1, %v571_v9  ;;  %v573_v13 = vpop.f32.mrb[3].mxu1 }
 0x105   :  { %647 = vst [vmem:[%s1136_s2] sm:$0xff] %v631_v11  ;;  %v632_v15 = vmax.f32 %v572_v12, 0.0 }
 0x106   :  { %v762_v16 = vpop.f32.mrb[8].mxu0 }
 0x107   :  { %648 = vst [vmem:[%s1136_s2 + $0x8] sm:$0xff] %v632_v15  ;;  %v763_v18 = vpop.f32.mrb[9].mxu0 }
 0x108   :  { %v576_v17 = vpop.f32.mrb[4].mxu1  ;;  %v764_v21 = vadd.f32 %v763_v18, %v762_v16  ;;  %v765_v22 = vpop.f32.mrb[10].mxu0 }
 0x109   :  { %v577_v19 = vadd.f32 %v758_v7, %v576_v17  ;;  %v578_v20 = vpop.f32.mrb[5].mxu1  ;;  %v766_v24 = vpop.f32.mrb[11].mxu0 }
 0x10a   :  { %v579_v23 = vpop.f32.mrb[6].mxu1  ;;  %v767_v28 = vadd.f32 %v766_v24, %v765_v22 }
 0x10b   :  { %v633_v25 = vmax.f32 %v577_v19, 0.0  ;;  %v580_v26 = vadd.f32 %v761_v14, %v579_v23  ;;  %v581_v27 = vpop.f32.mrb[7].mxu1 }
 0x10d   :  { %649 = vst [vmem:[%s1136_s2 + $0x10] sm:$0xff] %v633_v25  ;;  %v634_v29 = vmax.f32 %v580_v26, 0.0 }
 0x10e   :  { %v768_v30 = vpop.f32.mrb[12].mxu0 }
 0x10f   :  { %650 = vst [vmem:[%s1136_s2 + $0x18] sm:$0xff] %v634_v29  ;;  %v769_v32 = vpop.f32.mrb[13].mxu0 }
 0x110   :  { %v584_v31 = vpop.f32.mrb[8].mxu1  ;;  %v770_v35 = vadd.f32 %v769_v32, %v768_v30  ;;  %v771_v36 = vpop.f32.mrb[14].mxu0 }
 0x111   :  { %v585_v33 = vadd.f32 %v764_v21, %v584_v31  ;;  %v586_v34 = vpop.f32.mrb[9].mxu1  ;;  %v772_v38 = vpop.f32.mrb[15].mxu0 }
 0x112   :  { %v587_v37 = vpop.f32.mrb[10].mxu1  ;;  %v773_v42 = vadd.f32 %v772_v38, %v771_v36 }
 0x113   :  { %v635_v39 = vmax.f32 %v585_v33, 0.0  ;;  %v588_v40 = vadd.f32 %v767_v28, %v587_v37  ;;  %v589_v41 = vpop.f32.mrb[11].mxu1 }
 0x115   :  { %651 = vst [vmem:[%s1136_s2 + $0x20] sm:$0xff] %v635_v39  ;;  %v636_v43 = vmax.f32 %v588_v40, 0.0 }
 0x116   :  { %v774_v44 = vpop.f32.mrb[16].mxu0 }
 0x117   :  { %652 = vst [vmem:[%s1136_s2 + $0x28] sm:$0xff] %v636_v43  ;;  %v775_v46 = vpop.f32.mrb[17].mxu0 }
 0x118   :  { %v592_v45 = vpop.f32.mrb[12].mxu1  ;;  %v776_v49 = vadd.f32 %v775_v46, %v774_v44  ;;  %v777_v50 = vpop.f32.mrb[18].mxu0 }
 0x119   :  { %v593_v47 = vadd.f32 %v770_v35, %v592_v45  ;;  %v594_v48 = vpop.f32.mrb[13].mxu1  ;;  %v778_v52 = vpop.f32.mrb[19].mxu0 }
 0x11a   :  { %v595_v51 = vpop.f32.mrb[14].mxu1  ;;  %v779_v56 = vadd.f32 %v778_v52, %v777_v50 }
 0x11b   :  { %v637_v53 = vmax.f32 %v593_v47, 0.0  ;;  %v596_v54 = vadd.f32 %v773_v42, %v595_v51  ;;  %v597_v55 = vpop.f32.mrb[15].mxu1 }
 0x11d   :  { %653 = vst [vmem:[%s1136_s2 + $0x30] sm:$0xff] %v637_v53  ;;  %v638_v57 = vmax.f32 %v596_v54, 0.0 }
 0x11e   :  { %v780_v58 = vpop.f32.mrb[20].mxu0 }
 0x11f   :  { %654 = vst [vmem:[%s1136_s2 + $0x38] sm:$0xff] %v638_v57  ;;  %v781_v60 = vpop.f32.mrb[21].mxu0 }
 0x120   :  { %v600_v59 = vpop.f32.mrb[16].mxu1  ;;  %v782_v63 = vadd.f32 %v781_v60, %v780_v58  ;;  %v783_v0 = vpop.f32.mrb[22].mxu0 }
 0x121   :  { %v601_v61 = vadd.f32 %v776_v49, %v600_v59  ;;  %v602_v62 = vpop.f32.mrb[17].mxu1  ;;  %v784_v2 = vpop.f32.mrb[23].mxu0 }
 0x122   :  { %v603_v1 = vpop.f32.mrb[18].mxu1  ;;  %v785_v6 = vadd.f32 %v784_v2, %v783_v0 }
 0x123   :  { %v639_v3 = vmax.f32 %v601_v61, 0.0  ;;  %v604_v4 = vadd.f32 %v779_v56, %v603_v1  ;;  %v605_v5 = vpop.f32.mrb[19].mxu1 }
 0x125   :  { %655 = vst [vmem:[%s1136_s2 + $0x40] sm:$0xff] %v639_v3  ;;  %v640_v7 = vmax.f32 %v604_v4, 0.0 }
 0x126   :  { %v786_v8 = vpop.f32.mrb[24].mxu0 }
 0x127   :  { %656 = vst [vmem:[%s1136_s2 + $0x48] sm:$0xff] %v640_v7  ;;  %v787_v10 = vpop.f32.mrb[25].mxu0 }
 0x128   :  { %v608_v9 = vpop.f32.mrb[20].mxu1  ;;  %v788_v13 = vadd.f32 %v787_v10, %v786_v8  ;;  %v789_v14 = vpop.f32.mrb[26].mxu0 }
 0x129   :  { %v609_v11 = vadd.f32 %v782_v63, %v608_v9  ;;  %v610_v12 = vpop.f32.mrb[21].mxu1  ;;  %v790_v16 = vpop.f32.mrb[27].mxu0 }
 0x12a   :  { %v611_v15 = vpop.f32.mrb[22].mxu1  ;;  %v791_v20 = vadd.f32 %v790_v16, %v789_v14 }
 0x12b   :  { %v641_v17 = vmax.f32 %v609_v11, 0.0  ;;  %v612_v18 = vadd.f32 %v785_v6, %v611_v15  ;;  %v613_v19 = vpop.f32.mrb[23].mxu1 }
 0x12d   :  { %657 = vst [vmem:[%s1136_s2 + $0x50] sm:$0xff] %v641_v17  ;;  %v642_v21 = vmax.f32 %v612_v18, 0.0 }
 0x12e   :  { %v792_v22 = vpop.f32.mrb[28].mxu0 }
 0x12f   :  { %658 = vst [vmem:[%s1136_s2 + $0x58] sm:$0xff] %v642_v21  ;;  %v793_v24 = vpop.f32.mrb[29].mxu0 }
 0x130   :  { %v616_v23 = vpop.f32.mrb[24].mxu1  ;;  %v794_v27 = vadd.f32 %v793_v24, %v792_v22  ;;  %v795_v28 = vpop.f32.mrb[30].mxu0 }
 0x131   :  { %v617_v25 = vadd.f32 %v788_v13, %v616_v23  ;;  %v618_v26 = vpop.f32.mrb[25].mxu1  ;;  %v796_v30 = vpop.f32.mrb[31].mxu0 }
 0x132   :  { %v619_v29 = vpop.f32.mrb[26].mxu1  ;;  %v797_v34 = vadd.f32 %v796_v30, %v795_v28 }
 0x133   :  { %v643_v31 = vmax.f32 %v617_v25, 0.0  ;;  %v620_v32 = vadd.f32 %v791_v20, %v619_v29  ;;  %v621_v33 = vpop.f32.mrb[27].mxu1 }
 0x135   :  { %659 = vst [vmem:[%s1136_s2 + $0x60] sm:$0xff] %v643_v31  ;;  %v644_v35 = vmax.f32 %v620_v32, 0.0 }
 0x137   :  { %660 = vst [vmem:[%s1136_s2 + $0x68] sm:$0xff] %v644_v35 }
 0x138   :  { %v624_v36 = vpop.f32.mrb[28].mxu1 }
 0x139   :  { %v625_v37 = vadd.f32 %v794_v27, %v624_v36  ;;  %v626_v38 = vpop.f32.mrb[29].mxu1 }
 0x13a   :  { %v627_v39 = vpop.f32.mrb[30].mxu1 }
 0x13b   :  { %v645_v40 = vmax.f32 %v625_v37, 0.0  ;;  %v628_v41 = vadd.f32 %v797_v34, %v627_v39  ;;  %v629_v42 = vpop.f32.mrb[31].mxu1 }
 0x13d   :  { %661 = vst [vmem:[%s1136_s2 + $0x70] sm:$0xff] %v645_v40  ;;  %v646_v43 = vmax.f32 %v628_v41, 0.0 }
 0x13f   :  { %662 = vst [vmem:[%s1136_s2 + $0x78] sm:$0xff] %v646_v43 }

// kernel: uresnet_forward.17
= control target key start
LH: loop header
LB: loop body
LE: loop exit
PB: predicated region body
PF: predicated region fallthrough
CT: control target
= control target key end

     0   :  { %v893_v0 = vmov 0   ;;  %vm431_vm0 = vcmask 392192   ;;  %s1206_s1 = inlined_call_operand.vmem [shape: bf16[432,128], index: 1, kind: input, shape index: {}]   ;;  %s1207_s0 = inlined_call_operand.vmem [shape: bf16[128,432], index: 0, kind: input, shape index: {}]   ;;  %s1208_s2 = inlined_call_operand.vmem [shape: f32[128,128], index: 2, kind: input, shape index: {}]   ;;  %s1209_s3 = inlined_call_operand.vmem [shape: f32[128,128], index: 3, kind: output, shape index: {}]  }
   0x1   :  { %553 = vmatprep.subr.bf16.mxu1 %v893_v0  ;;  %v818_v1 = vld [vmem:[%s1206_s1 + $0x80] sm:$0xff]   ;;  %v821_v4 = vld [vmem:[%s1206_s1 + $0x88] sm:$0xff]   ;;  %v824_v7 = vld [vmem:[%s1206_s1 + $0x90] sm:$0xff]  }
   0x2   :  { %v819_v2 = vld [vmem:[%s1206_s1 + $0x40] sm:$0xff]   ;;  %554 = vmatpush1.bf16.msra.mxu1 %v818_v1  ;;  %v822_v5 = vld [vmem:[%s1206_s1 + $0x48] sm:$0xff]   ;;  %v825_v8 = vld [vmem:[%s1206_s1 + $0x50] sm:$0xff]  }
   0x3   :  { %v820_v3 = vld [vmem:[%s1206_s1] sm:$0xff]   ;;  %753 = vmatprep.subr.bf16.mxu0 %v819_v2  ;;  %555 = vmatprep.subr.bf16.mxu1 %v893_v0  ;;  %v823_v6 = vld [vmem:[%s1206_s1 + $0x8] sm:$0xff]   ;;  %v826_v9 = vld [vmem:[%s1206_s1 + $0x10] sm:$0xff]  }
   0x4   :  { %754 = vmatpush3.bf16.msra.mxu0 %v820_v3  ;;  %v827_v10 = vld [vmem:[%s1206_s1 + $0x98] sm:$0xff]   ;;  %v831_v13 = vld [vmem:[%s1206_s1 + $0x60] sm:$0xff]   ;;  %v834_v16 = vld [vmem:[%s1206_s1 + $0x68] sm:$0xff]  }
   0x5   :  { %755 = vmatprep.subr.bf16.mxu0 %v822_v5  ;;  %v828_v11 = vld [vmem:[%s1206_s1 + $0x58] sm:$0xff]   ;;  %v830_v14 = vld [vmem:[%s1206_s1 + $0xa0] sm:$0xff]   ;;  %v833_v17 = vld [vmem:[%s1206_s1 + $0xa8] sm:$0xff]  }
   0x6   :  { %556 = vmatpush1.bf16.msra.mxu1 %v821_v4  ;;  %v829_v12 = vld [vmem:[%s1206_s1 + $0x18] sm:$0xff]   ;;  %v832_v15 = vld [vmem:[%s1206_s1 + $0x20] sm:$0xff]   ;;  %v835_v18 = vld [vmem:[%s1206_s1 + $0x28] sm:$0xff]  }
   0x7   :  { %557 = vmatprep.subr.bf16.mxu1 %v893_v0  ;;  %v837_v19 = vld [vmem:[%s1206_s1 + $0x70] sm:$0xff]   ;;  %v839_v22 = vld [vmem:[%s1206_s1 + $0xb8] sm:$0xff]   ;;  %v842_v26 = vld [vmem:[%s1206_s1 + $0xc0] sm:$0xff]  }
   0x8   :  { %756 = vmatpush3.bf16.msra.mxu0 %v823_v6  ;;  %v836_v20 = vld [vmem:[%s1206_s1 + $0xb0] sm:$0xff]   ;;  %v840_v23 = vld [vmem:[%s1206_s1 + $0x78] sm:$0xff]   ;;  %v846_v30 = vld [vmem:[%s1206_s1 + $0xc8] sm:$0xff]  }
   0x9   :  { %757 = vmatprep.subr.bf16.mxu0 %v825_v8  ;;  %v838_v21 = vld [vmem:[%s1206_s1 + $0x30] sm:$0xff]   ;;  %v841_v25 = vld [vmem:[%s1206_s1 + $0x38] sm:$0xff]   ;;  %v101_v2 = vld [vmem:[%s1208_s2] sm:$0xff] }
   0xa   :  { %558 = vmatpush1.bf16.msra.mxu1 %v824_v7  ;;  %v845_v24 = vld [vmem:[%s1207_s0 + $0x4] ss:$16 sps:$4 sm:$0xff]   ;;  %v852_v27 = vld [vmem:[%s1207_s0 + $0xc] ss:$16 sps:$4 sm:$0xff]   ;;  %v843_v28 = vld [vmem:[%s1207_s0] ss:$16 sps:$4 sm:$0xff]  }
   0xb   :  { %559 = vmatprep.subr.bf16.mxu1 %v893_v0  ;;  %488 = vmatprep.mubr.bf16.mxu0 %v845_v24  ;;  %v848_v29 = vld [vmem:[%s1207_s0 + $0x24] ss:$16 sps:$4 sm:$0xff]   ;;  %v853_v32 = vld [vmem:[%s1207_s0 + $0x20] ss:$16 sps:$4 sm:$0xff]   ;;  %v850_v34 = vld [vmem:[%s1207_s0 + $0x8] ss:$16 sps:$4 sm:$0xff]  }
   0xc   :  { %758 = vmatpush3.bf16.msra.mxu0 %v826_v9  ;;  %745 = vmatprep.mubr.msk.bf16.mxu1 %vm431_vm0, %v852_v27  ;;  %v847_v31 = vld [vmem:[%s1206_s1 + $0xd0] sm:$0xff]   ;;  %v856_v35 = vld [vmem:[%s1207_s0 + $0x2c] ss:$16 sps:$4 sm:$0xff]   ;;  %v859_v38 = vld [vmem:[%s1207_s0 + $0x28] ss:$16 sps:$4 sm:$0xff]  }
   0xd   :  { %759 = vmatprep.subr.bf16.mxu0 %v828_v11  ;;  %v854_v33 = vld [vmem:[%s1207_s0 + $0x44] ss:$16 sps:$4 sm:$0xff]   ;;  %v858_v36 = vld [vmem:[%s1207_s0 + $0x40] ss:$16 sps:$4 sm:$0xff]   ;;  %v862_v39 = vld [vmem:[%s1207_s0 + $0x4c] ss:$16 sps:$4 sm:$0xff]  }
   0xe   :  { %560 = vmatpush1.bf16.msra.mxu1 %v827_v10  ;;  %v860_v37 = vld [vmem:[%s1207_s0 + $0x64] ss:$16 sps:$4 sm:$0xff]   ;;  %v864_v40 = vld [vmem:[%s1207_s0 + $0x60] ss:$16 sps:$4 sm:$0xff]   ;;  %v865_v42 = vld [vmem:[%s1207_s0 + $0x48] ss:$16 sps:$4 sm:$0xff]  }
   0xf   :  { %561 = vmatprep.subr.bf16.mxu1 %v893_v0  ;;  %v866_v41 = vld [vmem:[%s1207_s0 + $0x84] ss:$16 sps:$4 sm:$0xff]   ;;  %v868_v43 = vld [vmem:[%s1207_s0 + $0x6c] ss:$16 sps:$4 sm:$0xff]   ;;  %v870_v44 = vld [vmem:[%s1207_s0 + $0x80] ss:$16 sps:$4 sm:$0xff]  }
  0x10   :  { %760 = vmatpush3.bf16.msra.mxu0 %v829_v12  ;;  %v872_v45 = vld [vmem:[%s1207_s0 + $0xa4] ss:$16 sps:$4 sm:$0xff]   ;;  %v871_v46 = vld [vmem:[%s1207_s0 + $0x68] ss:$16 sps:$4 sm:$0xff]   ;;  %v874_v47 = vld [vmem:[%s1207_s0 + $0x8c] ss:$16 sps:$4 sm:$0xff]  }
  0x11   :  { %761 = vmatprep.subr.bf16.mxu0 %v831_v13  ;;  %v876_v48 = vld [vmem:[%s1207_s0 + $0xa0] ss:$16 sps:$4 sm:$0xff]   ;;  %v878_v49 = vld [vmem:[%s1207_s0 + $0xc4] ss:$16 sps:$4 sm:$0xff]   ;;  %v877_v50 = vld [vmem:[%s1207_s0 + $0x88] ss:$16 sps:$4 sm:$0xff]  }
  0x12   :  { %562 = vmatpush1.bf16.msra.mxu1 %v830_v14  ;;  %v880_v51 = vld [vmem:[%s1207_s0 + $0xac] ss:$16 sps:$4 sm:$0xff]   ;;  %v882_v52 = vld [vmem:[%s1207_s0 + $0xc0] ss:$16 sps:$4 sm:$0xff]   ;;  %v884_v53 = vld [vmem:[%s1207_s0 + $0xe4] ss:$16 sps:$4 sm:$0xff]  }
  0x13   :  { %563 = vmatprep.subr.bf16.mxu1 %v893_v0  ;;  %v883_v54 = vld [vmem:[%s1207_s0 + $0xa8] ss:$16 sps:$4 sm:$0xff]   ;;  %v886_v55 = vld [vmem:[%s1207_s0 + $0xcc] ss:$16 sps:$4 sm:$0xff]   ;;  %v888_v56 = vld [vmem:[%s1207_s0 + $0xe0] ss:$16 sps:$4 sm:$0xff]  }
  0x14   :  { %762 = vmatpush3.bf16.msra.mxu0 %v832_v15  ;;  %v889_v57 = vld [vmem:[%s1207_s0 + $0xc8] ss:$16 sps:$4 sm:$0xff]   ;;  %v890_v58 = vld [vmem:[%s1207_s0 + $0xec] ss:$16 sps:$4 sm:$0xff]  }
  0x15   :  { %763 = vmatprep.subr.bf16.mxu0 %v834_v16  ;;  %v892_v59 = vld [vmem:[%s1207_s0 + $0xe8] ss:$16 sps:$4 sm:$0xff]   ;;  %v103_v16 = vld [vmem:[%s1208_s2 + $0x10] sm:$0xff] }
  0x16   :  { %564 = vmatpush1.bf16.msra.mxu1 %v833_v17  ;;  %v102_v5 = vld [vmem:[%s1208_s2 + $0x8] sm:$0xff] }
  0x17   :  { %565 = vmatprep.subr.bf16.mxu1 %v893_v0 }
  0x18   :  { %764 = vmatpush3.bf16.msra.mxu0 %v835_v18 }
  0x19   :  { %765 = vmatprep.subr.bf16.mxu0 %v837_v19 }
  0x1a   :  { %566 = vmatpush1.bf16.msra.mxu1 %v836_v20 }
  0x1b   :  { %567 = vmatprep.subr.bf16.mxu1 %v893_v0 }
  0x1c   :  { %766 = vmatpush3.bf16.msra.mxu0 %v838_v21 }
  0x1d   :  { %767 = vmatprep.subr.bf16.mxu0 %v840_v23  ;;  %v104_v23 = vld [vmem:[%s1208_s2 + $0x18] sm:$0xff] }
  0x1e   :  { %568 = vmatpush1.bf16.msra.mxu1 %v839_v22 }
  0x1f   :  { %569 = vmatprep.subr.bf16.mxu1 %v893_v0 }
  0x20   :  { %768 = vmatpush3.bf16.msra.mxu0 %v841_v25 }
  0x22   :  { %570 = vmatpush1.bf16.msra.mxu1 %v842_v26 }
  0x23   :  { %489 = vmatmul.mubr.bf16.vlgmr.msra.gmra.mrb[0].mxu0 %v843_v28  ;;  %571 = vmatprep.subr.bf16.mxu1 %v893_v0 }
  0x24   :  { %496 = vmatprep.mubr.bf16.mxu0 %v848_v29 }
  0x26   :  { %572 = vmatpush1.bf16.msra.mxu1 %v846_v30 }
  0x27   :  { %573 = vmatprep.subr.bf16.mxu1 %v893_v0 }
  0x2a   :  { %574 = vmatpush1.bf16.msra.mxu1 %v847_v31 }
  0x2b   :  { %497 = vmatmul.mubr.bf16.gmra.mrb[4].mxu0 %v853_v32 }
  0x2c   :  { %504 = vmatprep.mubr.bf16.mxu0 %v854_v33 }
  0x2d   :  { %586 = vmatmul.mubr.bf16.vlgmr.msra.gmra.mrb[0].mxu1 %v850_v34  ;;  %v105_v34 = vld [vmem:[%s1208_s2 + $0x20] sm:$0xff] }
  0x2e   :  { %746 = vmatprep.mubr.msk.bf16.mxu1 %vm431_vm0, %v856_v35 }
  0x33   :  { %505 = vmatmul.mubr.bf16.gmra.mrb[8].mxu0 %v858_v36 }
  0x34   :  { %512 = vmatprep.mubr.bf16.mxu0 %v860_v37 }
  0x35   :  { %594 = vmatmul.mubr.bf16.gmra.mrb[4].mxu1 %v859_v38 }
  0x36   :  { %747 = vmatprep.mubr.msk.bf16.mxu1 %vm431_vm0, %v862_v39 }
  0x3b   :  { %513 = vmatmul.mubr.bf16.gmra.mrb[12].mxu0 %v864_v40 }
  0x3c   :  { %520 = vmatprep.mubr.bf16.mxu0 %v866_v41  ;;  %v106_v41 = vld [vmem:[%s1208_s2 + $0x28] sm:$0xff] }
  0x3d   :  { %602 = vmatmul.mubr.bf16.gmra.mrb[8].mxu1 %v865_v42 }
  0x3e   :  { %748 = vmatprep.mubr.msk.bf16.mxu1 %vm431_vm0, %v868_v43 }
  0x43   :  { %521 = vmatmul.mubr.bf16.gmra.mrb[16].mxu0 %v870_v44 }
  0x44   :  { %528 = vmatprep.mubr.bf16.mxu0 %v872_v45 }
  0x45   :  { %610 = vmatmul.mubr.bf16.gmra.mrb[12].mxu1 %v871_v46 }
  0x46   :  { %749 = vmatprep.mubr.msk.bf16.mxu1 %vm431_vm0, %v874_v47 }
  0x4b   :  { %529 = vmatmul.mubr.bf16.gmra.mrb[20].mxu0 %v876_v48 }
  0x4c   :  { %536 = vmatprep.mubr.bf16.mxu0 %v878_v49 }
  0x4d   :  { %618 = vmatmul.mubr.bf16.gmra.mrb[16].mxu1 %v877_v50 }
  0x4e   :  { %750 = vmatprep.mubr.msk.bf16.mxu1 %vm431_vm0, %v880_v51 }
  0x53   :  { %537 = vmatmul.mubr.bf16.gmra.mrb[24].mxu0 %v882_v52  ;;  %v107_v52 = vld [vmem:[%s1208_s2 + $0x30] sm:$0xff] }
  0x54   :  { %544 = vmatprep.mubr.bf16.mxu0 %v884_v53 }
  0x55   :  { %626 = vmatmul.mubr.bf16.gmra.mrb[20].mxu1 %v883_v54 }
  0x56   :  { %751 = vmatprep.mubr.msk.bf16.mxu1 %vm431_vm0, %v886_v55 }
  0x5b   :  { %545 = vmatmul.mubr.bf16.gmra.mrb[28].mxu0 %v888_v56 }
  0x5d   :  { %634 = vmatmul.mubr.bf16.gmra.mrb[24].mxu1 %v889_v57 }
  0x5e   :  { %752 = vmatprep.mubr.msk.bf16.mxu1 %vm431_vm0, %v890_v58 }
  0x65   :  { %642 = vmatmul.mubr.bf16.gmra.mrb[28].mxu1 %v892_v59  ;;  %v108_v59 = vld [vmem:[%s1208_s2 + $0x38] sm:$0xff] }
  0xf6   :  { %v769_v60 = vpop.f32.mrb[0].mxu0 }
  0xf7   :  { %v770_v61 = vpop.f32.mrb[1].mxu0 }
  0xf8   :  { %v771_v62 = vadd.f32 %v770_v61, %v769_v60  ;;  %v772_v63 = vpop.f32.mrb[2].mxu0 }
  0xf9   :  { %v773_v0 = vpop.f32.mrb[3].mxu0 }
  0xfa   :  { %v774_v1 = vadd.f32 %v773_v0, %v772_v63  ;;  %v491_v3 = vadd.f32 %v771_v62, %v101_v2 }
  0xfc   :  { %v494_v12 = vadd.f32 %v774_v1, %v102_v5 }
  0xfe   :  { %v775_v4 = vpop.f32.mrb[4].mxu0 }
  0xff   :  { %v776_v6 = vpop.f32.mrb[5].mxu0 }
 0x100   :  { %v587_v7 = vpop.f32.mrb[0].mxu1  ;;  %v777_v8 = vadd.f32 %v776_v6, %v775_v4  ;;  %v778_v9 = vpop.f32.mrb[6].mxu0  ;;  %v109_v6 = vld [vmem:[%s1208_s2 + $0x40] sm:$0xff] }
 0x101   :  { %v588_v10 = vadd.f32 %v587_v7, %v491_v3  ;;  %v589_v11 = vpop.f32.mrb[1].mxu1  ;;  %v779_v13 = vpop.f32.mrb[7].mxu0 }
 0x102   :  { %v590_v14 = vpop.f32.mrb[2].mxu1  ;;  %v780_v15 = vadd.f32 %v779_v13, %v778_v9  ;;  %v499_v21 = vadd.f32 %v777_v8, %v103_v16  ;;  %v110_v13 = vld [vmem:[%s1208_s2 + $0x48] sm:$0xff] }
 0x103   :  { %v650_v17 = vmax.f32 %v588_v10, 0.0  ;;  %v591_v18 = vadd.f32 %v590_v14, %v494_v12  ;;  %v592_v19 = vpop.f32.mrb[3].mxu1 }
 0x104   :  { %v502_v30 = vadd.f32 %v780_v15, %v104_v23 }
 0x105   :  { %666 = vst [vmem:[%s1209_s3] sm:$0xff] %v650_v17  ;;  %v651_v20 = vmax.f32 %v591_v18, 0.0 }
 0x106   :  { %v781_v22 = vpop.f32.mrb[8].mxu0 }
 0x107   :  { %667 = vst [vmem:[%s1209_s3 + $0x8] sm:$0xff] %v651_v20  ;;  %v782_v24 = vpop.f32.mrb[9].mxu0 }
 0x108   :  { %v595_v25 = vpop.f32.mrb[4].mxu1  ;;  %v783_v26 = vadd.f32 %v782_v24, %v781_v22  ;;  %v784_v27 = vpop.f32.mrb[10].mxu0  ;;  %v111_v24 = vld [vmem:[%s1208_s2 + $0x50] sm:$0xff] }
 0x109   :  { %v596_v28 = vadd.f32 %v595_v25, %v499_v21  ;;  %v597_v29 = vpop.f32.mrb[5].mxu1  ;;  %v785_v31 = vpop.f32.mrb[11].mxu0 }
 0x10a   :  { %v598_v32 = vpop.f32.mrb[6].mxu1  ;;  %v786_v33 = vadd.f32 %v785_v31, %v784_v27  ;;  %v507_v39 = vadd.f32 %v783_v26, %v105_v34  ;;  %v112_v31 = vld [vmem:[%s1208_s2 + $0x58] sm:$0xff] }
 0x10b   :  { %v652_v35 = vmax.f32 %v596_v28, 0.0  ;;  %v599_v36 = vadd.f32 %v598_v32, %v502_v30  ;;  %v600_v37 = vpop.f32.mrb[7].mxu1 }
 0x10c   :  { %v510_v48 = vadd.f32 %v786_v33, %v106_v41 }
 0x10d   :  { %668 = vst [vmem:[%s1209_s3 + $0x10] sm:$0xff] %v652_v35  ;;  %v653_v38 = vmax.f32 %v599_v36, 0.0 }
 0x10e   :  { %v787_v40 = vpop.f32.mrb[12].mxu0 }
 0x10f   :  { %669 = vst [vmem:[%s1209_s3 + $0x18] sm:$0xff] %v653_v38  ;;  %v788_v42 = vpop.f32.mrb[13].mxu0 }
 0x110   :  { %v603_v43 = vpop.f32.mrb[8].mxu1  ;;  %v789_v44 = vadd.f32 %v788_v42, %v787_v40  ;;  %v790_v45 = vpop.f32.mrb[14].mxu0  ;;  %v113_v42 = vld [vmem:[%s1208_s2 + $0x60] sm:$0xff] }
 0x111   :  { %v604_v46 = vadd.f32 %v603_v43, %v507_v39  ;;  %v605_v47 = vpop.f32.mrb[9].mxu1  ;;  %v791_v49 = vpop.f32.mrb[15].mxu0 }
 0x112   :  { %v606_v50 = vpop.f32.mrb[10].mxu1  ;;  %v792_v51 = vadd.f32 %v791_v49, %v790_v45  ;;  %v515_v57 = vadd.f32 %v789_v44, %v107_v52  ;;  %v114_v49 = vld [vmem:[%s1208_s2 + $0x68] sm:$0xff] }
 0x113   :  { %v654_v53 = vmax.f32 %v604_v46, 0.0  ;;  %v607_v54 = vadd.f32 %v606_v50, %v510_v48  ;;  %v608_v55 = vpop.f32.mrb[11].mxu1 }
 0x114   :  { %v518_v2 = vadd.f32 %v792_v51, %v108_v59 }
 0x115   :  { %670 = vst [vmem:[%s1209_s3 + $0x20] sm:$0xff] %v654_v53  ;;  %v655_v56 = vmax.f32 %v607_v54, 0.0 }
 0x116   :  { %v793_v58 = vpop.f32.mrb[16].mxu0 }
 0x117   :  { %671 = vst [vmem:[%s1209_s3 + $0x28] sm:$0xff] %v655_v56  ;;  %v794_v60 = vpop.f32.mrb[17].mxu0 }
 0x118   :  { %v611_v61 = vpop.f32.mrb[12].mxu1  ;;  %v795_v62 = vadd.f32 %v794_v60, %v793_v58  ;;  %v796_v63 = vpop.f32.mrb[18].mxu0  ;;  %v115_v60 = vld [vmem:[%s1208_s2 + $0x70] sm:$0xff] }
 0x119   :  { %v612_v0 = vadd.f32 %v611_v61, %v515_v57  ;;  %v613_v1 = vpop.f32.mrb[13].mxu1  ;;  %v797_v3 = vpop.f32.mrb[19].mxu0 }
 0x11a   :  { %v614_v4 = vpop.f32.mrb[14].mxu1  ;;  %v798_v5 = vadd.f32 %v797_v3, %v796_v63  ;;  %v523_v11 = vadd.f32 %v795_v62, %v109_v6 }
 0x11b   :  { %v656_v7 = vmax.f32 %v612_v0, 0.0  ;;  %v615_v8 = vadd.f32 %v614_v4, %v518_v2  ;;  %v616_v9 = vpop.f32.mrb[15].mxu1  ;;  %v116_v2 = vld [vmem:[%s1208_s2 + $0x78] sm:$0xff] }
 0x11c   :  { %v526_v20 = vadd.f32 %v798_v5, %v110_v13 }
 0x11d   :  { %672 = vst [vmem:[%s1209_s3 + $0x30] sm:$0xff] %v656_v7  ;;  %v657_v10 = vmax.f32 %v615_v8, 0.0 }
 0x11e   :  { %v799_v12 = vpop.f32.mrb[20].mxu0 }
 0x11f   :  { %673 = vst [vmem:[%s1209_s3 + $0x38] sm:$0xff] %v657_v10  ;;  %v800_v14 = vpop.f32.mrb[21].mxu0 }
 0x120   :  { %v619_v15 = vpop.f32.mrb[16].mxu1  ;;  %v801_v16 = vadd.f32 %v800_v14, %v799_v12  ;;  %v802_v17 = vpop.f32.mrb[22].mxu0 }
 0x121   :  { %v620_v18 = vadd.f32 %v619_v15, %v523_v11  ;;  %v621_v19 = vpop.f32.mrb[17].mxu1  ;;  %v803_v21 = vpop.f32.mrb[23].mxu0 }
 0x122   :  { %v622_v22 = vpop.f32.mrb[18].mxu1  ;;  %v804_v23 = vadd.f32 %v803_v21, %v802_v17  ;;  %v531_v29 = vadd.f32 %v801_v16, %v111_v24 }
 0x123   :  { %v658_v25 = vmax.f32 %v620_v18, 0.0  ;;  %v623_v26 = vadd.f32 %v622_v22, %v526_v20  ;;  %v624_v27 = vpop.f32.mrb[19].mxu1 }
 0x124   :  { %v534_v38 = vadd.f32 %v804_v23, %v112_v31 }
 0x125   :  { %674 = vst [vmem:[%s1209_s3 + $0x40] sm:$0xff] %v658_v25  ;;  %v659_v28 = vmax.f32 %v623_v26, 0.0 }
 0x126   :  { %v805_v30 = vpop.f32.mrb[24].mxu0 }
 0x127   :  { %675 = vst [vmem:[%s1209_s3 + $0x48] sm:$0xff] %v659_v28  ;;  %v806_v32 = vpop.f32.mrb[25].mxu0 }
 0x128   :  { %v627_v33 = vpop.f32.mrb[20].mxu1  ;;  %v807_v34 = vadd.f32 %v806_v32, %v805_v30  ;;  %v808_v35 = vpop.f32.mrb[26].mxu0 }
 0x129   :  { %v628_v36 = vadd.f32 %v627_v33, %v531_v29  ;;  %v629_v37 = vpop.f32.mrb[21].mxu1  ;;  %v809_v39 = vpop.f32.mrb[27].mxu0 }
 0x12a   :  { %v630_v40 = vpop.f32.mrb[22].mxu1  ;;  %v810_v41 = vadd.f32 %v809_v39, %v808_v35  ;;  %v539_v47 = vadd.f32 %v807_v34, %v113_v42 }
 0x12b   :  { %v660_v43 = vmax.f32 %v628_v36, 0.0  ;;  %v631_v44 = vadd.f32 %v630_v40, %v534_v38  ;;  %v632_v45 = vpop.f32.mrb[23].mxu1 }
 0x12c   :  { %v542_v56 = vadd.f32 %v810_v41, %v114_v49 }
 0x12d   :  { %676 = vst [vmem:[%s1209_s3 + $0x50] sm:$0xff] %v660_v43  ;;  %v661_v46 = vmax.f32 %v631_v44, 0.0 }
 0x12e   :  { %v811_v48 = vpop.f32.mrb[28].mxu0 }
 0x12f   :  { %677 = vst [vmem:[%s1209_s3 + $0x58] sm:$0xff] %v661_v46  ;;  %v812_v50 = vpop.f32.mrb[29].mxu0 }
 0x130   :  { %v635_v51 = vpop.f32.mrb[24].mxu1  ;;  %v813_v52 = vadd.f32 %v812_v50, %v811_v48  ;;  %v814_v53 = vpop.f32.mrb[30].mxu0 }
 0x131   :  { %v636_v54 = vadd.f32 %v635_v51, %v539_v47  ;;  %v637_v55 = vpop.f32.mrb[25].mxu1  ;;  %v815_v57 = vpop.f32.mrb[31].mxu0 }
 0x132   :  { %v638_v58 = vpop.f32.mrb[26].mxu1  ;;  %v816_v59 = vadd.f32 %v815_v57, %v814_v53  ;;  %v547_v1 = vadd.f32 %v813_v52, %v115_v60 }
 0x133   :  { %v662_v61 = vmax.f32 %v636_v54, 0.0  ;;  %v639_v62 = vadd.f32 %v638_v58, %v542_v56  ;;  %v640_v63 = vpop.f32.mrb[27].mxu1 }
 0x134   :  { %v550_v6 = vadd.f32 %v816_v59, %v116_v2 }
 0x135   :  { %678 = vst [vmem:[%s1209_s3 + $0x60] sm:$0xff] %v662_v61  ;;  %v663_v0 = vmax.f32 %v639_v62, 0.0 }
 0x137   :  { %679 = vst [vmem:[%s1209_s3 + $0x68] sm:$0xff] %v663_v0 }
 0x138   :  { %v643_v3 = vpop.f32.mrb[28].mxu1 }
 0x139   :  { %v644_v4 = vadd.f32 %v643_v3, %v547_v1  ;;  %v645_v5 = vpop.f32.mrb[29].mxu1 }
 0x13a   :  { %v646_v7 = vpop.f32.mrb[30].mxu1 }
 0x13b   :  { %v664_v8 = vmax.f32 %v644_v4, 0.0  ;;  %v647_v9 = vadd.f32 %v646_v7, %v550_v6  ;;  %v648_v10 = vpop.f32.mrb[31].mxu1 }
 0x13d   :  { %680 = vst [vmem:[%s1209_s3 + $0x70] sm:$0xff] %v664_v8  ;;  %v665_v11 = vmax.f32 %v647_v9, 0.0 }
 0x13f   :  { %681 = vst [vmem:[%s1209_s3 + $0x78] sm:$0xff] %v665_v11 }

// kernel: uresnet_forward.18
= control target key start
LH: loop header
LB: loop body
LE: loop exit
PB: predicated region body
PF: predicated region fallthrough
CT: control target
= control target key end

     0   :  { %vm191_vm0 = vcmask 130048   ;;  %s1243_s1 = inlined_call_operand.vmem [shape: bf16[16,128], index: 1, kind: input, shape index: {}]   ;;  %s1244_s0 = inlined_call_operand.vmem [shape: bf16[384,16], index: 0, kind: input, shape index: {}]   ;;  %s1245_s2 = inlined_call_operand.vmem [shape: f32[384,128], index: 2, kind: input, shape index: {}]   ;;  %s1246_s3 = inlined_call_operand.vmem [shape: f32[384,128], index: 3, kind: output, shape index: {}]  }
   0x1   :  { %v811_v0 = vld [vmem:[%s1243_s1] sm:$0xff]   ;;  %v814_v3 = vld [vmem:[%s1244_s0 + $0x8] sm:$0xff]   ;;  %v816_v5 = vld [vmem:[%s1244_s0 + $0x10] sm:$0xff]  }
   0x2   :  { %v812_v1 = vld [vmem:[%s1244_s0] sm:$0xff]   ;;  %759 = vmatprep.subr.bf16.mxu0 %v811_v0  ;;  %809 = vmatprep.subr.bf16.mxu1 %v811_v0  ;;  %v815_v4 = vld [vmem:[%s1244_s0 + $0x68] sm:$0xff]   ;;  %v817_v6 = vld [vmem:[%s1244_s0 + $0x70] sm:$0xff]  }
   0x3   :  { %v813_v2 = vld [vmem:[%s1244_s0 + $0x60] sm:$0xff]   ;;  %760 = vmatpush3.bf16.msra.mxu0 %v811_v0  ;;  %810 = vmatpush3.bf16.msra.mxu1 %v811_v0  ;;  %v818_v7 = vld [vmem:[%s1244_s0 + $0x18] sm:$0xff]   ;;  %v822_v11 = vld [vmem:[%s1244_s0 + $0x28] sm:$0xff]  }
   0x4   :  { %761 = vmatprep.mubr.msk.bf16.mxu0 %vm191_vm0, %v812_v1  ;;  %785 = vmatprep.mubr.msk.bf16.mxu1 %vm191_vm0, %v813_v2  ;;  %v819_v8 = vld [vmem:[%s1244_s0 + $0x78] sm:$0xff]   ;;  %v820_v9 = vld [vmem:[%s1244_s0 + $0x20] sm:$0xff]   ;;  %v823_v12 = vld [vmem:[%s1244_s0 + $0x88] sm:$0xff]  }
   0x5   :  { %v821_v10 = vld [vmem:[%s1244_s0 + $0x80] sm:$0xff]   ;;  %v824_v13 = vld [vmem:[%s1244_s0 + $0x30] sm:$0xff]   ;;  %v826_v15 = vld [vmem:[%s1244_s0 + $0x38] sm:$0xff]  }
   0x6   :  { %762 = vmatmul.mubr.msk.bf16.vlgmr.msra.gmra.mrb[0].mxu0 %vm191_vm0, %v814_v3  ;;  %786 = vmatmul.mubr.msk.bf16.vlgmr.msra.gmra.mrb[0].mxu1 %vm191_vm0, %v815_v4  ;;  %v825_v14 = vld [vmem:[%s1244_s0 + $0x90] sm:$0xff]   ;;  %v827_v16 = vld [vmem:[%s1244_s0 + $0x98] sm:$0xff]   ;;  %v828_v17 = vld [vmem:[%s1244_s0 + $0x40] sm:$0xff]  }
   0x7   :  { %765 = vmatprep.mubr.msk.bf16.mxu0 %vm191_vm0, %v816_v5  ;;  %789 = vmatprep.mubr.msk.bf16.mxu1 %vm191_vm0, %v817_v6  ;;  %v829_v18 = vld [vmem:[%s1244_s0 + $0xa0] sm:$0xff]   ;;  %v830_v19 = vld [vmem:[%s1244_s0 + $0x48] sm:$0xff]   ;;  %v832_v21 = vld [vmem:[%s1244_s0 + $0x50] sm:$0xff]  }
   0x8   :  { %v831_v20 = vld [vmem:[%s1244_s0 + $0xa8] sm:$0xff]   ;;  %v833_v22 = vld [vmem:[%s1244_s0 + $0xb0] sm:$0xff]   ;;  %v834_v23 = vld [vmem:[%s1244_s0 + $0x58] sm:$0xff]  }
   0x9   :  { %v835_v24 = vld [vmem:[%s1244_s0 + $0xb8] sm:$0xff]   ;;  %v539_v26 = vld [vmem:[%s1245_s2 + $0x10] sm:$0xff]  ;;  %v537_v32 = vld [vmem:[%s1245_s2] sm:$0xff] }
   0xa   :  { %v563_v28 = vld [vmem:[%s1245_s2 + $0xd0] sm:$0xff]  ;;  %v561_v34 = vld [vmem:[%s1245_s2 + $0xc0] sm:$0xff]  ;;  %v540_v38 = vld [vmem:[%s1245_s2 + $0x18] sm:$0xff] }
   0xb   :  { %v564_v40 = vld [vmem:[%s1245_s2 + $0xd8] sm:$0xff]  ;;  %v538_v46 = vld [vmem:[%s1245_s2 + $0x8] sm:$0xff]  ;;  %v543_v58 = vld [vmem:[%s1245_s2 + $0x30] sm:$0xff] }
   0xc   :  { %v562_v48 = vld [vmem:[%s1245_s2 + $0xc8] sm:$0xff]  ;;  %v567_v60 = vld [vmem:[%s1245_s2 + $0xf0] sm:$0xff]  ;;  %v541_v0 = vld [vmem:[%s1245_s2 + $0x20] sm:$0xff] }
   0xd   :  { %v565_v2 = vld [vmem:[%s1245_s2 + $0xe0] sm:$0xff]  ;;  %v544_v6 = vld [vmem:[%s1245_s2 + $0x38] sm:$0xff] }
   0xe   :  { %766 = vmatmul.mubr.msk.bf16.gmra.mrb[4].mxu0 %vm191_vm0, %v818_v7  ;;  %790 = vmatmul.mubr.msk.bf16.gmra.mrb[4].mxu1 %vm191_vm0, %v819_v8  ;;  %v568_v8 = vld [vmem:[%s1245_s2 + $0xf8] sm:$0xff] }
   0xf   :  { %769 = vmatprep.mubr.msk.bf16.mxu0 %vm191_vm0, %v820_v9  ;;  %793 = vmatprep.mubr.msk.bf16.mxu1 %vm191_vm0, %v821_v10 }
  0x16   :  { %770 = vmatmul.mubr.msk.bf16.gmra.mrb[8].mxu0 %vm191_vm0, %v822_v11  ;;  %794 = vmatmul.mubr.msk.bf16.gmra.mrb[8].mxu1 %vm191_vm0, %v823_v12 }
  0x17   :  { %773 = vmatprep.mubr.msk.bf16.mxu0 %vm191_vm0, %v824_v13  ;;  %797 = vmatprep.mubr.msk.bf16.mxu1 %vm191_vm0, %v825_v14  ;;  %v542_v14 = vld [vmem:[%s1245_s2 + $0x28] sm:$0xff] }
  0x1e   :  { %774 = vmatmul.mubr.msk.bf16.gmra.mrb[12].mxu0 %vm191_vm0, %v826_v15  ;;  %798 = vmatmul.mubr.msk.bf16.gmra.mrb[12].mxu1 %vm191_vm0, %v827_v16  ;;  %v566_v16 = vld [vmem:[%s1245_s2 + $0xe8] sm:$0xff] }
  0x1f   :  { %777 = vmatprep.mubr.msk.bf16.mxu0 %vm191_vm0, %v828_v17  ;;  %801 = vmatprep.mubr.msk.bf16.mxu1 %vm191_vm0, %v829_v18 }
  0x26   :  { %778 = vmatmul.mubr.msk.bf16.gmra.mrb[16].mxu0 %vm191_vm0, %v830_v19  ;;  %802 = vmatmul.mubr.msk.bf16.gmra.mrb[16].mxu1 %vm191_vm0, %v831_v20 }
  0x27   :  { %781 = vmatprep.mubr.msk.bf16.mxu0 %vm191_vm0, %v832_v21  ;;  %805 = vmatprep.mubr.msk.bf16.mxu1 %vm191_vm0, %v833_v22 }
  0x2e   :  { %782 = vmatmul.mubr.msk.bf16.gmra.mrb[20].mxu0 %vm191_vm0, %v834_v23  ;;  %806 = vmatmul.mubr.msk.bf16.gmra.mrb[20].mxu1 %vm191_vm0, %v835_v24 }
  0xd9   :  { %v763_v25 = vpop.f32.mrb[0].mxu0  ;;  %v787_v27 = vpop.f32.mrb[0].mxu1 }
  0xda   :  { %v491_v29 = vmax.f32 %v763_v25, 0.0  ;;  %v515_v30 = vmax.f32 %v787_v27, 0.0  ;;  %v298_v31 = vpop.f32.mrb[1].mxu0  ;;  %v394_v33 = vpop.f32.mrb[1].mxu1 }
  0xdb   :  { %v489_v35 = vmax.f32 %v298_v31, 0.0  ;;  %v513_v36 = vmax.f32 %v394_v33, 0.0  ;;  %v764_v37 = vpop.f32.mrb[2].mxu0  ;;  %v788_v39 = vpop.f32.mrb[2].mxu1 }
  0xdc   :  { %v587_v41 = vadd.f32 %v539_v26, %v491_v29  ;;  %v611_v42 = vadd.f32 %v563_v28, %v515_v30  ;;  %v492_v43 = vmax.f32 %v764_v37, 0.0  ;;  %v516_v44 = vmax.f32 %v788_v39, 0.0  ;;  %v301_v45 = vpop.f32.mrb[3].mxu0  ;;  %v397_v47 = vpop.f32.mrb[3].mxu1  ;;  %v547_v26 = vld [vmem:[%s1245_s2 + $0x50] sm:$0xff] }
  0xdd   :  { %v585_v49 = vadd.f32 %v537_v32, %v489_v35  ;;  %v609_v50 = vadd.f32 %v561_v34, %v513_v36  ;;  %v490_v51 = vmax.f32 %v301_v45, 0.0  ;;  %v514_v52 = vmax.f32 %v397_v47, 0.0  ;;  %v571_v28 = vld [vmem:[%s1245_s2 + $0x110] sm:$0xff]  ;;  %v545_v32 = vld [vmem:[%s1245_s2 + $0x40] sm:$0xff] }
  0xde   :  { %635 = vst [vmem:[%s1246_s3 + $0x10] sm:$0xff] %v587_v41  ;;  %659 = vst [vmem:[%s1246_s3 + $0xd0] sm:$0xff] %v611_v42  ;;  %v588_v53 = vadd.f32 %v540_v38, %v492_v43  ;;  %v612_v54 = vadd.f32 %v564_v40, %v516_v44  ;;  %v569_v34 = vld [vmem:[%s1245_s2 + $0x100] sm:$0xff]  ;;  %v548_v38 = vld [vmem:[%s1245_s2 + $0x58] sm:$0xff] }
  0xdf   :  { %633 = vst [vmem:[%s1246_s3] sm:$0xff] %v585_v49  ;;  %657 = vst [vmem:[%s1246_s3 + $0xc0] sm:$0xff] %v609_v50  ;;  %v586_v55 = vadd.f32 %v538_v46, %v490_v51  ;;  %v610_v56 = vadd.f32 %v562_v48, %v514_v52  ;;  %v572_v40 = vld [vmem:[%s1245_s2 + $0x118] sm:$0xff]  ;;  %v546_v46 = vld [vmem:[%s1245_s2 + $0x48] sm:$0xff] }
  0xe0   :  { %636 = vst [vmem:[%s1246_s3 + $0x18] sm:$0xff] %v588_v53  ;;  %660 = vst [vmem:[%s1246_s3 + $0xd8] sm:$0xff] %v612_v54  ;;  %v570_v48 = vld [vmem:[%s1245_s2 + $0x108] sm:$0xff] }
  0xe1   :  { %634 = vst [vmem:[%s1246_s3 + $0x8] sm:$0xff] %v586_v55  ;;  %658 = vst [vmem:[%s1246_s3 + $0xc8] sm:$0xff] %v610_v56  ;;  %v767_v57 = vpop.f32.mrb[4].mxu0  ;;  %v791_v59 = vpop.f32.mrb[4].mxu1 }
  0xe2   :  { %v495_v61 = vmax.f32 %v767_v57, 0.0  ;;  %v519_v62 = vmax.f32 %v791_v59, 0.0  ;;  %v314_v63 = vpop.f32.mrb[5].mxu0  ;;  %v410_v1 = vpop.f32.mrb[5].mxu1 }
  0xe3   :  { %v493_v3 = vmax.f32 %v314_v63, 0.0  ;;  %v517_v4 = vmax.f32 %v410_v1, 0.0  ;;  %v768_v5 = vpop.f32.mrb[6].mxu0  ;;  %v792_v7 = vpop.f32.mrb[6].mxu1 }
  0xe4   :  { %v591_v9 = vadd.f32 %v543_v58, %v495_v61  ;;  %v615_v10 = vadd.f32 %v567_v60, %v519_v62  ;;  %v496_v11 = vmax.f32 %v768_v5, 0.0  ;;  %v520_v12 = vmax.f32 %v792_v7, 0.0  ;;  %v317_v13 = vpop.f32.mrb[7].mxu0  ;;  %v413_v15 = vpop.f32.mrb[7].mxu1  ;;  %v551_v58 = vld [vmem:[%s1245_s2 + $0x70] sm:$0xff] }
  0xe5   :  { %v589_v17 = vadd.f32 %v541_v0, %v493_v3  ;;  %v613_v18 = vadd.f32 %v565_v2, %v517_v4  ;;  %v494_v19 = vmax.f32 %v317_v13, 0.0  ;;  %v518_v20 = vmax.f32 %v413_v15, 0.0  ;;  %v575_v60 = vld [vmem:[%s1245_s2 + $0x130] sm:$0xff]  ;;  %v549_v0 = vld [vmem:[%s1245_s2 + $0x60] sm:$0xff] }
  0xe6   :  { %639 = vst [vmem:[%s1246_s3 + $0x30] sm:$0xff] %v591_v9  ;;  %663 = vst [vmem:[%s1246_s3 + $0xf0] sm:$0xff] %v615_v10  ;;  %v592_v21 = vadd.f32 %v544_v6, %v496_v11  ;;  %v616_v22 = vadd.f32 %v568_v8, %v520_v12  ;;  %v573_v2 = vld [vmem:[%s1245_s2 + $0x120] sm:$0xff]  ;;  %v552_v6 = vld [vmem:[%s1245_s2 + $0x78] sm:$0xff] }
  0xe7   :  { %637 = vst [vmem:[%s1246_s3 + $0x20] sm:$0xff] %v589_v17  ;;  %661 = vst [vmem:[%s1246_s3 + $0xe0] sm:$0xff] %v613_v18  ;;  %v590_v23 = vadd.f32 %v542_v14, %v494_v19  ;;  %v614_v24 = vadd.f32 %v566_v16, %v518_v20  ;;  %v576_v8 = vld [vmem:[%s1245_s2 + $0x138] sm:$0xff]  ;;  %v550_v14 = vld [vmem:[%s1245_s2 + $0x68] sm:$0xff] }
  0xe8   :  { %640 = vst [vmem:[%s1246_s3 + $0x38] sm:$0xff] %v592_v21  ;;  %664 = vst [vmem:[%s1246_s3 + $0xf8] sm:$0xff] %v616_v22  ;;  %v574_v16 = vld [vmem:[%s1245_s2 + $0x128] sm:$0xff] }
  0xe9   :  { %638 = vst [vmem:[%s1246_s3 + $0x28] sm:$0xff] %v590_v23  ;;  %662 = vst [vmem:[%s1246_s3 + $0xe8] sm:$0xff] %v614_v24  ;;  %v771_v25 = vpop.f32.mrb[8].mxu0  ;;  %v795_v27 = vpop.f32.mrb[8].mxu1 }
  0xea   :  { %v499_v29 = vmax.f32 %v771_v25, 0.0  ;;  %v523_v30 = vmax.f32 %v795_v27, 0.0  ;;  %v330_v31 = vpop.f32.mrb[9].mxu0  ;;  %v426_v33 = vpop.f32.mrb[9].mxu1 }
  0xeb   :  { %v497_v35 = vmax.f32 %v330_v31, 0.0  ;;  %v521_v36 = vmax.f32 %v426_v33, 0.0  ;;  %v772_v37 = vpop.f32.mrb[10].mxu0  ;;  %v796_v39 = vpop.f32.mrb[10].mxu1 }
  0xec   :  { %v595_v41 = vadd.f32 %v547_v26, %v499_v29  ;;  %v619_v42 = vadd.f32 %v571_v28, %v523_v30  ;;  %v500_v43 = vmax.f32 %v772_v37, 0.0  ;;  %v524_v44 = vmax.f32 %v796_v39, 0.0  ;;  %v333_v45 = vpop.f32.mrb[11].mxu0  ;;  %v429_v47 = vpop.f32.mrb[11].mxu1  ;;  %v555_v26 = vld [vmem:[%s1245_s2 + $0x90] sm:$0xff] }
  0xed   :  { %v593_v49 = vadd.f32 %v545_v32, %v497_v35  ;;  %v617_v50 = vadd.f32 %v569_v34, %v521_v36  ;;  %v498_v51 = vmax.f32 %v333_v45, 0.0  ;;  %v522_v52 = vmax.f32 %v429_v47, 0.0  ;;  %v579_v28 = vld [vmem:[%s1245_s2 + $0x150] sm:$0xff]  ;;  %v553_v32 = vld [vmem:[%s1245_s2 + $0x80] sm:$0xff] }
  0xee   :  { %643 = vst [vmem:[%s1246_s3 + $0x50] sm:$0xff] %v595_v41  ;;  %667 = vst [vmem:[%s1246_s3 + $0x110] sm:$0xff] %v619_v42  ;;  %v596_v53 = vadd.f32 %v548_v38, %v500_v43  ;;  %v620_v54 = vadd.f32 %v572_v40, %v524_v44  ;;  %v577_v34 = vld [vmem:[%s1245_s2 + $0x140] sm:$0xff]  ;;  %v556_v38 = vld [vmem:[%s1245_s2 + $0x98] sm:$0xff] }
  0xef   :  { %641 = vst [vmem:[%s1246_s3 + $0x40] sm:$0xff] %v593_v49  ;;  %665 = vst [vmem:[%s1246_s3 + $0x100] sm:$0xff] %v617_v50  ;;  %v594_v55 = vadd.f32 %v546_v46, %v498_v51  ;;  %v618_v56 = vadd.f32 %v570_v48, %v522_v52  ;;  %v580_v40 = vld [vmem:[%s1245_s2 + $0x158] sm:$0xff]  ;;  %v554_v46 = vld [vmem:[%s1245_s2 + $0x88] sm:$0xff] }
  0xf0   :  { %644 = vst [vmem:[%s1246_s3 + $0x58] sm:$0xff] %v596_v53  ;;  %668 = vst [vmem:[%s1246_s3 + $0x118] sm:$0xff] %v620_v54  ;;  %v578_v48 = vld [vmem:[%s1245_s2 + $0x148] sm:$0xff] }
  0xf1   :  { %642 = vst [vmem:[%s1246_s3 + $0x48] sm:$0xff] %v594_v55  ;;  %666 = vst [vmem:[%s1246_s3 + $0x108] sm:$0xff] %v618_v56  ;;  %v775_v57 = vpop.f32.mrb[12].mxu0  ;;  %v799_v59 = vpop.f32.mrb[12].mxu1 }
  0xf2   :  { %v503_v61 = vmax.f32 %v775_v57, 0.0  ;;  %v527_v62 = vmax.f32 %v799_v59, 0.0  ;;  %v346_v63 = vpop.f32.mrb[13].mxu0  ;;  %v442_v1 = vpop.f32.mrb[13].mxu1 }
  0xf3   :  { %v501_v3 = vmax.f32 %v346_v63, 0.0  ;;  %v525_v4 = vmax.f32 %v442_v1, 0.0  ;;  %v776_v5 = vpop.f32.mrb[14].mxu0  ;;  %v800_v7 = vpop.f32.mrb[14].mxu1 }
  0xf4   :  { %v599_v9 = vadd.f32 %v551_v58, %v503_v61  ;;  %v623_v10 = vadd.f32 %v575_v60, %v527_v62  ;;  %v504_v11 = vmax.f32 %v776_v5, 0.0  ;;  %v528_v12 = vmax.f32 %v800_v7, 0.0  ;;  %v349_v13 = vpop.f32.mrb[15].mxu0  ;;  %v445_v15 = vpop.f32.mrb[15].mxu1  ;;  %v559_v58 = vld [vmem:[%s1245_s2 + $0xb0] sm:$0xff] }
  0xf5   :  { %v597_v17 = vadd.f32 %v549_v0, %v501_v3  ;;  %v621_v18 = vadd.f32 %v573_v2, %v525_v4  ;;  %v502_v19 = vmax.f32 %v349_v13, 0.0  ;;  %v526_v20 = vmax.f32 %v445_v15, 0.0  ;;  %v583_v60 = vld [vmem:[%s1245_s2 + $0x170] sm:$0xff]  ;;  %v557_v0 = vld [vmem:[%s1245_s2 + $0xa0] sm:$0xff] }
  0xf6   :  { %647 = vst [vmem:[%s1246_s3 + $0x70] sm:$0xff] %v599_v9  ;;  %671 = vst [vmem:[%s1246_s3 + $0x130] sm:$0xff] %v623_v10  ;;  %v600_v21 = vadd.f32 %v552_v6, %v504_v11  ;;  %v624_v22 = vadd.f32 %v576_v8, %v528_v12  ;;  %v581_v2 = vld [vmem:[%s1245_s2 + $0x160] sm:$0xff]  ;;  %v560_v6 = vld [vmem:[%s1245_s2 + $0xb8] sm:$0xff] }
  0xf7   :  { %645 = vst [vmem:[%s1246_s3 + $0x60] sm:$0xff] %v597_v17  ;;  %669 = vst [vmem:[%s1246_s3 + $0x120] sm:$0xff] %v621_v18  ;;  %v598_v23 = vadd.f32 %v550_v14, %v502_v19  ;;  %v622_v24 = vadd.f32 %v574_v16, %v526_v20  ;;  %v584_v8 = vld [vmem:[%s1245_s2 + $0x178] sm:$0xff]  ;;  %v558_v14 = vld [vmem:[%s1245_s2 + $0xa8] sm:$0xff] }
  0xf8   :  { %648 = vst [vmem:[%s1246_s3 + $0x78] sm:$0xff] %v600_v21  ;;  %672 = vst [vmem:[%s1246_s3 + $0x138] sm:$0xff] %v624_v22  ;;  %v582_v16 = vld [vmem:[%s1245_s2 + $0x168] sm:$0xff] }
  0xf9   :  { %646 = vst [vmem:[%s1246_s3 + $0x68] sm:$0xff] %v598_v23  ;;  %670 = vst [vmem:[%s1246_s3 + $0x128] sm:$0xff] %v622_v24  ;;  %v779_v25 = vpop.f32.mrb[16].mxu0  ;;  %v803_v27 = vpop.f32.mrb[16].mxu1 }
  0xfa   :  { %v507_v29 = vmax.f32 %v779_v25, 0.0  ;;  %v531_v30 = vmax.f32 %v803_v27, 0.0  ;;  %v362_v31 = vpop.f32.mrb[17].mxu0  ;;  %v458_v33 = vpop.f32.mrb[17].mxu1 }
  0xfb   :  { %v505_v35 = vmax.f32 %v362_v31, 0.0  ;;  %v529_v36 = vmax.f32 %v458_v33, 0.0  ;;  %v780_v37 = vpop.f32.mrb[18].mxu0  ;;  %v804_v39 = vpop.f32.mrb[18].mxu1 }
  0xfc   :  { %v603_v41 = vadd.f32 %v555_v26, %v507_v29  ;;  %v627_v42 = vadd.f32 %v579_v28, %v531_v30  ;;  %v508_v43 = vmax.f32 %v780_v37, 0.0  ;;  %v532_v44 = vmax.f32 %v804_v39, 0.0  ;;  %v365_v45 = vpop.f32.mrb[19].mxu0  ;;  %v461_v47 = vpop.f32.mrb[19].mxu1 }
  0xfd   :  { %v601_v49 = vadd.f32 %v553_v32, %v505_v35  ;;  %v625_v50 = vadd.f32 %v577_v34, %v529_v36  ;;  %v506_v51 = vmax.f32 %v365_v45, 0.0  ;;  %v530_v52 = vmax.f32 %v461_v47, 0.0 }
  0xfe   :  { %651 = vst [vmem:[%s1246_s3 + $0x90] sm:$0xff] %v603_v41  ;;  %675 = vst [vmem:[%s1246_s3 + $0x150] sm:$0xff] %v627_v42  ;;  %v604_v53 = vadd.f32 %v556_v38, %v508_v43  ;;  %v628_v54 = vadd.f32 %v580_v40, %v532_v44 }
  0xff   :  { %649 = vst [vmem:[%s1246_s3 + $0x80] sm:$0xff] %v601_v49  ;;  %673 = vst [vmem:[%s1246_s3 + $0x140] sm:$0xff] %v625_v50  ;;  %v602_v55 = vadd.f32 %v554_v46, %v506_v51  ;;  %v626_v56 = vadd.f32 %v578_v48, %v530_v52 }
 0x100   :  { %652 = vst [vmem:[%s1246_s3 + $0x98] sm:$0xff] %v604_v53  ;;  %676 = vst [vmem:[%s1246_s3 + $0x158] sm:$0xff] %v628_v54 }
 0x101   :  { %650 = vst [vmem:[%s1246_s3 + $0x88] sm:$0xff] %v602_v55  ;;  %674 = vst [vmem:[%s1246_s3 + $0x148] sm:$0xff] %v626_v56  ;;  %v783_v57 = vpop.f32.mrb[20].mxu0  ;;  %v807_v59 = vpop.f32.mrb[20].mxu1 }
 0x102   :  { %v511_v61 = vmax.f32 %v783_v57, 0.0  ;;  %v535_v62 = vmax.f32 %v807_v59, 0.0  ;;  %v378_v63 = vpop.f32.mrb[21].mxu0  ;;  %v474_v1 = vpop.f32.mrb[21].mxu1 }
 0x103   :  { %v509_v3 = vmax.f32 %v378_v63, 0.0  ;;  %v533_v4 = vmax.f32 %v474_v1, 0.0  ;;  %v784_v5 = vpop.f32.mrb[22].mxu0  ;;  %v808_v7 = vpop.f32.mrb[22].mxu1 }
 0x104   :  { %v607_v9 = vadd.f32 %v559_v58, %v511_v61  ;;  %v631_v10 = vadd.f32 %v583_v60, %v535_v62  ;;  %v512_v11 = vmax.f32 %v784_v5, 0.0  ;;  %v536_v12 = vmax.f32 %v808_v7, 0.0  ;;  %v381_v13 = vpop.f32.mrb[23].mxu0  ;;  %v477_v15 = vpop.f32.mrb[23].mxu1 }
 0x105   :  { %v605_v17 = vadd.f32 %v557_v0, %v509_v3  ;;  %v629_v18 = vadd.f32 %v581_v2, %v533_v4  ;;  %v510_v19 = vmax.f32 %v381_v13, 0.0  ;;  %v534_v20 = vmax.f32 %v477_v15, 0.0 }
 0x106   :  { %655 = vst [vmem:[%s1246_s3 + $0xb0] sm:$0xff] %v607_v9  ;;  %679 = vst [vmem:[%s1246_s3 + $0x170] sm:$0xff] %v631_v10  ;;  %v608_v21 = vadd.f32 %v560_v6, %v512_v11  ;;  %v632_v22 = vadd.f32 %v584_v8, %v536_v12 }
 0x107   :  { %653 = vst [vmem:[%s1246_s3 + $0xa0] sm:$0xff] %v605_v17  ;;  %677 = vst [vmem:[%s1246_s3 + $0x160] sm:$0xff] %v629_v18  ;;  %v606_v23 = vadd.f32 %v558_v14, %v510_v19  ;;  %v630_v24 = vadd.f32 %v582_v16, %v534_v20 }
 0x108   :  { %656 = vst [vmem:[%s1246_s3 + $0xb8] sm:$0xff] %v608_v21  ;;  %680 = vst [vmem:[%s1246_s3 + $0x178] sm:$0xff] %v632_v22 }
 0x109   :  { %654 = vst [vmem:[%s1246_s3 + $0xa8] sm:$0xff] %v606_v23  ;;  %678 = vst [vmem:[%s1246_s3 + $0x168] sm:$0xff] %v630_v24 }

// kernel: uresnet_forward.23
= control target key start
LH: loop header
LB: loop body
LE: loop exit
PB: predicated region body
PF: predicated region fallthrough
CT: control target
= control target key end

     0   :  { %s1124_s9 = smov 0   ;;  %s1280_s0 = inlined_call_operand.vmem [shape: bf16[1536,8], index: 0, kind: input, shape index: {}]   ;;  %s1281_s1 = inlined_call_operand.vmem [shape: bf16[8,128], index: 1, kind: input, shape index: {}]   ;;  %s1282_s2 = inlined_call_operand.vmem [shape: f32[1536,128], index: 2, kind: output, shape index: {}]  }
   0x1 LB: > { %s883_s10 = sadd.s32 4294967295, %s1107_s9   ;;  %p887_p0 = scmp.ge.s32.totalorder %s1107_s9, 1  ;;  %s1107_s9 = sphi %s1124_s9, %s12_s9  }
   0x2   : > { %p113_p1 = scmp.lt.s32.totalorder %s1107_s9, 4 }
   0x4   : > { %p114_p2 = pnand %p887_p0, %p113_p1 }
   0x5   : > { %v212_v0 = vld [vmem:[%s1281_s1] sm:$0xf] (!%p114_p2)  ;;  %vm470_vm0 = vcmask (!%p114_p2), 1043456   ;;  %s888_s13 = sshll.u32 (!%p114_p2), %s883_s10, 6  ;;  %vm373_vm1 = vcmask (!%p114_p2), 64512  }
   0x6   : > { %117 = sbr.rel (%p114_p2) target bundleno = 291 (0x123), region = 28  ;;  %1059 = vmatprep.subr.msk.bf16.mxu0 (!%p114_p2), %vm470_vm0, %v212_v0  ;;  %1060 = vmatprep.subr.msk.bf16.mxu1 (!%p114_p2), %vm470_vm0, %v212_v0  ;;  %v472_v1 = vsel (!%p114_p2), %vm470_vm0, %v212_v0, 0  ;;  %p136_p3 = scmp.lt.s32.totalorder (!%p114_p2), %s888_s13, 191 }
   0x7   : > { %992 = vmatpush3.bf16.msra.mxu0 (!%p114_p2), %v472_v1  ;;  %1058 = vmatpush3.bf16.msra.mxu1 (!%p114_p2), %v472_v1 }
   0xd   : > { %s1284_s13 = smov (!%p136_p3, %s888_s13), 191 }
   0xe   : > { %s889_s14 = sshll.u32 %s1284_s13, 2  ;;  %s891_s18 = sshll.u32 %s1284_s13, 3 }
   0xf   : > { %s1141_s17 = scalar_lea.vmem %s1280_s0, %s889_s14  ;;  %s1211_s21 = scalar_lea.vmem %s1282_s2, %s891_s18 }
  0x10   : > { %v1069_v2 = vld [vmem:[%s1141_s17] sm:$0xff]   ;;  %v1071_v4 = vld [vmem:[%s1141_s17 + $0x8] sm:$0xff]   ;;  %v1073_v6 = vld [vmem:[%s1141_s17 + $0x10] sm:$0xff]  }
  0x11   : > { %v1070_v3 = vld [vmem:[%s1141_s17 + $0x80] sm:$0xff]   ;;  %993 = vmatprep.mubr.msk.bf16.mxu0 %vm373_vm1, %v1069_v2  ;;  %v1072_v5 = vld [vmem:[%s1141_s17 + $0x88] sm:$0xff]   ;;  %v1074_v7 = vld [vmem:[%s1141_s17 + $0x90] sm:$0xff]  }
  0x12   : > { %1025 = vmatprep.mubr.msk.bf16.mxu1 %vm373_vm1, %v1070_v3  ;;  %994 = vmatmul.mubr.msk.bf16.vlgmr.msra.gmra.mrb[0].mxu0 %vm373_vm1, %v1071_v4  ;;  %v1075_v8 = vld [vmem:[%s1141_s17 + $0x18] sm:$0xff]   ;;  %v1077_v10 = vld [vmem:[%s1141_s17 + $0x20] sm:$0xff]   ;;  %v1079_v12 = vld [vmem:[%s1141_s17 + $0x28] sm:$0xff]  }
  0x13   : > { %1026 = vmatmul.mubr.msk.bf16.vlgmr.msra.gmra.mrb[0].mxu1 %vm373_vm1, %v1072_v5  ;;  %997 = vmatprep.mubr.msk.bf16.mxu0 %vm373_vm1, %v1073_v6  ;;  %v1076_v9 = vld [vmem:[%s1141_s17 + $0x98] sm:$0xff]   ;;  %v1078_v11 = vld [vmem:[%s1141_s17 + $0xa0] sm:$0xff]   ;;  %v1080_v13 = vld [vmem:[%s1141_s17 + $0xa8] sm:$0xff]  }
  0x14   : > { %1029 = vmatprep.mubr.msk.bf16.mxu1 %vm373_vm1, %v1074_v7  ;;  %v1081_v14 = vld [vmem:[%s1141_s17 + $0x30] sm:$0xff]   ;;  %v1083_v16 = vld [vmem:[%s1141_s17 + $0x38] sm:$0xff]   ;;  %v1085_v18 = vld [vmem:[%s1141_s17 + $0x40] sm:$0xff]  }
  0x15   : > { %v1082_v15 = vld [vmem:[%s1141_s17 + $0xb0] sm:$0xff]   ;;  %v1084_v17 = vld [vmem:[%s1141_s17 + $0xb8] sm:$0xff]   ;;  %v1086_v19 = vld [vmem:[%s1141_s17 + $0xc0] sm:$0xff]  }
  0x16   : > { %v1087_v20 = vld [vmem:[%s1141_s17 + $0x48] sm:$0xff]   ;;  %v1089_v22 = vld [vmem:[%s1141_s17 + $0x50] sm:$0xff]   ;;  %v1091_v24 = vld [vmem:[%s1141_s17 + $0x58] sm:$0xff]  }
  0x17   : > { %v1088_v21 = vld [vmem:[%s1141_s17 + $0xc8] sm:$0xff]   ;;  %v1090_v23 = vld [vmem:[%s1141_s17 + $0xd0] sm:$0xff]   ;;  %v1092_v25 = vld [vmem:[%s1141_s17 + $0xd8] sm:$0xff]  }
  0x18   : > { %v1093_v26 = vld [vmem:[%s1141_s17 + $0x60] sm:$0xff]   ;;  %v1095_v28 = vld [vmem:[%s1141_s17 + $0x68] sm:$0xff]   ;;  %v1097_v30 = vld [vmem:[%s1141_s17 + $0x70] sm:$0xff]  }
  0x19   : > { %v1094_v27 = vld [vmem:[%s1141_s17 + $0xe0] sm:$0xff]   ;;  %v1096_v29 = vld [vmem:[%s1141_s17 + $0xe8] sm:$0xff]   ;;  %v1098_v31 = vld [vmem:[%s1141_s17 + $0xf0] sm:$0xff]  }
  0x1a   : > { %998 = vmatmul.mubr.msk.bf16.gmra.mrb[4].mxu0 %vm373_vm1, %v1075_v8  ;;  %v1099_v32 = vld [vmem:[%s1141_s17 + $0x78] sm:$0xff]  }
  0x1b   : > { %1030 = vmatmul.mubr.msk.bf16.gmra.mrb[4].mxu1 %vm373_vm1, %v1076_v9  ;;  %1001 = vmatprep.mubr.msk.bf16.mxu0 %vm373_vm1, %v1077_v10  ;;  %v1100_v33 = vld [vmem:[%s1141_s17 + $0xf8] sm:$0xff]  }
  0x1c   : > { %1033 = vmatprep.mubr.msk.bf16.mxu1 %vm373_vm1, %v1078_v11 }
  0x22   : > { %1002 = vmatmul.mubr.msk.bf16.gmra.mrb[8].mxu0 %vm373_vm1, %v1079_v12 }
  0x23   : > { %1034 = vmatmul.mubr.msk.bf16.gmra.mrb[8].mxu1 %vm373_vm1, %v1080_v13  ;;  %1005 = vmatprep.mubr.msk.bf16.mxu0 %vm373_vm1, %v1081_v14 }
  0x24   : > { %1037 = vmatprep.mubr.msk.bf16.mxu1 %vm373_vm1, %v1082_v15 }
  0x2a   : > { %1006 = vmatmul.mubr.msk.bf16.gmra.mrb[12].mxu0 %vm373_vm1, %v1083_v16 }
  0x2b   : > { %1038 = vmatmul.mubr.msk.bf16.gmra.mrb[12].mxu1 %vm373_vm1, %v1084_v17  ;;  %1009 = vmatprep.mubr.msk.bf16.mxu0 %vm373_vm1, %v1085_v18 }
  0x2c   : > { %1041 = vmatprep.mubr.msk.bf16.mxu1 %vm373_vm1, %v1086_v19 }
  0x32   : > { %1010 = vmatmul.mubr.msk.bf16.gmra.mrb[16].mxu0 %vm373_vm1, %v1087_v20 }
  0x33   : > { %1042 = vmatmul.mubr.msk.bf16.gmra.mrb[16].mxu1 %vm373_vm1, %v1088_v21  ;;  %1013 = vmatprep.mubr.msk.bf16.mxu0 %vm373_vm1, %v1089_v22 }
  0x34   : > { %1045 = vmatprep.mubr.msk.bf16.mxu1 %vm373_vm1, %v1090_v23 }
  0x3a   : > { %1014 = vmatmul.mubr.msk.bf16.gmra.mrb[20].mxu0 %vm373_vm1, %v1091_v24 }
  0x3b   : > { %1046 = vmatmul.mubr.msk.bf16.gmra.mrb[20].mxu1 %vm373_vm1, %v1092_v25  ;;  %1017 = vmatprep.mubr.msk.bf16.mxu0 %vm373_vm1, %v1093_v26 }
  0x3c   : > { %1049 = vmatprep.mubr.msk.bf16.mxu1 %vm373_vm1, %v1094_v27 }
  0x42   : > { %1018 = vmatmul.mubr.msk.bf16.gmra.mrb[24].mxu0 %vm373_vm1, %v1095_v28 }
  0x43   : > { %1050 = vmatmul.mubr.msk.bf16.gmra.mrb[24].mxu1 %vm373_vm1, %v1096_v29  ;;  %1021 = vmatprep.mubr.msk.bf16.mxu0 %vm373_vm1, %v1097_v30 }
  0x44   : > { %1053 = vmatprep.mubr.msk.bf16.mxu1 %vm373_vm1, %v1098_v31 }
  0x4a   : > { %1022 = vmatmul.mubr.msk.bf16.gmra.mrb[28].mxu0 %vm373_vm1, %v1099_v32 }
  0x4b   : > { %1054 = vmatmul.mubr.msk.bf16.gmra.mrb[28].mxu1 %vm373_vm1, %v1100_v33 }
  0xe5   : > { %v995_v34 = vpop.f32.mrb[0].mxu0 }
  0xe6   : > { %765 = vst [vmem:[%s1211_s21 + $0x10] sm:$0xff] %v995_v34  ;;  %v1027_v35 = vpop.f32.mrb[0].mxu1  ;;  %v508_v36 = vpop.f32.mrb[1].mxu0 }
  0xe7   : > { %797 = vst [vmem:[%s1211_s21 + $0x110] sm:$0xff] %v1027_v35  ;;  %763 = vst [vmem:[%s1211_s21] sm:$0xff] %v508_v36  ;;  %v636_v37 = vpop.f32.mrb[1].mxu1  ;;  %v996_v38 = vpop.f32.mrb[2].mxu0 }
  0xe8   : > { %795 = vst [vmem:[%s1211_s21 + $0x100] sm:$0xff] %v636_v37  ;;  %766 = vst [vmem:[%s1211_s21 + $0x18] sm:$0xff] %v996_v38  ;;  %v1028_v39 = vpop.f32.mrb[2].mxu1  ;;  %v511_v40 = vpop.f32.mrb[3].mxu0 }
  0xe9   : > { %798 = vst [vmem:[%s1211_s21 + $0x118] sm:$0xff] %v1028_v39  ;;  %764 = vst [vmem:[%s1211_s21 + $0x8] sm:$0xff] %v511_v40  ;;  %v639_v41 = vpop.f32.mrb[3].mxu1 }
  0xea   : > { %796 = vst [vmem:[%s1211_s21 + $0x108] sm:$0xff] %v639_v41 }
  0xed   : > { %v999_v42 = vpop.f32.mrb[4].mxu0 }
  0xee   : > { %769 = vst [vmem:[%s1211_s21 + $0x30] sm:$0xff] %v999_v42  ;;  %v1031_v43 = vpop.f32.mrb[4].mxu1  ;;  %v524_v44 = vpop.f32.mrb[5].mxu0 }
  0xef   : > { %801 = vst [vmem:[%s1211_s21 + $0x130] sm:$0xff] %v1031_v43  ;;  %767 = vst [vmem:[%s1211_s21 + $0x20] sm:$0xff] %v524_v44  ;;  %v652_v45 = vpop.f32.mrb[5].mxu1  ;;  %v1000_v46 = vpop.f32.mrb[6].mxu0 }
  0xf0   : > { %799 = vst [vmem:[%s1211_s21 + $0x120] sm:$0xff] %v652_v45  ;;  %770 = vst [vmem:[%s1211_s21 + $0x38] sm:$0xff] %v1000_v46  ;;  %v1032_v47 = vpop.f32.mrb[6].mxu1  ;;  %v527_v48 = vpop.f32.mrb[7].mxu0 }
  0xf1   : > { %802 = vst [vmem:[%s1211_s21 + $0x138] sm:$0xff] %v1032_v47  ;;  %768 = vst [vmem:[%s1211_s21 + $0x28] sm:$0xff] %v527_v48  ;;  %v655_v49 = vpop.f32.mrb[7].mxu1 }
  0xf2   : > { %800 = vst [vmem:[%s1211_s21 + $0x128] sm:$0xff] %v655_v49 }
  0xf5   : > { %v1003_v50 = vpop.f32.mrb[8].mxu0 }
  0xf6   : > { %773 = vst [vmem:[%s1211_s21 + $0x50] sm:$0xff] %v1003_v50  ;;  %v1035_v51 = vpop.f32.mrb[8].mxu1  ;;  %v540_v52 = vpop.f32.mrb[9].mxu0 }
  0xf7   : > { %805 = vst [vmem:[%s1211_s21 + $0x150] sm:$0xff] %v1035_v51  ;;  %771 = vst [vmem:[%s1211_s21 + $0x40] sm:$0xff] %v540_v52  ;;  %v668_v53 = vpop.f32.mrb[9].mxu1  ;;  %v1004_v54 = vpop.f32.mrb[10].mxu0 }
  0xf8   : > { %803 = vst [vmem:[%s1211_s21 + $0x140] sm:$0xff] %v668_v53  ;;  %774 = vst [vmem:[%s1211_s21 + $0x58] sm:$0xff] %v1004_v54  ;;  %v1036_v55 = vpop.f32.mrb[10].mxu1  ;;  %v543_v56 = vpop.f32.mrb[11].mxu0 }
  0xf9   : > { %806 = vst [vmem:[%s1211_s21 + $0x158] sm:$0xff] %v1036_v55  ;;  %772 = vst [vmem:[%s1211_s21 + $0x48] sm:$0xff] %v543_v56  ;;  %v671_v57 = vpop.f32.mrb[11].mxu1 }
  0xfa   : > { %804 = vst [vmem:[%s1211_s21 + $0x148] sm:$0xff] %v671_v57 }
  0xfd   : > { %v1007_v58 = vpop.f32.mrb[12].mxu0 }
  0xfe   : > { %777 = vst [vmem:[%s1211_s21 + $0x70] sm:$0xff] %v1007_v58  ;;  %v1039_v59 = vpop.f32.mrb[12].mxu1  ;;  %v556_v60 = vpop.f32.mrb[13].mxu0 }
  0xff   : > { %809 = vst [vmem:[%s1211_s21 + $0x170] sm:$0xff] %v1039_v59  ;;  %775 = vst [vmem:[%s1211_s21 + $0x60] sm:$0xff] %v556_v60  ;;  %v684_v61 = vpop.f32.mrb[13].mxu1  ;;  %v1008_v62 = vpop.f32.mrb[14].mxu0 }
 0x100   : > { %807 = vst [vmem:[%s1211_s21 + $0x160] sm:$0xff] %v684_v61  ;;  %778 = vst [vmem:[%s1211_s21 + $0x78] sm:$0xff] %v1008_v62  ;;  %v1040_v63 = vpop.f32.mrb[14].mxu1  ;;  %v559_v0 = vpop.f32.mrb[15].mxu0 }
 0x101   : > { %810 = vst [vmem:[%s1211_s21 + $0x178] sm:$0xff] %v1040_v63  ;;  %776 = vst [vmem:[%s1211_s21 + $0x68] sm:$0xff] %v559_v0  ;;  %v687_v1 = vpop.f32.mrb[15].mxu1 }
 0x102   : > { %808 = vst [vmem:[%s1211_s21 + $0x168] sm:$0xff] %v687_v1 }
 0x105   : > { %v1011_v2 = vpop.f32.mrb[16].mxu0 }
 0x106   : > { %781 = vst [vmem:[%s1211_s21 + $0x90] sm:$0xff] %v1011_v2  ;;  %v1043_v3 = vpop.f32.mrb[16].mxu1  ;;  %v572_v4 = vpop.f32.mrb[17].mxu0 }
 0x107   : > { %813 = vst [vmem:[%s1211_s21 + $0x190] sm:$0xff] %v1043_v3  ;;  %779 = vst [vmem:[%s1211_s21 + $0x80] sm:$0xff] %v572_v4  ;;  %v700_v5 = vpop.f32.mrb[17].mxu1  ;;  %v1012_v6 = vpop.f32.mrb[18].mxu0 }
 0x108   : > { %811 = vst [vmem:[%s1211_s21 + $0x180] sm:$0xff] %v700_v5  ;;  %782 = vst [vmem:[%s1211_s21 + $0x98] sm:$0xff] %v1012_v6  ;;  %v1044_v7 = vpop.f32.mrb[18].mxu1  ;;  %v575_v8 = vpop.f32.mrb[19].mxu0 }
 0x109   : > { %814 = vst [vmem:[%s1211_s21 + $0x198] sm:$0xff] %v1044_v7  ;;  %780 = vst [vmem:[%s1211_s21 + $0x88] sm:$0xff] %v575_v8  ;;  %v703_v9 = vpop.f32.mrb[19].mxu1 }
 0x10a   : > { %812 = vst [vmem:[%s1211_s21 + $0x188] sm:$0xff] %v703_v9 }
 0x10d   : > { %v1015_v10 = vpop.f32.mrb[20].mxu0 }
 0x10e   : > { %785 = vst [vmem:[%s1211_s21 + $0xb0] sm:$0xff] %v1015_v10  ;;  %v1047_v11 = vpop.f32.mrb[20].mxu1  ;;  %v588_v12 = vpop.f32.mrb[21].mxu0 }
 0x10f   : > { %817 = vst [vmem:[%s1211_s21 + $0x1b0] sm:$0xff] %v1047_v11  ;;  %783 = vst [vmem:[%s1211_s21 + $0xa0] sm:$0xff] %v588_v12  ;;  %v716_v13 = vpop.f32.mrb[21].mxu1  ;;  %v1016_v14 = vpop.f32.mrb[22].mxu0 }
 0x110   : > { %815 = vst [vmem:[%s1211_s21 + $0x1a0] sm:$0xff] %v716_v13  ;;  %786 = vst [vmem:[%s1211_s21 + $0xb8] sm:$0xff] %v1016_v14  ;;  %v1048_v15 = vpop.f32.mrb[22].mxu1  ;;  %v591_v16 = vpop.f32.mrb[23].mxu0 }
 0x111   : > { %818 = vst [vmem:[%s1211_s21 + $0x1b8] sm:$0xff] %v1048_v15  ;;  %784 = vst [vmem:[%s1211_s21 + $0xa8] sm:$0xff] %v591_v16  ;;  %v719_v17 = vpop.f32.mrb[23].mxu1 }
 0x112   : > { %816 = vst [vmem:[%s1211_s21 + $0x1a8] sm:$0xff] %v719_v17 }
 0x115   : > { %v1019_v18 = vpop.f32.mrb[24].mxu0 }
 0x116   : > { %789 = vst [vmem:[%s1211_s21 + $0xd0] sm:$0xff] %v1019_v18  ;;  %v1051_v19 = vpop.f32.mrb[24].mxu1  ;;  %v604_v20 = vpop.f32.mrb[25].mxu0 }
 0x117   : > { %821 = vst [vmem:[%s1211_s21 + $0x1d0] sm:$0xff] %v1051_v19  ;;  %787 = vst [vmem:[%s1211_s21 + $0xc0] sm:$0xff] %v604_v20  ;;  %v732_v21 = vpop.f32.mrb[25].mxu1  ;;  %v1020_v22 = vpop.f32.mrb[26].mxu0 }
 0x118   : > { %819 = vst [vmem:[%s1211_s21 + $0x1c0] sm:$0xff] %v732_v21  ;;  %790 = vst [vmem:[%s1211_s21 + $0xd8] sm:$0xff] %v1020_v22  ;;  %v1052_v23 = vpop.f32.mrb[26].mxu1  ;;  %v607_v24 = vpop.f32.mrb[27].mxu0 }
 0x119   : > { %822 = vst [vmem:[%s1211_s21 + $0x1d8] sm:$0xff] %v1052_v23  ;;  %788 = vst [vmem:[%s1211_s21 + $0xc8] sm:$0xff] %v607_v24  ;;  %v735_v25 = vpop.f32.mrb[27].mxu1 }
 0x11a   : > { %820 = vst [vmem:[%s1211_s21 + $0x1c8] sm:$0xff] %v735_v25 }
 0x11d   : > { %v1023_v26 = vpop.f32.mrb[28].mxu0 }
 0x11e   : > { %793 = vst [vmem:[%s1211_s21 + $0xf0] sm:$0xff] %v1023_v26  ;;  %v1055_v27 = vpop.f32.mrb[28].mxu1  ;;  %v620_v28 = vpop.f32.mrb[29].mxu0 }
 0x11f   : > { %825 = vst [vmem:[%s1211_s21 + $0x1f0] sm:$0xff] %v1055_v27  ;;  %791 = vst [vmem:[%s1211_s21 + $0xe0] sm:$0xff] %v620_v28  ;;  %v748_v29 = vpop.f32.mrb[29].mxu1  ;;  %v1024_v30 = vpop.f32.mrb[30].mxu0 }
 0x120   : > { %823 = vst [vmem:[%s1211_s21 + $0x1e0] sm:$0xff] %v748_v29  ;;  %794 = vst [vmem:[%s1211_s21 + $0xf8] sm:$0xff] %v1024_v30  ;;  %v1056_v31 = vpop.f32.mrb[30].mxu1  ;;  %v623_v32 = vpop.f32.mrb[31].mxu0 }
 0x121   : > { %826 = vst [vmem:[%s1211_s21 + $0x1f8] sm:$0xff] %v1056_v31  ;;  %792 = vst [vmem:[%s1211_s21 + $0xe8] sm:$0xff] %v623_v32  ;;  %v751_v33 = vpop.f32.mrb[31].mxu1 }
 0x122   : > { %824 = vst [vmem:[%s1211_s21 + $0x1e8] sm:$0xff] %v751_v33 }
 0x123 PF: > { %s12_s9 = sadd.s32 1, %s1107_s9  }
 0x124   : > { %p9_p4 = scmp.ge.s32.totalorder %s12_s9, 5  }
 0x126   :  { %11 = sbr.rel (!%p9_p4) target bundleno = 1 (0x1), region = 58 }

</bundles_post_ra>
